<compile_context>
chip_gen: v7x
topology: tpu7x:2x2x1
jax: 0.10.0
libtpu: 0.0.40
codegen_flags: <defaults>
</compile_context>

<pallas_src>
import numpy as np
import jax
import jax.numpy as jnp
from jax import lax
from jax.experimental import pallas as pl
from jax.experimental.pallas import tpu as pltpu

BN_EPS = 1e-5
LANE = 128
SUBLANE = 8


def _round_up(x, m):
    return ((x + m - 1) // m) * m


# ----------------------------- in-kernel helpers ---------------------------- #

def _scatter_taps(z, *, kh, cp, h_in, h_out, h_out_pad, stride, pad):
    """Scatter per-tap channel-mixed slabs into the transposed-conv output rows.

    z : (h_in_rows, kh*cp) value; lane slab k holds  X @ W_k  (lane-aligned).
    Returns y : (h_out_pad, cp) with rows >= h_out exactly zero.
    """
    if h_in == 1:
        # Each tap lands on exactly one static output row: pure VPU selects,
        # no scatter matmul at all (layer 1 of the generator).
        rows = lax.broadcasted_iota(jnp.int32, (h_out_pad, cp), 0)
        y = jnp.zeros((h_out_pad, cp), jnp.float32)
        for k in range(kh):
            target = k - pad
            if 0 <= target < h_out:
                zk = jnp.broadcast_to(z[0:1, k * cp:(k + 1) * cp], (h_out_pad, cp))
                y = y + jnp.where(rows == target, zk, 0.0)
        return y

    # General case: per-tap 0/1 scatter matrix built in-kernel from iotas.
    # Nothing is DMA'd from HBM and nothing scales with the batch size.
    h_rows = z.shape[0]
    ho = lax.broadcasted_iota(jnp.int32, (h_out_pad, h_rows), 0)
    hi = lax.broadcasted_iota(jnp.int32, (h_out_pad, h_rows), 1)
    valid = (hi < h_in) & (ho < h_out)
    y = jnp.zeros((h_out_pad, cp), jnp.float32)
    for k in range(kh):
        sk = jnp.where(valid & (ho == stride * hi + (k - pad)), 1.0, 0.0)
        y = y + jnp.dot(sk, z[:, k * cp:(k + 1) * cp],
                        preferred_element_type=jnp.float32)
    return y


def _batchnorm_relu(ys, *, h_out, gamma, beta):
    """Training-mode BatchNorm2d (biased batch stats over N*H rows) + ReLU.

    ys    : list (length N) of (h_pad, cp) values; rows >= h_out are zero.
    gamma : (1, cp) scale (zero on padded channels).
    beta  : (1, cp) shift (zero on padded channels).
    """
    n = len(ys)
    h_pad, cp = ys[0].shape
    inv_count = 1.0 / float(n * h_out)
    mean = sum(jnp.sum(y, axis=0, keepdims=True) for y in ys) * inv_count
    rows = lax.broadcasted_iota(jnp.int32, (h_pad, cp), 0)
    row_mask = rows < h_out
    devs = [jnp.where(row_mask, y - mean, 0.0) for y in ys]     # two-pass stats
    var = sum(jnp.sum(d * d, axis=0, keepdims=True) for d in devs) * inv_count
    scale = lax.rsqrt(var + BN_EPS) * gamma
    return [jnp.maximum(d * scale + beta, 0.0) for d in devs]


# ------------------------------ parameters --------------------------------- #

def init_generator(key, in_dim, hidden_num=64, out_dim=6):
    """Build padded, MXU/DMA-friendly parameters (plus raw ones for reference)."""
    # (C_in, C_out, kH, stride, pad); kW is always 1 except the final layer.
    layer_cfgs = [
        (in_dim,         hidden_num * 8, 5, 1, 0),
        (hidden_num * 8, hidden_num * 4, 4, 2, 1),
        (hidden_num * 4, hidden_num * 2, 8, 1, 1),
        (hidden_num * 2, hidden_num,     4, 2, 1),
    ]
    cp_list = [_round_up(co, LANE) for (_, co, _, _, _) in layer_cfgs]
    max_cp = max(cp_list)

    w_cats, raw_layers = [], []
    gb = np.zeros((2 * len(layer_cfgs), max_cp), np.float32)
    for l, cfg in enumerate(layer_cfgs):
        ci, co, kh, s, p = cfg
        key, kw, kg, kb = jax.random.split(key, 4)
        cp = cp_list[l]
        ci_pad = in_dim if l == 0 else cp_list[l - 1]
        # PyTorch ConvTranspose2d weight layout: (in_ch, out_ch, kH, kW=1).
        w = (np.asarray(jax.random.normal(kw, (ci, co, kh, 1), jnp.float32))
             * 0.05).astype(np.float32)
        gamma = (1.0 + 0.1 * np.asarray(
            jax.random.normal(kg, (co,), jnp.float32))).astype(np.float32)
        beta = (0.1 * np.asarray(
            jax.random.normal(kb, (co,), jnp.float32))).astype(np.float32)
        raw_layers.append((w, gamma, beta, cfg))

        # Wide fused weight: tap k occupies lane slab [k*cp, k*cp + co); padded
        # input-channel rows and padded output-channel lanes are exact zeros.
        w_cat = np.zeros((ci_pad, kh * cp), np.float32)
        for k in range(kh):
            w_cat[:ci, k * cp:k * cp + co] = w[:, :, k, 0]
        w_cats.append(jnp.asarray(w_cat))
        gb[2 * l, :co] = gamma          # gamma/beta stay 0 on padded channels
        gb[2 * l + 1, :co] = beta

    key, kwf = jax.random.split(key)
    # Final ConvTranspose2d weight: (in_ch=hidden, out_ch=1, 1, out_dim).
    wf_raw = (np.asarray(jax.random.normal(kwf, (hidden_num, 1, 1, out_dim),
                                           jnp.float32)) * 0.05).astype(np.float32)
    out_lanes = _round_up(out_dim, LANE)                 # lane-dense output slab
    wf = np.zeros((cp_list[-1], out_lanes), np.float32)
    wf[:hidden_num, :out_dim] = wf_raw[:, 0, 0, :]

    params = dict(w_cats=tuple(w_cats), gb=jnp.asarray(gb), wf=jnp.asarray(wf))
    meta = dict(layer_cfgs=tuple(layer_cfgs), cp_list=tuple(cp_list),
                out_dim=out_dim, out_lanes=out_lanes)
    raw = dict(layers=raw_layers, wf=wf_raw)
    return params, meta, raw


# ------------------------------ forward pass -------------------------------- #

def generator_forward(x, params, meta):
    """x: (N, in_dim, H0, 1) NCHW.  Returns (N, 1, H_final, out_dim)."""
    n, c_in, h0, w_in = x.shape
    assert w_in == 1, "Generator expects width-1 input (conv kernels are (k, 1))."
    x_rows = jnp.transpose(x[..., 0], (0, 2, 1))             # (N, H0, C_in)

    layer_cfgs = meta["layer_cfgs"]
    cp_list = meta["cp_list"]
    out_lanes = meta["out_lanes"]

    # Static per-layer geometry (H trajectory), computed at trace time.
    cfgs = []
    h_cur = h0
    for l, (ci, co, kh, s, p) in enumerate(layer_cfgs):
        h_out = (h_cur - 1) * s - 2 * p + kh
        cfgs.append(dict(kh=kh, stride=s, pad=p, cp=cp_list[l],
                         h_in=h_cur, h_out=h_out,
                         h_out_pad=_round_up(h_out, SUBLANE)))
        h_cur = h_out
    h_final = h_cur
    out_rows = _round_up(h_final, SUBLANE)

    def kernel(x_ref, w1_ref, w2_ref, w3_ref, w4_ref, gb_ref, wf_ref, o_ref):
        w_refs = (w1_ref, w2_ref, w3_ref, w4_ref)
        acts = [x_ref[b] for b in range(n)]                   # (H0, C_in) each
        for l, cfg in enumerate(cfgs):
            cp = cfg["cp"]
            w_cat = w_refs[l][...]                            # hoisted out of batch loop
            gamma = gb_ref[2 * l:2 * l + 1, 0:cp]
            beta = gb_ref[2 * l + 1:2 * l + 2, 0:cp]
            ys = []
            for hb in acts:
                # One wide MXU matmul mixes channels for all kh taps at once.
                z = jnp.dot(hb, w_cat, preferred_element_type=jnp.float32)
                ys.append(_scatter_taps(z, kh=cfg["kh"], cp=cp,
                                        h_in=cfg["h_in"], h_out=cfg["h_out"],
                                        h_out_pad=cfg["h_out_pad"],
                                        stride=cfg["stride"], pad=cfg["pad"]))
            acts = _batchnorm_relu(ys, h_out=cfg["h_out"], gamma=gamma, beta=beta)
        # Final ConvTranspose2d(hidden, 1, (1, out_dim)) as a lane-padded matmul
        # + tanh -> unmasked, lane/sublane-dense stores.
        wfv = wf_ref[...]
        for b, hb in enumerate(acts):
            o_ref[b * out_rows:(b + 1) * out_rows, :] = jnp.tanh(
                jnp.dot(hb, wfv, preferred_element_type=jnp.float32))

    kernel_args = (x_rows, *params["w_cats"], params["gb"], params["wf"])

    def full_spec(shape):
        nd = len(shape)
        return pl.BlockSpec(shape, lambda i, _nd=nd: (0,) * _nd)

    out = pl.pallas_call(
        kernel,
        out_shape=jax.ShapeDtypeStruct((n * out_rows, out_lanes), jnp.float32),
        grid=(1,),
        in_specs=[full_spec(a.shape) for a in kernel_args],
        out_specs=full_spec((n * out_rows, out_lanes)),
        compiler_params=pltpu.CompilerParams(
            dimension_semantics=("arbitrary",),
            vmem_limit_bytes=32 * 1024 * 1024),
    )(*kernel_args)

    y = out.reshape(n, out_rows, out_lanes)[:, :h_final, :meta["out_dim"]]
    return y[:, None, :, :]                                   # (N, 1, H_final, out_dim)


# TODO(synk): BatchNorm running_mean/running_var tracking (a training-time side
# effect that does not influence the forward output) is not reproduced.


# ------------------------- float64 NumPy reference -------------------------- #

def reference_generator_forward(x, raw_layers, wf_raw):
    """Independent reference with PyTorch ConvTranspose2d / BatchNorm2d(train) semantics."""
    a = np.asarray(x, np.float64)[..., 0]                     # (N, C, H)
    for (w, gamma, beta, cfg) in raw_layers:
        ci, co, kh, s, p = cfg
        wk = np.asarray(w, np.float64)[..., 0]                # (ci, co, kh)
        n, _, h_in = a.shape
        h_out = (h_in - 1) * s - 2 * p + kh
        y = np.zeros((n, co, h_out), np.float64)
        for k in range(kh):
            for hi in range(h_in):
                ho = hi * s + k - p
                if 0 <= ho < h_out:
                    y[:, :, ho] += a[:, :, hi] @ wk[:, :, k]
        mean = y.mean(axis=(0, 2), keepdims=True)
        var = y.var(axis=(0, 2), keepdims=True)               # biased (training BN)
        y = (y - mean) / np.sqrt(var + BN_EPS)
        y = (y * np.asarray(gamma, np.float64)[None, :, None]
             + np.asarray(beta, np.float64)[None, :, None])
        a = np.maximum(y, 0.0)
    wf = np.asarray(wf_raw, np.float64)[:, 0, 0, :]           # (hidden, out_dim)
    out = np.einsum("nch,cd->nhd", a, wf)
    return np.tanh(out)[:, None, :, :]                        # (N, 1, H, out_dim)


if __name__ == "__main__":
    key = jax.random.PRNGKey(0)
    kx, kp = jax.random.split(key)

    N, in_dim, hidden_num, out_dim = 2, 8, 32, 6
    # Typical GAN latent input: (N, in_dim, 1, 1) NCHW.
    x = jax.random.normal(kx, (N, in_dim, 1, 1), jnp.float32)
    params, meta, raw = init_generator(kp, in_dim, hidden_num, out_dim)

    fwd = jax.jit(lambda xx: generator_forward(xx, params, meta))
    out = jax.block_until_ready(fwd(x))

    # H trajectory: 1 -> 5 -> 10 -> 15 -> 30 ; final layer widens W to out_dim.
    assert out.shape == (N, 1, 30, out_dim), out.shape
    assert bool(jnp.all(jnp.isfinite(out)))
    assert bool(jnp.all(jnp.abs(out) <= 1.0 + 1e-6))          # tanh range

    ref = reference_generator_forward(np.asarray(x), raw["layers"], raw["wf"])
    max_err = float(np.max(np.abs(np.asarray(out, np.float64) - ref)))
    assert max_err < 5e-3, f"max abs error vs reference: {max_err}"

    print("KERNEL_OK")
</pallas_src>

<mosaic_0001>
module attributes {stable_mosaic.version = 11 : i64} {
  func.func @kernel(%arg0: i32, %arg1: memref<2x1x8xf32, #tpu.memory_space<vmem>>, %arg2: memref<8x1280xf32, #tpu.memory_space<vmem>>, %arg3: memref<256x512xf32, #tpu.memory_space<vmem>>, %arg4: memref<128x1024xf32, #tpu.memory_space<vmem>>, %arg5: memref<128x512xf32, #tpu.memory_space<vmem>>, %arg6: memref<8x256xf32, #tpu.memory_space<vmem>>, %arg7: memref<128x128xf32, #tpu.memory_space<vmem>>, %arg8: memref<64x128xf32, #tpu.memory_space<vmem>>) attributes {dimension_semantics = [#tpu.dimension_semantics<arbitrary>], iteration_bounds = array<i64: 1>, scalar_prefetch = 0 : i64, scratch_operands = 0 : i64, tpu.core_type = #tpu.core_type<tc>, window_params = [{pipeline_mode = #tpu.pipeline_mode<synchronous>, transform_indices = @transform_0, window_bounds = array<i64: 2, 1, 8>}, {pipeline_mode = #tpu.pipeline_mode<synchronous>, transform_indices = @transform_1, window_bounds = array<i64: 8, 1280>}, {pipeline_mode = #tpu.pipeline_mode<synchronous>, transform_indices = @transform_2, window_bounds = array<i64: 256, 512>}, {pipeline_mode = #tpu.pipeline_mode<synchronous>, transform_indices = @transform_3, window_bounds = array<i64: 128, 1024>}, {pipeline_mode = #tpu.pipeline_mode<synchronous>, transform_indices = @transform_4, window_bounds = array<i64: 128, 512>}, {pipeline_mode = #tpu.pipeline_mode<synchronous>, transform_indices = @transform_5, window_bounds = array<i64: 8, 256>}, {pipeline_mode = #tpu.pipeline_mode<synchronous>, transform_indices = @transform_6, window_bounds = array<i64: 128, 128>}, {pipeline_mode = #tpu.pipeline_mode<synchronous>, transform_indices = @transform_7, window_bounds = array<i64: 64, 128>}]} {
    %c0 = arith.constant 0 : index
    %c0_0 = arith.constant 0 : index
    %c0_1 = arith.constant 0 : index
    %0 = vector.load %arg1[%c0, %c0_0, %c0_1] : memref<2x1x8xf32, #tpu.memory_space<vmem>>, vector<1x1x8xf32>
    %1 = vector.shape_cast %0 : vector<1x1x8xf32> to vector<1x8xf32>
    %c1 = arith.constant 1 : index
    %c0_2 = arith.constant 0 : index
    %c0_3 = arith.constant 0 : index
    %2 = vector.load %arg1[%c1, %c0_2, %c0_3] : memref<2x1x8xf32, #tpu.memory_space<vmem>>, vector<1x1x8xf32>
    %3 = vector.shape_cast %2 : vector<1x1x8xf32> to vector<1x8xf32>
    %c0_4 = arith.constant 0 : index
    %c0_5 = arith.constant 0 : index
    %4 = vector.load %arg2[%c0_4, %c0_5] : memref<8x1280xf32, #tpu.memory_space<vmem>>, vector<8x1280xf32>
    %c0_6 = arith.constant 0 : index
    %c0_7 = arith.constant 0 : index
    %5 = vector.load %arg6[%c0_6, %c0_7] : memref<8x256xf32, #tpu.memory_space<vmem>>, vector<1x256xf32>
    %c1_8 = arith.constant 1 : index
    %c0_9 = arith.constant 0 : index
    %6 = vector.load %arg6[%c1_8, %c0_9] : memref<8x256xf32, #tpu.memory_space<vmem>>, vector<1x256xf32>
    %cst = arith.constant dense<0.000000e+00> : vector<1x1280xf32>
    %7 = tpu.matmul %1, %4, %cst {dimension_numbers = #tpu.dot_dimension_numbers<[1], [0], [0], [1], [0, 0, 1, 1], [], []>} : vector<1x8xf32>, vector<8x1280xf32>, vector<1x1280xf32> -> vector<1x1280xf32>
    %8 = tpu.iota {dimensions = array<i32: 0>} : vector<8x256xi32>
    %cst_10 = arith.constant 0.000000e+00 : f32
    %9 = vector.broadcast %cst_10 : f32 to vector<8x256xf32>
    %10 = vector.extract_strided_slice %7 {offsets = [0, 0], sizes = [1, 256], strides = [1, 1]} : vector<1x1280xf32> to vector<1x256xf32>
    %11 = vector.shape_cast %10 : vector<1x256xf32> to vector<1x256xf32>
    %12 = vector.broadcast %11 : vector<1x256xf32> to vector<8x256xf32>
    %c0_i32 = arith.constant 0 : i32
    %13 = vector.broadcast %c0_i32 : i32 to vector<8x256xi32>
    %14 = arith.cmpi eq, %8, %13 : vector<8x256xi32>
    %cst_11 = arith.constant 0.000000e+00 : f32
    %15 = vector.broadcast %cst_11 : f32 to vector<8x256xf32>
    %16 = arith.select %14, %12, %15 : vector<8x256xi1>, vector<8x256xf32>
    %17 = arith.addf %9, %16 : vector<8x256xf32>
    %18 = vector.extract_strided_slice %7 {offsets = [0, 256], sizes = [1, 256], strides = [1, 1]} : vector<1x1280xf32> to vector<1x256xf32>
    %19 = vector.shape_cast %18 : vector<1x256xf32> to vector<1x256xf32>
    %20 = vector.broadcast %19 : vector<1x256xf32> to vector<8x256xf32>
    %c1_i32 = arith.constant 1 : i32
    %21 = vector.broadcast %c1_i32 : i32 to vector<8x256xi32>
    %22 = arith.cmpi eq, %8, %21 : vector<8x256xi32>
    %cst_12 = arith.constant 0.000000e+00 : f32
    %23 = vector.broadcast %cst_12 : f32 to vector<8x256xf32>
    %24 = arith.select %22, %20, %23 : vector<8x256xi1>, vector<8x256xf32>
    %25 = arith.addf %17, %24 : vector<8x256xf32>
    %26 = vector.extract_strided_slice %7 {offsets = [0, 512], sizes = [1, 256], strides = [1, 1]} : vector<1x1280xf32> to vector<1x256xf32>
    %27 = vector.shape_cast %26 : vector<1x256xf32> to vector<1x256xf32>
    %28 = vector.broadcast %27 : vector<1x256xf32> to vector<8x256xf32>
    %c2_i32 = arith.constant 2 : i32
    %29 = vector.broadcast %c2_i32 : i32 to vector<8x256xi32>
    %30 = arith.cmpi eq, %8, %29 : vector<8x256xi32>
    %cst_13 = arith.constant 0.000000e+00 : f32
    %31 = vector.broadcast %cst_13 : f32 to vector<8x256xf32>
    %32 = arith.select %30, %28, %31 : vector<8x256xi1>, vector<8x256xf32>
    %33 = arith.addf %25, %32 : vector<8x256xf32>
    %34 = vector.extract_strided_slice %7 {offsets = [0, 768], sizes = [1, 256], strides = [1, 1]} : vector<1x1280xf32> to vector<1x256xf32>
    %35 = vector.shape_cast %34 : vector<1x256xf32> to vector<1x256xf32>
    %36 = vector.broadcast %35 : vector<1x256xf32> to vector<8x256xf32>
    %c3_i32 = arith.constant 3 : i32
    %37 = vector.broadcast %c3_i32 : i32 to vector<8x256xi32>
    %38 = arith.cmpi eq, %8, %37 : vector<8x256xi32>
    %cst_14 = arith.constant 0.000000e+00 : f32
    %39 = vector.broadcast %cst_14 : f32 to vector<8x256xf32>
    %40 = arith.select %38, %36, %39 : vector<8x256xi1>, vector<8x256xf32>
    %41 = arith.addf %33, %40 : vector<8x256xf32>
    %42 = vector.extract_strided_slice %7 {offsets = [0, 1024], sizes = [1, 256], strides = [1, 1]} : vector<1x1280xf32> to vector<1x256xf32>
    %43 = vector.shape_cast %42 : vector<1x256xf32> to vector<1x256xf32>
    %44 = vector.broadcast %43 : vector<1x256xf32> to vector<8x256xf32>
    %c4_i32 = arith.constant 4 : i32
    %45 = vector.broadcast %c4_i32 : i32 to vector<8x256xi32>
    %46 = arith.cmpi eq, %8, %45 : vector<8x256xi32>
    %cst_15 = arith.constant 0.000000e+00 : f32
    %47 = vector.broadcast %cst_15 : f32 to vector<8x256xf32>
    %48 = arith.select %46, %44, %47 : vector<8x256xi1>, vector<8x256xf32>
    %49 = arith.addf %41, %48 : vector<8x256xf32>
    %cst_16 = arith.constant dense<0.000000e+00> : vector<1x1280xf32>
    %50 = tpu.matmul %3, %4, %cst_16 {dimension_numbers = #tpu.dot_dimension_numbers<[1], [0], [0], [1], [0, 0, 1, 1], [], []>} : vector<1x8xf32>, vector<8x1280xf32>, vector<1x1280xf32> -> vector<1x1280xf32>
    %51 = tpu.iota {dimensions = array<i32: 0>} : vector<8x256xi32>
    %cst_17 = arith.constant 0.000000e+00 : f32
    %52 = vector.broadcast %cst_17 : f32 to vector<8x256xf32>
    %53 = vector.extract_strided_slice %50 {offsets = [0, 0], sizes = [1, 256], strides = [1, 1]} : vector<1x1280xf32> to vector<1x256xf32>
    %54 = vector.shape_cast %53 : vector<1x256xf32> to vector<1x256xf32>
    %55 = vector.broadcast %54 : vector<1x256xf32> to vector<8x256xf32>
    %c0_i32_18 = arith.constant 0 : i32
    %56 = vector.broadcast %c0_i32_18 : i32 to vector<8x256xi32>
    %57 = arith.cmpi eq, %51, %56 : vector<8x256xi32>
    %cst_19 = arith.constant 0.000000e+00 : f32
    %58 = vector.broadcast %cst_19 : f32 to vector<8x256xf32>
    %59 = arith.select %57, %55, %58 : vector<8x256xi1>, vector<8x256xf32>
    %60 = arith.addf %52, %59 : vector<8x256xf32>
    %61 = vector.extract_strided_slice %50 {offsets = [0, 256], sizes = [1, 256], strides = [1, 1]} : vector<1x1280xf32> to vector<1x256xf32>
    %62 = vector.shape_cast %61 : vector<1x256xf32> to vector<1x256xf32>
    %63 = vector.broadcast %62 : vector<1x256xf32> to vector<8x256xf32>
    %c1_i32_20 = arith.constant 1 : i32
    %64 = vector.broadcast %c1_i32_20 : i32 to vector<8x256xi32>
    %65 = arith.cmpi eq, %51, %64 : vector<8x256xi32>
    %cst_21 = arith.constant 0.000000e+00 : f32
    %66 = vector.broadcast %cst_21 : f32 to vector<8x256xf32>
    %67 = arith.select %65, %63, %66 : vector<8x256xi1>, vector<8x256xf32>
    %68 = arith.addf %60, %67 : vector<8x256xf32>
    %69 = vector.extract_strided_slice %50 {offsets = [0, 512], sizes = [1, 256], strides = [1, 1]} : vector<1x1280xf32> to vector<1x256xf32>
    %70 = vector.shape_cast %69 : vector<1x256xf32> to vector<1x256xf32>
    %71 = vector.broadcast %70 : vector<1x256xf32> to vector<8x256xf32>
    %c2_i32_22 = arith.constant 2 : i32
    %72 = vector.broadcast %c2_i32_22 : i32 to vector<8x256xi32>
    %73 = arith.cmpi eq, %51, %72 : vector<8x256xi32>
    %cst_23 = arith.constant 0.000000e+00 : f32
    %74 = vector.broadcast %cst_23 : f32 to vector<8x256xf32>
    %75 = arith.select %73, %71, %74 : vector<8x256xi1>, vector<8x256xf32>
    %76 = arith.addf %68, %75 : vector<8x256xf32>
    %77 = vector.extract_strided_slice %50 {offsets = [0, 768], sizes = [1, 256], strides = [1, 1]} : vector<1x1280xf32> to vector<1x256xf32>
    %78 = vector.shape_cast %77 : vector<1x256xf32> to vector<1x256xf32>
    %79 = vector.broadcast %78 : vector<1x256xf32> to vector<8x256xf32>
    %c3_i32_24 = arith.constant 3 : i32
    %80 = vector.broadcast %c3_i32_24 : i32 to vector<8x256xi32>
    %81 = arith.cmpi eq, %51, %80 : vector<8x256xi32>
    %cst_25 = arith.constant 0.000000e+00 : f32
    %82 = vector.broadcast %cst_25 : f32 to vector<8x256xf32>
    %83 = arith.select %81, %79, %82 : vector<8x256xi1>, vector<8x256xf32>
    %84 = arith.addf %76, %83 : vector<8x256xf32>
    %85 = vector.extract_strided_slice %50 {offsets = [0, 1024], sizes = [1, 256], strides = [1, 1]} : vector<1x1280xf32> to vector<1x256xf32>
    %86 = vector.shape_cast %85 : vector<1x256xf32> to vector<1x256xf32>
    %87 = vector.broadcast %86 : vector<1x256xf32> to vector<8x256xf32>
    %c4_i32_26 = arith.constant 4 : i32
    %88 = vector.broadcast %c4_i32_26 : i32 to vector<8x256xi32>
    %89 = arith.cmpi eq, %51, %88 : vector<8x256xi32>
    %cst_27 = arith.constant 0.000000e+00 : f32
    %90 = vector.broadcast %cst_27 : f32 to vector<8x256xf32>
    %91 = arith.select %89, %87, %90 : vector<8x256xi1>, vector<8x256xf32>
    %92 = arith.addf %84, %91 : vector<8x256xf32>
    %cst_28 = arith.constant dense<0.000000e+00> : vector<256xf32>
    %93 = vector.multi_reduction <add>, %49, %cst_28 [0] : vector<8x256xf32> to vector<256xf32>
    %94 = vector.shape_cast %93 : vector<256xf32> to vector<1x256xf32>
    %cst_29 = arith.constant 0.000000e+00 : f32
    %95 = vector.broadcast %cst_29 : f32 to vector<1x256xf32>
    %96 = arith.addf %95, %94 : vector<1x256xf32>
    %cst_30 = arith.constant dense<0.000000e+00> : vector<256xf32>
    %97 = vector.multi_reduction <add>, %92, %cst_30 [0] : vector<8x256xf32> to vector<256xf32>
    %98 = vector.shape_cast %97 : vector<256xf32> to vector<1x256xf32>
    %99 = arith.addf %96, %98 : vector<1x256xf32>
    %cst_31 = arith.constant 1.000000e-01 : f32
    %100 = vector.broadcast %cst_31 : f32 to vector<1x256xf32>
    %101 = arith.mulf %99, %100 : vector<1x256xf32>
    %102 = tpu.iota {dimensions = array<i32: 0>} : vector<8x256xi32>
    %c5_i32 = arith.constant 5 : i32
    %103 = vector.broadcast %c5_i32 : i32 to vector<8x256xi32>
    %104 = arith.cmpi slt, %102, %103 : vector<8x256xi32>
    %105 = vector.broadcast %101 : vector<1x256xf32> to vector<8x256xf32>
    %106 = arith.subf %49, %105 : vector<8x256xf32>
    %cst_32 = arith.constant 0.000000e+00 : f32
    %107 = vector.broadcast %cst_32 : f32 to vector<8x256xf32>
    %108 = arith.select %104, %106, %107 : vector<8x256xi1>, vector<8x256xf32>
    %109 = vector.broadcast %101 : vector<1x256xf32> to vector<8x256xf32>
    %110 = arith.subf %92, %109 : vector<8x256xf32>
    %cst_33 = arith.constant 0.000000e+00 : f32
    %111 = vector.broadcast %cst_33 : f32 to vector<8x256xf32>
    %112 = arith.select %104, %110, %111 : vector<8x256xi1>, vector<8x256xf32>
    %113 = arith.mulf %108, %108 : vector<8x256xf32>
    %cst_34 = arith.constant dense<0.000000e+00> : vector<256xf32>
    %114 = vector.multi_reduction <add>, %113, %cst_34 [0] : vector<8x256xf32> to vector<256xf32>
    %115 = vector.shape_cast %114 : vector<256xf32> to vector<1x256xf32>
    %cst_35 = arith.constant 0.000000e+00 : f32
    %116 = vector.broadcast %cst_35 : f32 to vector<1x256xf32>
    %117 = arith.addf %116, %115 : vector<1x256xf32>
    %118 = arith.mulf %112, %112 : vector<8x256xf32>
    %cst_36 = arith.constant dense<0.000000e+00> : vector<256xf32>
    %119 = vector.multi_reduction <add>, %118, %cst_36 [0] : vector<8x256xf32> to vector<256xf32>
    %120 = vector.shape_cast %119 : vector<256xf32> to vector<1x256xf32>
    %121 = arith.addf %117, %120 : vector<1x256xf32>
    %cst_37 = arith.constant 1.000000e-01 : f32
    %122 = vector.broadcast %cst_37 : f32 to vector<1x256xf32>
    %123 = arith.mulf %121, %122 : vector<1x256xf32>
    %cst_38 = arith.constant 9.99999974E-6 : f32
    %124 = vector.broadcast %cst_38 : f32 to vector<1x256xf32>
    %125 = arith.addf %123, %124 : vector<1x256xf32>
    %126 = math.rsqrt %125 : vector<1x256xf32>
    %127 = arith.mulf %126, %5 : vector<1x256xf32>
    %128 = vector.broadcast %127 : vector<1x256xf32> to vector<8x256xf32>
    %129 = arith.mulf %108, %128 : vector<8x256xf32>
    %130 = vector.broadcast %6 : vector<1x256xf32> to vector<8x256xf32>
    %131 = arith.addf %129, %130 : vector<8x256xf32>
    %cst_39 = arith.constant 0.000000e+00 : f32
    %132 = vector.broadcast %cst_39 : f32 to vector<8x256xf32>
    %133 = arith.maximumf %131, %132 : vector<8x256xf32>
    %134 = vector.broadcast %127 : vector<1x256xf32> to vector<8x256xf32>
    %135 = arith.mulf %112, %134 : vector<8x256xf32>
    %136 = vector.broadcast %6 : vector<1x256xf32> to vector<8x256xf32>
    %137 = arith.addf %135, %136 : vector<8x256xf32>
    %cst_40 = arith.constant 0.000000e+00 : f32
    %138 = vector.broadcast %cst_40 : f32 to vector<8x256xf32>
    %139 = arith.maximumf %137, %138 : vector<8x256xf32>
    %c0_41 = arith.constant 0 : index
    %c0_42 = arith.constant 0 : index
    %140 = vector.load %arg3[%c0_41, %c0_42] : memref<256x512xf32, #tpu.memory_space<vmem>>, vector<256x512xf32>
    %c2 = arith.constant 2 : index
    %c0_43 = arith.constant 0 : index
    %141 = vector.load %arg6[%c2, %c0_43] : memref<8x256xf32, #tpu.memory_space<vmem>>, vector<1x128xf32>
    %c3 = arith.constant 3 : index
    %c0_44 = arith.constant 0 : index
    %142 = vector.load %arg6[%c3, %c0_44] : memref<8x256xf32, #tpu.memory_space<vmem>>, vector<1x128xf32>
    %cst_45 = arith.constant dense<0.000000e+00> : vector<8x512xf32>
    %143 = tpu.matmul %133, %140, %cst_45 {dimension_numbers = #tpu.dot_dimension_numbers<[1], [0], [0], [1], [0, 0, 1, 1], [], []>} : vector<8x256xf32>, vector<256x512xf32>, vector<8x512xf32> -> vector<8x512xf32>
    %144 = tpu.iota {dimensions = array<i32: 0>} : vector<16x8xi32>
    %145 = tpu.iota {dimensions = array<i32: 1>} : vector<16x8xi32>
    %c5_i32_46 = arith.constant 5 : i32
    %146 = vector.broadcast %c5_i32_46 : i32 to vector<16x8xi32>
    %147 = arith.cmpi slt, %145, %146 : vector<16x8xi32>
    %c10_i32 = arith.constant 10 : i32
    %148 = vector.broadcast %c10_i32 : i32 to vector<16x8xi32>
    %149 = arith.cmpi slt, %144, %148 : vector<16x8xi32>
    %150 = arith.andi %147, %149 : vector<16x8xi1>
    %cst_47 = arith.constant 0.000000e+00 : f32
    %151 = vector.broadcast %cst_47 : f32 to vector<16x128xf32>
    %c2_i32_48 = arith.constant 2 : i32
    %152 = vector.broadcast %c2_i32_48 : i32 to vector<16x8xi32>
    %153 = arith.muli %152, %145 : vector<16x8xi32>
    %c-1_i32 = arith.constant -1 : i32
    %154 = vector.broadcast %c-1_i32 : i32 to vector<16x8xi32>
    %155 = arith.addi %153, %154 : vector<16x8xi32>
    %156 = arith.cmpi eq, %144, %155 : vector<16x8xi32>
    %157 = arith.andi %150, %156 : vector<16x8xi1>
    %cst_49 = arith.constant 1.000000e+00 : f32
    %cst_50 = arith.constant 0.000000e+00 : f32
    %158 = vector.broadcast %cst_49 : f32 to vector<16x8xf32>
    %159 = vector.broadcast %cst_50 : f32 to vector<16x8xf32>
    %160 = arith.select %157, %158, %159 : vector<16x8xi1>, vector<16x8xf32>
    %161 = vector.extract_strided_slice %143 {offsets = [0, 0], sizes = [8, 128], strides = [1, 1]} : vector<8x512xf32> to vector<8x128xf32>
    %cst_51 = arith.constant dense<0.000000e+00> : vector<16x128xf32>
    %162 = tpu.matmul %160, %161, %cst_51 {dimension_numbers = #tpu.dot_dimension_numbers<[1], [0], [0], [1], [0, 0, 1, 1], [], []>} : vector<16x8xf32>, vector<8x128xf32>, vector<16x128xf32> -> vector<16x128xf32>
    %163 = arith.addf %151, %162 : vector<16x128xf32>
    %c2_i32_52 = arith.constant 2 : i32
    %164 = vector.broadcast %c2_i32_52 : i32 to vector<16x8xi32>
    %165 = arith.muli %164, %145 : vector<16x8xi32>
    %c0_i32_53 = arith.constant 0 : i32
    %166 = vector.broadcast %c0_i32_53 : i32 to vector<16x8xi32>
    %167 = arith.addi %165, %166 : vector<16x8xi32>
    %168 = arith.cmpi eq, %144, %167 : vector<16x8xi32>
    %169 = arith.andi %150, %168 : vector<16x8xi1>
    %cst_54 = arith.constant 1.000000e+00 : f32
    %cst_55 = arith.constant 0.000000e+00 : f32
    %170 = vector.broadcast %cst_54 : f32 to vector<16x8xf32>
    %171 = vector.broadcast %cst_55 : f32 to vector<16x8xf32>
    %172 = arith.select %169, %170, %171 : vector<16x8xi1>, vector<16x8xf32>
    %173 = vector.extract_strided_slice %143 {offsets = [0, 128], sizes = [8, 128], strides = [1, 1]} : vector<8x512xf32> to vector<8x128xf32>
    %cst_56 = arith.constant dense<0.000000e+00> : vector<16x128xf32>
    %174 = tpu.matmul %172, %173, %cst_56 {dimension_numbers = #tpu.dot_dimension_numbers<[1], [0], [0], [1], [0, 0, 1, 1], [], []>} : vector<16x8xf32>, vector<8x128xf32>, vector<16x128xf32> -> vector<16x128xf32>
    %175 = arith.addf %163, %174 : vector<16x128xf32>
    %c2_i32_57 = arith.constant 2 : i32
    %176 = vector.broadcast %c2_i32_57 : i32 to vector<16x8xi32>
    %177 = arith.muli %176, %145 : vector<16x8xi32>
    %c1_i32_58 = arith.constant 1 : i32
    %178 = vector.broadcast %c1_i32_58 : i32 to vector<16x8xi32>
    %179 = arith.addi %177, %178 : vector<16x8xi32>
    %180 = arith.cmpi eq, %144, %179 : vector<16x8xi32>
    %181 = arith.andi %150, %180 : vector<16x8xi1>
    %cst_59 = arith.constant 1.000000e+00 : f32
    %cst_60 = arith.constant 0.000000e+00 : f32
    %182 = vector.broadcast %cst_59 : f32 to vector<16x8xf32>
    %183 = vector.broadcast %cst_60 : f32 to vector<16x8xf32>
    %184 = arith.select %181, %182, %183 : vector<16x8xi1>, vector<16x8xf32>
    %185 = vector.extract_strided_slice %143 {offsets = [0, 256], sizes = [8, 128], strides = [1, 1]} : vector<8x512xf32> to vector<8x128xf32>
    %cst_61 = arith.constant dense<0.000000e+00> : vector<16x128xf32>
    %186 = tpu.matmul %184, %185, %cst_61 {dimension_numbers = #tpu.dot_dimension_numbers<[1], [0], [0], [1], [0, 0, 1, 1], [], []>} : vector<16x8xf32>, vector<8x128xf32>, vector<16x128xf32> -> vector<16x128xf32>
    %187 = arith.addf %175, %186 : vector<16x128xf32>
    %c2_i32_62 = arith.constant 2 : i32
    %188 = vector.broadcast %c2_i32_62 : i32 to vector<16x8xi32>
    %189 = arith.muli %188, %145 : vector<16x8xi32>
    %c2_i32_63 = arith.constant 2 : i32
    %190 = vector.broadcast %c2_i32_63 : i32 to vector<16x8xi32>
    %191 = arith.addi %189, %190 : vector<16x8xi32>
    %192 = arith.cmpi eq, %144, %191 : vector<16x8xi32>
    %193 = arith.andi %150, %192 : vector<16x8xi1>
    %cst_64 = arith.constant 1.000000e+00 : f32
    %cst_65 = arith.constant 0.000000e+00 : f32
    %194 = vector.broadcast %cst_64 : f32 to vector<16x8xf32>
    %195 = vector.broadcast %cst_65 : f32 to vector<16x8xf32>
    %196 = arith.select %193, %194, %195 : vector<16x8xi1>, vector<16x8xf32>
    %197 = vector.extract_strided_slice %143 {offsets = [0, 384], sizes = [8, 128], strides = [1, 1]} : vector<8x512xf32> to vector<8x128xf32>
    %cst_66 = arith.constant dense<0.000000e+00> : vector<16x128xf32>
    %198 = tpu.matmul %196, %197, %cst_66 {dimension_numbers = #tpu.dot_dimension_numbers<[1], [0], [0], [1], [0, 0, 1, 1], [], []>} : vector<16x8xf32>, vector<8x128xf32>, vector<16x128xf32> -> vector<16x128xf32>
    %199 = arith.addf %187, %198 : vector<16x128xf32>
    %cst_67 = arith.constant dense<0.000000e+00> : vector<8x512xf32>
    %200 = tpu.matmul %139, %140, %cst_67 {dimension_numbers = #tpu.dot_dimension_numbers<[1], [0], [0], [1], [0, 0, 1, 1], [], []>} : vector<8x256xf32>, vector<256x512xf32>, vector<8x512xf32> -> vector<8x512xf32>
    %201 = tpu.iota {dimensions = array<i32: 0>} : vector<16x8xi32>
    %202 = tpu.iota {dimensions = array<i32: 1>} : vector<16x8xi32>
    %c5_i32_68 = arith.constant 5 : i32
    %203 = vector.broadcast %c5_i32_68 : i32 to vector<16x8xi32>
    %204 = arith.cmpi slt, %202, %203 : vector<16x8xi32>
    %c10_i32_69 = arith.constant 10 : i32
    %205 = vector.broadcast %c10_i32_69 : i32 to vector<16x8xi32>
    %206 = arith.cmpi slt, %201, %205 : vector<16x8xi32>
    %207 = arith.andi %204, %206 : vector<16x8xi1>
    %cst_70 = arith.constant 0.000000e+00 : f32
    %208 = vector.broadcast %cst_70 : f32 to vector<16x128xf32>
    %c2_i32_71 = arith.constant 2 : i32
    %209 = vector.broadcast %c2_i32_71 : i32 to vector<16x8xi32>
    %210 = arith.muli %209, %202 : vector<16x8xi32>
    %c-1_i32_72 = arith.constant -1 : i32
    %211 = vector.broadcast %c-1_i32_72 : i32 to vector<16x8xi32>
    %212 = arith.addi %210, %211 : vector<16x8xi32>
    %213 = arith.cmpi eq, %201, %212 : vector<16x8xi32>
    %214 = arith.andi %207, %213 : vector<16x8xi1>
    %cst_73 = arith.constant 1.000000e+00 : f32
    %cst_74 = arith.constant 0.000000e+00 : f32
    %215 = vector.broadcast %cst_73 : f32 to vector<16x8xf32>
    %216 = vector.broadcast %cst_74 : f32 to vector<16x8xf32>
    %217 = arith.select %214, %215, %216 : vector<16x8xi1>, vector<16x8xf32>
    %218 = vector.extract_strided_slice %200 {offsets = [0, 0], sizes = [8, 128], strides = [1, 1]} : vector<8x512xf32> to vector<8x128xf32>
    %cst_75 = arith.constant dense<0.000000e+00> : vector<16x128xf32>
    %219 = tpu.matmul %217, %218, %cst_75 {dimension_numbers = #tpu.dot_dimension_numbers<[1], [0], [0], [1], [0, 0, 1, 1], [], []>} : vector<16x8xf32>, vector<8x128xf32>, vector<16x128xf32> -> vector<16x128xf32>
    %220 = arith.addf %208, %219 : vector<16x128xf32>
    %c2_i32_76 = arith.constant 2 : i32
    %221 = vector.broadcast %c2_i32_76 : i32 to vector<16x8xi32>
    %222 = arith.muli %221, %202 : vector<16x8xi32>
    %c0_i32_77 = arith.constant 0 : i32
    %223 = vector.broadcast %c0_i32_77 : i32 to vector<16x8xi32>
    %224 = arith.addi %222, %223 : vector<16x8xi32>
    %225 = arith.cmpi eq, %201, %224 : vector<16x8xi32>
    %226 = arith.andi %207, %225 : vector<16x8xi1>
    %cst_78 = arith.constant 1.000000e+00 : f32
    %cst_79 = arith.constant 0.000000e+00 : f32
    %227 = vector.broadcast %cst_78 : f32 to vector<16x8xf32>
    %228 = vector.broadcast %cst_79 : f32 to vector<16x8xf32>
    %229 = arith.select %226, %227, %228 : vector<16x8xi1>, vector<16x8xf32>
    %230 = vector.extract_strided_slice %200 {offsets = [0, 128], sizes = [8, 128], strides = [1, 1]} : vector<8x512xf32> to vector<8x128xf32>
    %cst_80 = arith.constant dense<0.000000e+00> : vector<16x128xf32>
    %231 = tpu.matmul %229, %230, %cst_80 {dimension_numbers = #tpu.dot_dimension_numbers<[1], [0], [0], [1], [0, 0, 1, 1], [], []>} : vector<16x8xf32>, vector<8x128xf32>, vector<16x128xf32> -> vector<16x128xf32>
    %232 = arith.addf %220, %231 : vector<16x128xf32>
    %c2_i32_81 = arith.constant 2 : i32
    %233 = vector.broadcast %c2_i32_81 : i32 to vector<16x8xi32>
    %234 = arith.muli %233, %202 : vector<16x8xi32>
    %c1_i32_82 = arith.constant 1 : i32
    %235 = vector.broadcast %c1_i32_82 : i32 to vector<16x8xi32>
    %236 = arith.addi %234, %235 : vector<16x8xi32>
    %237 = arith.cmpi eq, %201, %236 : vector<16x8xi32>
    %238 = arith.andi %207, %237 : vector<16x8xi1>
    %cst_83 = arith.constant 1.000000e+00 : f32
    %cst_84 = arith.constant 0.000000e+00 : f32
    %239 = vector.broadcast %cst_83 : f32 to vector<16x8xf32>
    %240 = vector.broadcast %cst_84 : f32 to vector<16x8xf32>
    %241 = arith.select %238, %239, %240 : vector<16x8xi1>, vector<16x8xf32>
    %242 = vector.extract_strided_slice %200 {offsets = [0, 256], sizes = [8, 128], strides = [1, 1]} : vector<8x512xf32> to vector<8x128xf32>
    %cst_85 = arith.constant dense<0.000000e+00> : vector<16x128xf32>
    %243 = tpu.matmul %241, %242, %cst_85 {dimension_numbers = #tpu.dot_dimension_numbers<[1], [0], [0], [1], [0, 0, 1, 1], [], []>} : vector<16x8xf32>, vector<8x128xf32>, vector<16x128xf32> -> vector<16x128xf32>
    %244 = arith.addf %232, %243 : vector<16x128xf32>
    %c2_i32_86 = arith.constant 2 : i32
    %245 = vector.broadcast %c2_i32_86 : i32 to vector<16x8xi32>
    %246 = arith.muli %245, %202 : vector<16x8xi32>
    %c2_i32_87 = arith.constant 2 : i32
    %247 = vector.broadcast %c2_i32_87 : i32 to vector<16x8xi32>
    %248 = arith.addi %246, %247 : vector<16x8xi32>
    %249 = arith.cmpi eq, %201, %248 : vector<16x8xi32>
    %250 = arith.andi %207, %249 : vector<16x8xi1>
    %cst_88 = arith.constant 1.000000e+00 : f32
    %cst_89 = arith.constant 0.000000e+00 : f32
    %251 = vector.broadcast %cst_88 : f32 to vector<16x8xf32>
    %252 = vector.broadcast %cst_89 : f32 to vector<16x8xf32>
    %253 = arith.select %250, %251, %252 : vector<16x8xi1>, vector<16x8xf32>
    %254 = vector.extract_strided_slice %200 {offsets = [0, 384], sizes = [8, 128], strides = [1, 1]} : vector<8x512xf32> to vector<8x128xf32>
    %cst_90 = arith.constant dense<0.000000e+00> : vector<16x128xf32>
    %255 = tpu.matmul %253, %254, %cst_90 {dimension_numbers = #tpu.dot_dimension_numbers<[1], [0], [0], [1], [0, 0, 1, 1], [], []>} : vector<16x8xf32>, vector<8x128xf32>, vector<16x128xf32> -> vector<16x128xf32>
    %256 = arith.addf %244, %255 : vector<16x128xf32>
    %cst_91 = arith.constant dense<0.000000e+00> : vector<128xf32>
    %257 = vector.multi_reduction <add>, %199, %cst_91 [0] : vector<16x128xf32> to vector<128xf32>
    %258 = vector.shape_cast %257 : vector<128xf32> to vector<1x128xf32>
    %cst_92 = arith.constant 0.000000e+00 : f32
    %259 = vector.broadcast %cst_92 : f32 to vector<1x128xf32>
    %260 = arith.addf %259, %258 : vector<1x128xf32>
    %cst_93 = arith.constant dense<0.000000e+00> : vector<128xf32>
    %261 = vector.multi_reduction <add>, %256, %cst_93 [0] : vector<16x128xf32> to vector<128xf32>
    %262 = vector.shape_cast %261 : vector<128xf32> to vector<1x128xf32>
    %263 = arith.addf %260, %262 : vector<1x128xf32>
    %cst_94 = arith.constant 5.000000e-02 : f32
    %264 = vector.broadcast %cst_94 : f32 to vector<1x128xf32>
    %265 = arith.mulf %263, %264 : vector<1x128xf32>
    %266 = tpu.iota {dimensions = array<i32: 0>} : vector<16x128xi32>
    %c10_i32_95 = arith.constant 10 : i32
    %267 = vector.broadcast %c10_i32_95 : i32 to vector<16x128xi32>
    %268 = arith.cmpi slt, %266, %267 : vector<16x128xi32>
    %269 = vector.broadcast %265 : vector<1x128xf32> to vector<16x128xf32>
    %270 = arith.subf %199, %269 : vector<16x128xf32>
    %cst_96 = arith.constant 0.000000e+00 : f32
    %271 = vector.broadcast %cst_96 : f32 to vector<16x128xf32>
    %272 = arith.select %268, %270, %271 : vector<16x128xi1>, vector<16x128xf32>
    %273 = vector.broadcast %265 : vector<1x128xf32> to vector<16x128xf32>
    %274 = arith.subf %256, %273 : vector<16x128xf32>
    %cst_97 = arith.constant 0.000000e+00 : f32
    %275 = vector.broadcast %cst_97 : f32 to vector<16x128xf32>
    %276 = arith.select %268, %274, %275 : vector<16x128xi1>, vector<16x128xf32>
    %277 = arith.mulf %272, %272 : vector<16x128xf32>
    %cst_98 = arith.constant dense<0.000000e+00> : vector<128xf32>
    %278 = vector.multi_reduction <add>, %277, %cst_98 [0] : vector<16x128xf32> to vector<128xf32>
    %279 = vector.shape_cast %278 : vector<128xf32> to vector<1x128xf32>
    %cst_99 = arith.constant 0.000000e+00 : f32
    %280 = vector.broadcast %cst_99 : f32 to vector<1x128xf32>
    %281 = arith.addf %280, %279 : vector<1x128xf32>
    %282 = arith.mulf %276, %276 : vector<16x128xf32>
    %cst_100 = arith.constant dense<0.000000e+00> : vector<128xf32>
    %283 = vector.multi_reduction <add>, %282, %cst_100 [0] : vector<16x128xf32> to vector<128xf32>
    %284 = vector.shape_cast %283 : vector<128xf32> to vector<1x128xf32>
    %285 = arith.addf %281, %284 : vector<1x128xf32>
    %cst_101 = arith.constant 5.000000e-02 : f32
    %286 = vector.broadcast %cst_101 : f32 to vector<1x128xf32>
    %287 = arith.mulf %285, %286 : vector<1x128xf32>
    %cst_102 = arith.constant 9.99999974E-6 : f32
    %288 = vector.broadcast %cst_102 : f32 to vector<1x128xf32>
    %289 = arith.addf %287, %288 : vector<1x128xf32>
    %290 = math.rsqrt %289 : vector<1x128xf32>
    %291 = arith.mulf %290, %141 : vector<1x128xf32>
    %292 = vector.broadcast %291 : vector<1x128xf32> to vector<16x128xf32>
    %293 = arith.mulf %272, %292 : vector<16x128xf32>
    %294 = vector.broadcast %142 : vector<1x128xf32> to vector<16x128xf32>
    %295 = arith.addf %293, %294 : vector<16x128xf32>
    %cst_103 = arith.constant 0.000000e+00 : f32
    %296 = vector.broadcast %cst_103 : f32 to vector<16x128xf32>
    %297 = arith.maximumf %295, %296 : vector<16x128xf32>
    %298 = vector.broadcast %291 : vector<1x128xf32> to vector<16x128xf32>
    %299 = arith.mulf %276, %298 : vector<16x128xf32>
    %300 = vector.broadcast %142 : vector<1x128xf32> to vector<16x128xf32>
    %301 = arith.addf %299, %300 : vector<16x128xf32>
    %cst_104 = arith.constant 0.000000e+00 : f32
    %302 = vector.broadcast %cst_104 : f32 to vector<16x128xf32>
    %303 = arith.maximumf %301, %302 : vector<16x128xf32>
    %c0_105 = arith.constant 0 : index
    %c0_106 = arith.constant 0 : index
    %304 = vector.load %arg4[%c0_105, %c0_106] : memref<128x1024xf32, #tpu.memory_space<vmem>>, vector<128x1024xf32>
    %c4 = arith.constant 4 : index
    %c0_107 = arith.constant 0 : index
    %305 = vector.load %arg6[%c4, %c0_107] : memref<8x256xf32, #tpu.memory_space<vmem>>, vector<1x128xf32>
    %c5 = arith.constant 5 : index
    %c0_108 = arith.constant 0 : index
    %306 = vector.load %arg6[%c5, %c0_108] : memref<8x256xf32, #tpu.memory_space<vmem>>, vector<1x128xf32>
    %cst_109 = arith.constant dense<0.000000e+00> : vector<16x1024xf32>
    %307 = tpu.matmul %297, %304, %cst_109 {dimension_numbers = #tpu.dot_dimension_numbers<[1], [0], [0], [1], [0, 0, 1, 1], [], []>} : vector<16x128xf32>, vector<128x1024xf32>, vector<16x1024xf32> -> vector<16x1024xf32>
    %308 = tpu.iota {dimensions = array<i32: 0>} : vector<16x16xi32>
    %309 = tpu.iota {dimensions = array<i32: 1>} : vector<16x16xi32>
    %c10_i32_110 = arith.constant 10 : i32
    %310 = vector.broadcast %c10_i32_110 : i32 to vector<16x16xi32>
    %311 = arith.cmpi slt, %309, %310 : vector<16x16xi32>
    %c15_i32 = arith.constant 15 : i32
    %312 = vector.broadcast %c15_i32 : i32 to vector<16x16xi32>
    %313 = arith.cmpi slt, %308, %312 : vector<16x16xi32>
    %314 = arith.andi %311, %313 : vector<16x16xi1>
    %cst_111 = arith.constant 0.000000e+00 : f32
    %315 = vector.broadcast %cst_111 : f32 to vector<16x128xf32>
    %c1_i32_112 = arith.constant 1 : i32
    %316 = vector.broadcast %c1_i32_112 : i32 to vector<16x16xi32>
    %317 = arith.muli %316, %309 : vector<16x16xi32>
    %c-1_i32_113 = arith.constant -1 : i32
    %318 = vector.broadcast %c-1_i32_113 : i32 to vector<16x16xi32>
    %319 = arith.addi %317, %318 : vector<16x16xi32>
    %320 = arith.cmpi eq, %308, %319 : vector<16x16xi32>
    %321 = arith.andi %314, %320 : vector<16x16xi1>
    %cst_114 = arith.constant 1.000000e+00 : f32
    %cst_115 = arith.constant 0.000000e+00 : f32
    %322 = vector.broadcast %cst_114 : f32 to vector<16x16xf32>
    %323 = vector.broadcast %cst_115 : f32 to vector<16x16xf32>
    %324 = arith.select %321, %322, %323 : vector<16x16xi1>, vector<16x16xf32>
    %325 = vector.extract_strided_slice %307 {offsets = [0, 0], sizes = [16, 128], strides = [1, 1]} : vector<16x1024xf32> to vector<16x128xf32>
    %cst_116 = arith.constant dense<0.000000e+00> : vector<16x128xf32>
    %326 = tpu.matmul %324, %325, %cst_116 {dimension_numbers = #tpu.dot_dimension_numbers<[1], [0], [0], [1], [0, 0, 1, 1], [], []>} : vector<16x16xf32>, vector<16x128xf32>, vector<16x128xf32> -> vector<16x128xf32>
    %327 = arith.addf %315, %326 : vector<16x128xf32>
    %c1_i32_117 = arith.constant 1 : i32
    %328 = vector.broadcast %c1_i32_117 : i32 to vector<16x16xi32>
    %329 = arith.muli %328, %309 : vector<16x16xi32>
    %c0_i32_118 = arith.constant 0 : i32
    %330 = vector.broadcast %c0_i32_118 : i32 to vector<16x16xi32>
    %331 = arith.addi %329, %330 : vector<16x16xi32>
    %332 = arith.cmpi eq, %308, %331 : vector<16x16xi32>
    %333 = arith.andi %314, %332 : vector<16x16xi1>
    %cst_119 = arith.constant 1.000000e+00 : f32
    %cst_120 = arith.constant 0.000000e+00 : f32
    %334 = vector.broadcast %cst_119 : f32 to vector<16x16xf32>
    %335 = vector.broadcast %cst_120 : f32 to vector<16x16xf32>
    %336 = arith.select %333, %334, %335 : vector<16x16xi1>, vector<16x16xf32>
    %337 = vector.extract_strided_slice %307 {offsets = [0, 128], sizes = [16, 128], strides = [1, 1]} : vector<16x1024xf32> to vector<16x128xf32>
    %cst_121 = arith.constant dense<0.000000e+00> : vector<16x128xf32>
    %338 = tpu.matmul %336, %337, %cst_121 {dimension_numbers = #tpu.dot_dimension_numbers<[1], [0], [0], [1], [0, 0, 1, 1], [], []>} : vector<16x16xf32>, vector<16x128xf32>, vector<16x128xf32> -> vector<16x128xf32>
    %339 = arith.addf %327, %338 : vector<16x128xf32>
    %c1_i32_122 = arith.constant 1 : i32
    %340 = vector.broadcast %c1_i32_122 : i32 to vector<16x16xi32>
    %341 = arith.muli %340, %309 : vector<16x16xi32>
    %c1_i32_123 = arith.constant 1 : i32
    %342 = vector.broadcast %c1_i32_123 : i32 to vector<16x16xi32>
    %343 = arith.addi %341, %342 : vector<16x16xi32>
    %344 = arith.cmpi eq, %308, %343 : vector<16x16xi32>
    %345 = arith.andi %314, %344 : vector<16x16xi1>
    %cst_124 = arith.constant 1.000000e+00 : f32
    %cst_125 = arith.constant 0.000000e+00 : f32
    %346 = vector.broadcast %cst_124 : f32 to vector<16x16xf32>
    %347 = vector.broadcast %cst_125 : f32 to vector<16x16xf32>
    %348 = arith.select %345, %346, %347 : vector<16x16xi1>, vector<16x16xf32>
    %349 = vector.extract_strided_slice %307 {offsets = [0, 256], sizes = [16, 128], strides = [1, 1]} : vector<16x1024xf32> to vector<16x128xf32>
    %cst_126 = arith.constant dense<0.000000e+00> : vector<16x128xf32>
    %350 = tpu.matmul %348, %349, %cst_126 {dimension_numbers = #tpu.dot_dimension_numbers<[1], [0], [0], [1], [0, 0, 1, 1], [], []>} : vector<16x16xf32>, vector<16x128xf32>, vector<16x128xf32> -> vector<16x128xf32>
    %351 = arith.addf %339, %350 : vector<16x128xf32>
    %c1_i32_127 = arith.constant 1 : i32
    %352 = vector.broadcast %c1_i32_127 : i32 to vector<16x16xi32>
    %353 = arith.muli %352, %309 : vector<16x16xi32>
    %c2_i32_128 = arith.constant 2 : i32
    %354 = vector.broadcast %c2_i32_128 : i32 to vector<16x16xi32>
    %355 = arith.addi %353, %354 : vector<16x16xi32>
    %356 = arith.cmpi eq, %308, %355 : vector<16x16xi32>
    %357 = arith.andi %314, %356 : vector<16x16xi1>
    %cst_129 = arith.constant 1.000000e+00 : f32
    %cst_130 = arith.constant 0.000000e+00 : f32
    %358 = vector.broadcast %cst_129 : f32 to vector<16x16xf32>
    %359 = vector.broadcast %cst_130 : f32 to vector<16x16xf32>
    %360 = arith.select %357, %358, %359 : vector<16x16xi1>, vector<16x16xf32>
    %361 = vector.extract_strided_slice %307 {offsets = [0, 384], sizes = [16, 128], strides = [1, 1]} : vector<16x1024xf32> to vector<16x128xf32>
    %cst_131 = arith.constant dense<0.000000e+00> : vector<16x128xf32>
    %362 = tpu.matmul %360, %361, %cst_131 {dimension_numbers = #tpu.dot_dimension_numbers<[1], [0], [0], [1], [0, 0, 1, 1], [], []>} : vector<16x16xf32>, vector<16x128xf32>, vector<16x128xf32> -> vector<16x128xf32>
    %363 = arith.addf %351, %362 : vector<16x128xf32>
    %c1_i32_132 = arith.constant 1 : i32
    %364 = vector.broadcast %c1_i32_132 : i32 to vector<16x16xi32>
    %365 = arith.muli %364, %309 : vector<16x16xi32>
    %c3_i32_133 = arith.constant 3 : i32
    %366 = vector.broadcast %c3_i32_133 : i32 to vector<16x16xi32>
    %367 = arith.addi %365, %366 : vector<16x16xi32>
    %368 = arith.cmpi eq, %308, %367 : vector<16x16xi32>
    %369 = arith.andi %314, %368 : vector<16x16xi1>
    %cst_134 = arith.constant 1.000000e+00 : f32
    %cst_135 = arith.constant 0.000000e+00 : f32
    %370 = vector.broadcast %cst_134 : f32 to vector<16x16xf32>
    %371 = vector.broadcast %cst_135 : f32 to vector<16x16xf32>
    %372 = arith.select %369, %370, %371 : vector<16x16xi1>, vector<16x16xf32>
    %373 = vector.extract_strided_slice %307 {offsets = [0, 512], sizes = [16, 128], strides = [1, 1]} : vector<16x1024xf32> to vector<16x128xf32>
    %cst_136 = arith.constant dense<0.000000e+00> : vector<16x128xf32>
    %374 = tpu.matmul %372, %373, %cst_136 {dimension_numbers = #tpu.dot_dimension_numbers<[1], [0], [0], [1], [0, 0, 1, 1], [], []>} : vector<16x16xf32>, vector<16x128xf32>, vector<16x128xf32> -> vector<16x128xf32>
    %375 = arith.addf %363, %374 : vector<16x128xf32>
    %c1_i32_137 = arith.constant 1 : i32
    %376 = vector.broadcast %c1_i32_137 : i32 to vector<16x16xi32>
    %377 = arith.muli %376, %309 : vector<16x16xi32>
    %c4_i32_138 = arith.constant 4 : i32
    %378 = vector.broadcast %c4_i32_138 : i32 to vector<16x16xi32>
    %379 = arith.addi %377, %378 : vector<16x16xi32>
    %380 = arith.cmpi eq, %308, %379 : vector<16x16xi32>
    %381 = arith.andi %314, %380 : vector<16x16xi1>
    %cst_139 = arith.constant 1.000000e+00 : f32
    %cst_140 = arith.constant 0.000000e+00 : f32
    %382 = vector.broadcast %cst_139 : f32 to vector<16x16xf32>
    %383 = vector.broadcast %cst_140 : f32 to vector<16x16xf32>
    %384 = arith.select %381, %382, %383 : vector<16x16xi1>, vector<16x16xf32>
    %385 = vector.extract_strided_slice %307 {offsets = [0, 640], sizes = [16, 128], strides = [1, 1]} : vector<16x1024xf32> to vector<16x128xf32>
    %cst_141 = arith.constant dense<0.000000e+00> : vector<16x128xf32>
    %386 = tpu.matmul %384, %385, %cst_141 {dimension_numbers = #tpu.dot_dimension_numbers<[1], [0], [0], [1], [0, 0, 1, 1], [], []>} : vector<16x16xf32>, vector<16x128xf32>, vector<16x128xf32> -> vector<16x128xf32>
    %387 = arith.addf %375, %386 : vector<16x128xf32>
    %c1_i32_142 = arith.constant 1 : i32
    %388 = vector.broadcast %c1_i32_142 : i32 to vector<16x16xi32>
    %389 = arith.muli %388, %309 : vector<16x16xi32>
    %c5_i32_143 = arith.constant 5 : i32
    %390 = vector.broadcast %c5_i32_143 : i32 to vector<16x16xi32>
    %391 = arith.addi %389, %390 : vector<16x16xi32>
    %392 = arith.cmpi eq, %308, %391 : vector<16x16xi32>
    %393 = arith.andi %314, %392 : vector<16x16xi1>
    %cst_144 = arith.constant 1.000000e+00 : f32
    %cst_145 = arith.constant 0.000000e+00 : f32
    %394 = vector.broadcast %cst_144 : f32 to vector<16x16xf32>
    %395 = vector.broadcast %cst_145 : f32 to vector<16x16xf32>
    %396 = arith.select %393, %394, %395 : vector<16x16xi1>, vector<16x16xf32>
    %397 = vector.extract_strided_slice %307 {offsets = [0, 768], sizes = [16, 128], strides = [1, 1]} : vector<16x1024xf32> to vector<16x128xf32>
    %cst_146 = arith.constant dense<0.000000e+00> : vector<16x128xf32>
    %398 = tpu.matmul %396, %397, %cst_146 {dimension_numbers = #tpu.dot_dimension_numbers<[1], [0], [0], [1], [0, 0, 1, 1], [], []>} : vector<16x16xf32>, vector<16x128xf32>, vector<16x128xf32> -> vector<16x128xf32>
    %399 = arith.addf %387, %398 : vector<16x128xf32>
    %c1_i32_147 = arith.constant 1 : i32
    %400 = vector.broadcast %c1_i32_147 : i32 to vector<16x16xi32>
    %401 = arith.muli %400, %309 : vector<16x16xi32>
    %c6_i32 = arith.constant 6 : i32
    %402 = vector.broadcast %c6_i32 : i32 to vector<16x16xi32>
    %403 = arith.addi %401, %402 : vector<16x16xi32>
    %404 = arith.cmpi eq, %308, %403 : vector<16x16xi32>
    %405 = arith.andi %314, %404 : vector<16x16xi1>
    %cst_148 = arith.constant 1.000000e+00 : f32
    %cst_149 = arith.constant 0.000000e+00 : f32
    %406 = vector.broadcast %cst_148 : f32 to vector<16x16xf32>
    %407 = vector.broadcast %cst_149 : f32 to vector<16x16xf32>
    %408 = arith.select %405, %406, %407 : vector<16x16xi1>, vector<16x16xf32>
    %409 = vector.extract_strided_slice %307 {offsets = [0, 896], sizes = [16, 128], strides = [1, 1]} : vector<16x1024xf32> to vector<16x128xf32>
    %cst_150 = arith.constant dense<0.000000e+00> : vector<16x128xf32>
    %410 = tpu.matmul %408, %409, %cst_150 {dimension_numbers = #tpu.dot_dimension_numbers<[1], [0], [0], [1], [0, 0, 1, 1], [], []>} : vector<16x16xf32>, vector<16x128xf32>, vector<16x128xf32> -> vector<16x128xf32>
    %411 = arith.addf %399, %410 : vector<16x128xf32>
    %cst_151 = arith.constant dense<0.000000e+00> : vector<16x1024xf32>
    %412 = tpu.matmul %303, %304, %cst_151 {dimension_numbers = #tpu.dot_dimension_numbers<[1], [0], [0], [1], [0, 0, 1, 1], [], []>} : vector<16x128xf32>, vector<128x1024xf32>, vector<16x1024xf32> -> vector<16x1024xf32>
    %413 = tpu.iota {dimensions = array<i32: 0>} : vector<16x16xi32>
    %414 = tpu.iota {dimensions = array<i32: 1>} : vector<16x16xi32>
    %c10_i32_152 = arith.constant 10 : i32
    %415 = vector.broadcast %c10_i32_152 : i32 to vector<16x16xi32>
    %416 = arith.cmpi slt, %414, %415 : vector<16x16xi32>
    %c15_i32_153 = arith.constant 15 : i32
    %417 = vector.broadcast %c15_i32_153 : i32 to vector<16x16xi32>
    %418 = arith.cmpi slt, %413, %417 : vector<16x16xi32>
    %419 = arith.andi %416, %418 : vector<16x16xi1>
    %cst_154 = arith.constant 0.000000e+00 : f32
    %420 = vector.broadcast %cst_154 : f32 to vector<16x128xf32>
    %c1_i32_155 = arith.constant 1 : i32
    %421 = vector.broadcast %c1_i32_155 : i32 to vector<16x16xi32>
    %422 = arith.muli %421, %414 : vector<16x16xi32>
    %c-1_i32_156 = arith.constant -1 : i32
    %423 = vector.broadcast %c-1_i32_156 : i32 to vector<16x16xi32>
    %424 = arith.addi %422, %423 : vector<16x16xi32>
    %425 = arith.cmpi eq, %413, %424 : vector<16x16xi32>
    %426 = arith.andi %419, %425 : vector<16x16xi1>
    %cst_157 = arith.constant 1.000000e+00 : f32
    %cst_158 = arith.constant 0.000000e+00 : f32
    %427 = vector.broadcast %cst_157 : f32 to vector<16x16xf32>
    %428 = vector.broadcast %cst_158 : f32 to vector<16x16xf32>
    %429 = arith.select %426, %427, %428 : vector<16x16xi1>, vector<16x16xf32>
    %430 = vector.extract_strided_slice %412 {offsets = [0, 0], sizes = [16, 128], strides = [1, 1]} : vector<16x1024xf32> to vector<16x128xf32>
    %cst_159 = arith.constant dense<0.000000e+00> : vector<16x128xf32>
    %431 = tpu.matmul %429, %430, %cst_159 {dimension_numbers = #tpu.dot_dimension_numbers<[1], [0], [0], [1], [0, 0, 1, 1], [], []>} : vector<16x16xf32>, vector<16x128xf32>, vector<16x128xf32> -> vector<16x128xf32>
    %432 = arith.addf %420, %431 : vector<16x128xf32>
    %c1_i32_160 = arith.constant 1 : i32
    %433 = vector.broadcast %c1_i32_160 : i32 to vector<16x16xi32>
    %434 = arith.muli %433, %414 : vector<16x16xi32>
    %c0_i32_161 = arith.constant 0 : i32
    %435 = vector.broadcast %c0_i32_161 : i32 to vector<16x16xi32>
    %436 = arith.addi %434, %435 : vector<16x16xi32>
    %437 = arith.cmpi eq, %413, %436 : vector<16x16xi32>
    %438 = arith.andi %419, %437 : vector<16x16xi1>
    %cst_162 = arith.constant 1.000000e+00 : f32
    %cst_163 = arith.constant 0.000000e+00 : f32
    %439 = vector.broadcast %cst_162 : f32 to vector<16x16xf32>
    %440 = vector.broadcast %cst_163 : f32 to vector<16x16xf32>
    %441 = arith.select %438, %439, %440 : vector<16x16xi1>, vector<16x16xf32>
    %442 = vector.extract_strided_slice %412 {offsets = [0, 128], sizes = [16, 128], strides = [1, 1]} : vector<16x1024xf32> to vector<16x128xf32>
    %cst_164 = arith.constant dense<0.000000e+00> : vector<16x128xf32>
    %443 = tpu.matmul %441, %442, %cst_164 {dimension_numbers = #tpu.dot_dimension_numbers<[1], [0], [0], [1], [0, 0, 1, 1], [], []>} : vector<16x16xf32>, vector<16x128xf32>, vector<16x128xf32> -> vector<16x128xf32>
    %444 = arith.addf %432, %443 : vector<16x128xf32>
    %c1_i32_165 = arith.constant 1 : i32
    %445 = vector.broadcast %c1_i32_165 : i32 to vector<16x16xi32>
    %446 = arith.muli %445, %414 : vector<16x16xi32>
    %c1_i32_166 = arith.constant 1 : i32
    %447 = vector.broadcast %c1_i32_166 : i32 to vector<16x16xi32>
    %448 = arith.addi %446, %447 : vector<16x16xi32>
    %449 = arith.cmpi eq, %413, %448 : vector<16x16xi32>
    %450 = arith.andi %419, %449 : vector<16x16xi1>
    %cst_167 = arith.constant 1.000000e+00 : f32
    %cst_168 = arith.constant 0.000000e+00 : f32
    %451 = vector.broadcast %cst_167 : f32 to vector<16x16xf32>
    %452 = vector.broadcast %cst_168 : f32 to vector<16x16xf32>
    %453 = arith.select %450, %451, %452 : vector<16x16xi1>, vector<16x16xf32>
    %454 = vector.extract_strided_slice %412 {offsets = [0, 256], sizes = [16, 128], strides = [1, 1]} : vector<16x1024xf32> to vector<16x128xf32>
    %cst_169 = arith.constant dense<0.000000e+00> : vector<16x128xf32>
    %455 = tpu.matmul %453, %454, %cst_169 {dimension_numbers = #tpu.dot_dimension_numbers<[1], [0], [0], [1], [0, 0, 1, 1], [], []>} : vector<16x16xf32>, vector<16x128xf32>, vector<16x128xf32> -> vector<16x128xf32>
    %456 = arith.addf %444, %455 : vector<16x128xf32>
    %c1_i32_170 = arith.constant 1 : i32
    %457 = vector.broadcast %c1_i32_170 : i32 to vector<16x16xi32>
    %458 = arith.muli %457, %414 : vector<16x16xi32>
    %c2_i32_171 = arith.constant 2 : i32
    %459 = vector.broadcast %c2_i32_171 : i32 to vector<16x16xi32>
    %460 = arith.addi %458, %459 : vector<16x16xi32>
    %461 = arith.cmpi eq, %413, %460 : vector<16x16xi32>
    %462 = arith.andi %419, %461 : vector<16x16xi1>
    %cst_172 = arith.constant 1.000000e+00 : f32
    %cst_173 = arith.constant 0.000000e+00 : f32
    %463 = vector.broadcast %cst_172 : f32 to vector<16x16xf32>
    %464 = vector.broadcast %cst_173 : f32 to vector<16x16xf32>
    %465 = arith.select %462, %463, %464 : vector<16x16xi1>, vector<16x16xf32>
    %466 = vector.extract_strided_slice %412 {offsets = [0, 384], sizes = [16, 128], strides = [1, 1]} : vector<16x1024xf32> to vector<16x128xf32>
    %cst_174 = arith.constant dense<0.000000e+00> : vector<16x128xf32>
    %467 = tpu.matmul %465, %466, %cst_174 {dimension_numbers = #tpu.dot_dimension_numbers<[1], [0], [0], [1], [0, 0, 1, 1], [], []>} : vector<16x16xf32>, vector<16x128xf32>, vector<16x128xf32> -> vector<16x128xf32>
    %468 = arith.addf %456, %467 : vector<16x128xf32>
    %c1_i32_175 = arith.constant 1 : i32
    %469 = vector.broadcast %c1_i32_175 : i32 to vector<16x16xi32>
    %470 = arith.muli %469, %414 : vector<16x16xi32>
    %c3_i32_176 = arith.constant 3 : i32
    %471 = vector.broadcast %c3_i32_176 : i32 to vector<16x16xi32>
    %472 = arith.addi %470, %471 : vector<16x16xi32>
    %473 = arith.cmpi eq, %413, %472 : vector<16x16xi32>
    %474 = arith.andi %419, %473 : vector<16x16xi1>
    %cst_177 = arith.constant 1.000000e+00 : f32
    %cst_178 = arith.constant 0.000000e+00 : f32
    %475 = vector.broadcast %cst_177 : f32 to vector<16x16xf32>
    %476 = vector.broadcast %cst_178 : f32 to vector<16x16xf32>
    %477 = arith.select %474, %475, %476 : vector<16x16xi1>, vector<16x16xf32>
    %478 = vector.extract_strided_slice %412 {offsets = [0, 512], sizes = [16, 128], strides = [1, 1]} : vector<16x1024xf32> to vector<16x128xf32>
    %cst_179 = arith.constant dense<0.000000e+00> : vector<16x128xf32>
    %479 = tpu.matmul %477, %478, %cst_179 {dimension_numbers = #tpu.dot_dimension_numbers<[1], [0], [0], [1], [0, 0, 1, 1], [], []>} : vector<16x16xf32>, vector<16x128xf32>, vector<16x128xf32> -> vector<16x128xf32>
    %480 = arith.addf %468, %479 : vector<16x128xf32>
    %c1_i32_180 = arith.constant 1 : i32
    %481 = vector.broadcast %c1_i32_180 : i32 to vector<16x16xi32>
    %482 = arith.muli %481, %414 : vector<16x16xi32>
    %c4_i32_181 = arith.constant 4 : i32
    %483 = vector.broadcast %c4_i32_181 : i32 to vector<16x16xi32>
    %484 = arith.addi %482, %483 : vector<16x16xi32>
    %485 = arith.cmpi eq, %413, %484 : vector<16x16xi32>
    %486 = arith.andi %419, %485 : vector<16x16xi1>
    %cst_182 = arith.constant 1.000000e+00 : f32
    %cst_183 = arith.constant 0.000000e+00 : f32
    %487 = vector.broadcast %cst_182 : f32 to vector<16x16xf32>
    %488 = vector.broadcast %cst_183 : f32 to vector<16x16xf32>
    %489 = arith.select %486, %487, %488 : vector<16x16xi1>, vector<16x16xf32>
    %490 = vector.extract_strided_slice %412 {offsets = [0, 640], sizes = [16, 128], strides = [1, 1]} : vector<16x1024xf32> to vector<16x128xf32>
    %cst_184 = arith.constant dense<0.000000e+00> : vector<16x128xf32>
    %491 = tpu.matmul %489, %490, %cst_184 {dimension_numbers = #tpu.dot_dimension_numbers<[1], [0], [0], [1], [0, 0, 1, 1], [], []>} : vector<16x16xf32>, vector<16x128xf32>, vector<16x128xf32> -> vector<16x128xf32>
    %492 = arith.addf %480, %491 : vector<16x128xf32>
    %c1_i32_185 = arith.constant 1 : i32
    %493 = vector.broadcast %c1_i32_185 : i32 to vector<16x16xi32>
    %494 = arith.muli %493, %414 : vector<16x16xi32>
    %c5_i32_186 = arith.constant 5 : i32
    %495 = vector.broadcast %c5_i32_186 : i32 to vector<16x16xi32>
    %496 = arith.addi %494, %495 : vector<16x16xi32>
    %497 = arith.cmpi eq, %413, %496 : vector<16x16xi32>
    %498 = arith.andi %419, %497 : vector<16x16xi1>
    %cst_187 = arith.constant 1.000000e+00 : f32
    %cst_188 = arith.constant 0.000000e+00 : f32
    %499 = vector.broadcast %cst_187 : f32 to vector<16x16xf32>
    %500 = vector.broadcast %cst_188 : f32 to vector<16x16xf32>
    %501 = arith.select %498, %499, %500 : vector<16x16xi1>, vector<16x16xf32>
    %502 = vector.extract_strided_slice %412 {offsets = [0, 768], sizes = [16, 128], strides = [1, 1]} : vector<16x1024xf32> to vector<16x128xf32>
    %cst_189 = arith.constant dense<0.000000e+00> : vector<16x128xf32>
    %503 = tpu.matmul %501, %502, %cst_189 {dimension_numbers = #tpu.dot_dimension_numbers<[1], [0], [0], [1], [0, 0, 1, 1], [], []>} : vector<16x16xf32>, vector<16x128xf32>, vector<16x128xf32> -> vector<16x128xf32>
    %504 = arith.addf %492, %503 : vector<16x128xf32>
    %c1_i32_190 = arith.constant 1 : i32
    %505 = vector.broadcast %c1_i32_190 : i32 to vector<16x16xi32>
    %506 = arith.muli %505, %414 : vector<16x16xi32>
    %c6_i32_191 = arith.constant 6 : i32
    %507 = vector.broadcast %c6_i32_191 : i32 to vector<16x16xi32>
    %508 = arith.addi %506, %507 : vector<16x16xi32>
    %509 = arith.cmpi eq, %413, %508 : vector<16x16xi32>
    %510 = arith.andi %419, %509 : vector<16x16xi1>
    %cst_192 = arith.constant 1.000000e+00 : f32
    %cst_193 = arith.constant 0.000000e+00 : f32
    %511 = vector.broadcast %cst_192 : f32 to vector<16x16xf32>
    %512 = vector.broadcast %cst_193 : f32 to vector<16x16xf32>
    %513 = arith.select %510, %511, %512 : vector<16x16xi1>, vector<16x16xf32>
    %514 = vector.extract_strided_slice %412 {offsets = [0, 896], sizes = [16, 128], strides = [1, 1]} : vector<16x1024xf32> to vector<16x128xf32>
    %cst_194 = arith.constant dense<0.000000e+00> : vector<16x128xf32>
    %515 = tpu.matmul %513, %514, %cst_194 {dimension_numbers = #tpu.dot_dimension_numbers<[1], [0], [0], [1], [0, 0, 1, 1], [], []>} : vector<16x16xf32>, vector<16x128xf32>, vector<16x128xf32> -> vector<16x128xf32>
    %516 = arith.addf %504, %515 : vector<16x128xf32>
    %cst_195 = arith.constant dense<0.000000e+00> : vector<128xf32>
    %517 = vector.multi_reduction <add>, %411, %cst_195 [0] : vector<16x128xf32> to vector<128xf32>
    %518 = vector.shape_cast %517 : vector<128xf32> to vector<1x128xf32>
    %cst_196 = arith.constant 0.000000e+00 : f32
    %519 = vector.broadcast %cst_196 : f32 to vector<1x128xf32>
    %520 = arith.addf %519, %518 : vector<1x128xf32>
    %cst_197 = arith.constant dense<0.000000e+00> : vector<128xf32>
    %521 = vector.multi_reduction <add>, %516, %cst_197 [0] : vector<16x128xf32> to vector<128xf32>
    %522 = vector.shape_cast %521 : vector<128xf32> to vector<1x128xf32>
    %523 = arith.addf %520, %522 : vector<1x128xf32>
    %cst_198 = arith.constant 0.0333333351 : f32
    %524 = vector.broadcast %cst_198 : f32 to vector<1x128xf32>
    %525 = arith.mulf %523, %524 : vector<1x128xf32>
    %526 = tpu.iota {dimensions = array<i32: 0>} : vector<16x128xi32>
    %c15_i32_199 = arith.constant 15 : i32
    %527 = vector.broadcast %c15_i32_199 : i32 to vector<16x128xi32>
    %528 = arith.cmpi slt, %526, %527 : vector<16x128xi32>
    %529 = vector.broadcast %525 : vector<1x128xf32> to vector<16x128xf32>
    %530 = arith.subf %411, %529 : vector<16x128xf32>
    %cst_200 = arith.constant 0.000000e+00 : f32
    %531 = vector.broadcast %cst_200 : f32 to vector<16x128xf32>
    %532 = arith.select %528, %530, %531 : vector<16x128xi1>, vector<16x128xf32>
    %533 = vector.broadcast %525 : vector<1x128xf32> to vector<16x128xf32>
    %534 = arith.subf %516, %533 : vector<16x128xf32>
    %cst_201 = arith.constant 0.000000e+00 : f32
    %535 = vector.broadcast %cst_201 : f32 to vector<16x128xf32>
    %536 = arith.select %528, %534, %535 : vector<16x128xi1>, vector<16x128xf32>
    %537 = arith.mulf %532, %532 : vector<16x128xf32>
    %cst_202 = arith.constant dense<0.000000e+00> : vector<128xf32>
    %538 = vector.multi_reduction <add>, %537, %cst_202 [0] : vector<16x128xf32> to vector<128xf32>
    %539 = vector.shape_cast %538 : vector<128xf32> to vector<1x128xf32>
    %cst_203 = arith.constant 0.000000e+00 : f32
    %540 = vector.broadcast %cst_203 : f32 to vector<1x128xf32>
    %541 = arith.addf %540, %539 : vector<1x128xf32>
    %542 = arith.mulf %536, %536 : vector<16x128xf32>
    %cst_204 = arith.constant dense<0.000000e+00> : vector<128xf32>
    %543 = vector.multi_reduction <add>, %542, %cst_204 [0] : vector<16x128xf32> to vector<128xf32>
    %544 = vector.shape_cast %543 : vector<128xf32> to vector<1x128xf32>
    %545 = arith.addf %541, %544 : vector<1x128xf32>
    %cst_205 = arith.constant 0.0333333351 : f32
    %546 = vector.broadcast %cst_205 : f32 to vector<1x128xf32>
    %547 = arith.mulf %545, %546 : vector<1x128xf32>
    %cst_206 = arith.constant 9.99999974E-6 : f32
    %548 = vector.broadcast %cst_206 : f32 to vector<1x128xf32>
    %549 = arith.addf %547, %548 : vector<1x128xf32>
    %550 = math.rsqrt %549 : vector<1x128xf32>
    %551 = arith.mulf %550, %305 : vector<1x128xf32>
    %552 = vector.broadcast %551 : vector<1x128xf32> to vector<16x128xf32>
    %553 = arith.mulf %532, %552 : vector<16x128xf32>
    %554 = vector.broadcast %306 : vector<1x128xf32> to vector<16x128xf32>
    %555 = arith.addf %553, %554 : vector<16x128xf32>
    %cst_207 = arith.constant 0.000000e+00 : f32
    %556 = vector.broadcast %cst_207 : f32 to vector<16x128xf32>
    %557 = arith.maximumf %555, %556 : vector<16x128xf32>
    %558 = vector.broadcast %551 : vector<1x128xf32> to vector<16x128xf32>
    %559 = arith.mulf %536, %558 : vector<16x128xf32>
    %560 = vector.broadcast %306 : vector<1x128xf32> to vector<16x128xf32>
    %561 = arith.addf %559, %560 : vector<16x128xf32>
    %cst_208 = arith.constant 0.000000e+00 : f32
    %562 = vector.broadcast %cst_208 : f32 to vector<16x128xf32>
    %563 = arith.maximumf %561, %562 : vector<16x128xf32>
    %c0_209 = arith.constant 0 : index
    %c0_210 = arith.constant 0 : index
    %564 = vector.load %arg5[%c0_209, %c0_210] : memref<128x512xf32, #tpu.memory_space<vmem>>, vector<128x512xf32>
    %c6 = arith.constant 6 : index
    %c0_211 = arith.constant 0 : index
    %565 = vector.load %arg6[%c6, %c0_211] : memref<8x256xf32, #tpu.memory_space<vmem>>, vector<1x128xf32>
    %c7 = arith.constant 7 : index
    %c0_212 = arith.constant 0 : index
    %566 = vector.load %arg6[%c7, %c0_212] : memref<8x256xf32, #tpu.memory_space<vmem>>, vector<1x128xf32>
    %cst_213 = arith.constant dense<0.000000e+00> : vector<16x512xf32>
    %567 = tpu.matmul %557, %564, %cst_213 {dimension_numbers = #tpu.dot_dimension_numbers<[1], [0], [0], [1], [0, 0, 1, 1], [], []>} : vector<16x128xf32>, vector<128x512xf32>, vector<16x512xf32> -> vector<16x512xf32>
    %568 = tpu.iota {dimensions = array<i32: 0>} : vector<32x16xi32>
    %569 = tpu.iota {dimensions = array<i32: 1>} : vector<32x16xi32>
    %c15_i32_214 = arith.constant 15 : i32
    %570 = vector.broadcast %c15_i32_214 : i32 to vector<32x16xi32>
    %571 = arith.cmpi slt, %569, %570 : vector<32x16xi32>
    %c30_i32 = arith.constant 30 : i32
    %572 = vector.broadcast %c30_i32 : i32 to vector<32x16xi32>
    %573 = arith.cmpi slt, %568, %572 : vector<32x16xi32>
    %574 = arith.andi %571, %573 : vector<32x16xi1>
    %cst_215 = arith.constant 0.000000e+00 : f32
    %575 = vector.broadcast %cst_215 : f32 to vector<32x128xf32>
    %c2_i32_216 = arith.constant 2 : i32
    %576 = vector.broadcast %c2_i32_216 : i32 to vector<32x16xi32>
    %577 = arith.muli %576, %569 : vector<32x16xi32>
    %c-1_i32_217 = arith.constant -1 : i32
    %578 = vector.broadcast %c-1_i32_217 : i32 to vector<32x16xi32>
    %579 = arith.addi %577, %578 : vector<32x16xi32>
    %580 = arith.cmpi eq, %568, %579 : vector<32x16xi32>
    %581 = arith.andi %574, %580 : vector<32x16xi1>
    %cst_218 = arith.constant 1.000000e+00 : f32
    %cst_219 = arith.constant 0.000000e+00 : f32
    %582 = vector.broadcast %cst_218 : f32 to vector<32x16xf32>
    %583 = vector.broadcast %cst_219 : f32 to vector<32x16xf32>
    %584 = arith.select %581, %582, %583 : vector<32x16xi1>, vector<32x16xf32>
    %585 = vector.extract_strided_slice %567 {offsets = [0, 0], sizes = [16, 128], strides = [1, 1]} : vector<16x512xf32> to vector<16x128xf32>
    %cst_220 = arith.constant dense<0.000000e+00> : vector<32x128xf32>
    %586 = tpu.matmul %584, %585, %cst_220 {dimension_numbers = #tpu.dot_dimension_numbers<[1], [0], [0], [1], [0, 0, 1, 1], [], []>} : vector<32x16xf32>, vector<16x128xf32>, vector<32x128xf32> -> vector<32x128xf32>
    %587 = arith.addf %575, %586 : vector<32x128xf32>
    %c2_i32_221 = arith.constant 2 : i32
    %588 = vector.broadcast %c2_i32_221 : i32 to vector<32x16xi32>
    %589 = arith.muli %588, %569 : vector<32x16xi32>
    %c0_i32_222 = arith.constant 0 : i32
    %590 = vector.broadcast %c0_i32_222 : i32 to vector<32x16xi32>
    %591 = arith.addi %589, %590 : vector<32x16xi32>
    %592 = arith.cmpi eq, %568, %591 : vector<32x16xi32>
    %593 = arith.andi %574, %592 : vector<32x16xi1>
    %cst_223 = arith.constant 1.000000e+00 : f32
    %cst_224 = arith.constant 0.000000e+00 : f32
    %594 = vector.broadcast %cst_223 : f32 to vector<32x16xf32>
    %595 = vector.broadcast %cst_224 : f32 to vector<32x16xf32>
    %596 = arith.select %593, %594, %595 : vector<32x16xi1>, vector<32x16xf32>
    %597 = vector.extract_strided_slice %567 {offsets = [0, 128], sizes = [16, 128], strides = [1, 1]} : vector<16x512xf32> to vector<16x128xf32>
    %cst_225 = arith.constant dense<0.000000e+00> : vector<32x128xf32>
    %598 = tpu.matmul %596, %597, %cst_225 {dimension_numbers = #tpu.dot_dimension_numbers<[1], [0], [0], [1], [0, 0, 1, 1], [], []>} : vector<32x16xf32>, vector<16x128xf32>, vector<32x128xf32> -> vector<32x128xf32>
    %599 = arith.addf %587, %598 : vector<32x128xf32>
    %c2_i32_226 = arith.constant 2 : i32
    %600 = vector.broadcast %c2_i32_226 : i32 to vector<32x16xi32>
    %601 = arith.muli %600, %569 : vector<32x16xi32>
    %c1_i32_227 = arith.constant 1 : i32
    %602 = vector.broadcast %c1_i32_227 : i32 to vector<32x16xi32>
    %603 = arith.addi %601, %602 : vector<32x16xi32>
    %604 = arith.cmpi eq, %568, %603 : vector<32x16xi32>
    %605 = arith.andi %574, %604 : vector<32x16xi1>
    %cst_228 = arith.constant 1.000000e+00 : f32
    %cst_229 = arith.constant 0.000000e+00 : f32
    %606 = vector.broadcast %cst_228 : f32 to vector<32x16xf32>
    %607 = vector.broadcast %cst_229 : f32 to vector<32x16xf32>
    %608 = arith.select %605, %606, %607 : vector<32x16xi1>, vector<32x16xf32>
    %609 = vector.extract_strided_slice %567 {offsets = [0, 256], sizes = [16, 128], strides = [1, 1]} : vector<16x512xf32> to vector<16x128xf32>
    %cst_230 = arith.constant dense<0.000000e+00> : vector<32x128xf32>
    %610 = tpu.matmul %608, %609, %cst_230 {dimension_numbers = #tpu.dot_dimension_numbers<[1], [0], [0], [1], [0, 0, 1, 1], [], []>} : vector<32x16xf32>, vector<16x128xf32>, vector<32x128xf32> -> vector<32x128xf32>
    %611 = arith.addf %599, %610 : vector<32x128xf32>
    %c2_i32_231 = arith.constant 2 : i32
    %612 = vector.broadcast %c2_i32_231 : i32 to vector<32x16xi32>
    %613 = arith.muli %612, %569 : vector<32x16xi32>
    %c2_i32_232 = arith.constant 2 : i32
    %614 = vector.broadcast %c2_i32_232 : i32 to vector<32x16xi32>
    %615 = arith.addi %613, %614 : vector<32x16xi32>
    %616 = arith.cmpi eq, %568, %615 : vector<32x16xi32>
    %617 = arith.andi %574, %616 : vector<32x16xi1>
    %cst_233 = arith.constant 1.000000e+00 : f32
    %cst_234 = arith.constant 0.000000e+00 : f32
    %618 = vector.broadcast %cst_233 : f32 to vector<32x16xf32>
    %619 = vector.broadcast %cst_234 : f32 to vector<32x16xf32>
    %620 = arith.select %617, %618, %619 : vector<32x16xi1>, vector<32x16xf32>
    %621 = vector.extract_strided_slice %567 {offsets = [0, 384], sizes = [16, 128], strides = [1, 1]} : vector<16x512xf32> to vector<16x128xf32>
    %cst_235 = arith.constant dense<0.000000e+00> : vector<32x128xf32>
    %622 = tpu.matmul %620, %621, %cst_235 {dimension_numbers = #tpu.dot_dimension_numbers<[1], [0], [0], [1], [0, 0, 1, 1], [], []>} : vector<32x16xf32>, vector<16x128xf32>, vector<32x128xf32> -> vector<32x128xf32>
    %623 = arith.addf %611, %622 : vector<32x128xf32>
    %cst_236 = arith.constant dense<0.000000e+00> : vector<16x512xf32>
    %624 = tpu.matmul %563, %564, %cst_236 {dimension_numbers = #tpu.dot_dimension_numbers<[1], [0], [0], [1], [0, 0, 1, 1], [], []>} : vector<16x128xf32>, vector<128x512xf32>, vector<16x512xf32> -> vector<16x512xf32>
    %625 = tpu.iota {dimensions = array<i32: 0>} : vector<32x16xi32>
    %626 = tpu.iota {dimensions = array<i32: 1>} : vector<32x16xi32>
    %c15_i32_237 = arith.constant 15 : i32
    %627 = vector.broadcast %c15_i32_237 : i32 to vector<32x16xi32>
    %628 = arith.cmpi slt, %626, %627 : vector<32x16xi32>
    %c30_i32_238 = arith.constant 30 : i32
    %629 = vector.broadcast %c30_i32_238 : i32 to vector<32x16xi32>
    %630 = arith.cmpi slt, %625, %629 : vector<32x16xi32>
    %631 = arith.andi %628, %630 : vector<32x16xi1>
    %cst_239 = arith.constant 0.000000e+00 : f32
    %632 = vector.broadcast %cst_239 : f32 to vector<32x128xf32>
    %c2_i32_240 = arith.constant 2 : i32
    %633 = vector.broadcast %c2_i32_240 : i32 to vector<32x16xi32>
    %634 = arith.muli %633, %626 : vector<32x16xi32>
    %c-1_i32_241 = arith.constant -1 : i32
    %635 = vector.broadcast %c-1_i32_241 : i32 to vector<32x16xi32>
    %636 = arith.addi %634, %635 : vector<32x16xi32>
    %637 = arith.cmpi eq, %625, %636 : vector<32x16xi32>
    %638 = arith.andi %631, %637 : vector<32x16xi1>
    %cst_242 = arith.constant 1.000000e+00 : f32
    %cst_243 = arith.constant 0.000000e+00 : f32
    %639 = vector.broadcast %cst_242 : f32 to vector<32x16xf32>
    %640 = vector.broadcast %cst_243 : f32 to vector<32x16xf32>
    %641 = arith.select %638, %639, %640 : vector<32x16xi1>, vector<32x16xf32>
    %642 = vector.extract_strided_slice %624 {offsets = [0, 0], sizes = [16, 128], strides = [1, 1]} : vector<16x512xf32> to vector<16x128xf32>
    %cst_244 = arith.constant dense<0.000000e+00> : vector<32x128xf32>
    %643 = tpu.matmul %641, %642, %cst_244 {dimension_numbers = #tpu.dot_dimension_numbers<[1], [0], [0], [1], [0, 0, 1, 1], [], []>} : vector<32x16xf32>, vector<16x128xf32>, vector<32x128xf32> -> vector<32x128xf32>
    %644 = arith.addf %632, %643 : vector<32x128xf32>
    %c2_i32_245 = arith.constant 2 : i32
    %645 = vector.broadcast %c2_i32_245 : i32 to vector<32x16xi32>
    %646 = arith.muli %645, %626 : vector<32x16xi32>
    %c0_i32_246 = arith.constant 0 : i32
    %647 = vector.broadcast %c0_i32_246 : i32 to vector<32x16xi32>
    %648 = arith.addi %646, %647 : vector<32x16xi32>
    %649 = arith.cmpi eq, %625, %648 : vector<32x16xi32>
    %650 = arith.andi %631, %649 : vector<32x16xi1>
    %cst_247 = arith.constant 1.000000e+00 : f32
    %cst_248 = arith.constant 0.000000e+00 : f32
    %651 = vector.broadcast %cst_247 : f32 to vector<32x16xf32>
    %652 = vector.broadcast %cst_248 : f32 to vector<32x16xf32>
    %653 = arith.select %650, %651, %652 : vector<32x16xi1>, vector<32x16xf32>
    %654 = vector.extract_strided_slice %624 {offsets = [0, 128], sizes = [16, 128], strides = [1, 1]} : vector<16x512xf32> to vector<16x128xf32>
    %cst_249 = arith.constant dense<0.000000e+00> : vector<32x128xf32>
    %655 = tpu.matmul %653, %654, %cst_249 {dimension_numbers = #tpu.dot_dimension_numbers<[1], [0], [0], [1], [0, 0, 1, 1], [], []>} : vector<32x16xf32>, vector<16x128xf32>, vector<32x128xf32> -> vector<32x128xf32>
    %656 = arith.addf %644, %655 : vector<32x128xf32>
    %c2_i32_250 = arith.constant 2 : i32
    %657 = vector.broadcast %c2_i32_250 : i32 to vector<32x16xi32>
    %658 = arith.muli %657, %626 : vector<32x16xi32>
    %c1_i32_251 = arith.constant 1 : i32
    %659 = vector.broadcast %c1_i32_251 : i32 to vector<32x16xi32>
    %660 = arith.addi %658, %659 : vector<32x16xi32>
    %661 = arith.cmpi eq, %625, %660 : vector<32x16xi32>
    %662 = arith.andi %631, %661 : vector<32x16xi1>
    %cst_252 = arith.constant 1.000000e+00 : f32
    %cst_253 = arith.constant 0.000000e+00 : f32
    %663 = vector.broadcast %cst_252 : f32 to vector<32x16xf32>
    %664 = vector.broadcast %cst_253 : f32 to vector<32x16xf32>
    %665 = arith.select %662, %663, %664 : vector<32x16xi1>, vector<32x16xf32>
    %666 = vector.extract_strided_slice %624 {offsets = [0, 256], sizes = [16, 128], strides = [1, 1]} : vector<16x512xf32> to vector<16x128xf32>
    %cst_254 = arith.constant dense<0.000000e+00> : vector<32x128xf32>
    %667 = tpu.matmul %665, %666, %cst_254 {dimension_numbers = #tpu.dot_dimension_numbers<[1], [0], [0], [1], [0, 0, 1, 1], [], []>} : vector<32x16xf32>, vector<16x128xf32>, vector<32x128xf32> -> vector<32x128xf32>
    %668 = arith.addf %656, %667 : vector<32x128xf32>
    %c2_i32_255 = arith.constant 2 : i32
    %669 = vector.broadcast %c2_i32_255 : i32 to vector<32x16xi32>
    %670 = arith.muli %669, %626 : vector<32x16xi32>
    %c2_i32_256 = arith.constant 2 : i32
    %671 = vector.broadcast %c2_i32_256 : i32 to vector<32x16xi32>
    %672 = arith.addi %670, %671 : vector<32x16xi32>
    %673 = arith.cmpi eq, %625, %672 : vector<32x16xi32>
    %674 = arith.andi %631, %673 : vector<32x16xi1>
    %cst_257 = arith.constant 1.000000e+00 : f32
    %cst_258 = arith.constant 0.000000e+00 : f32
    %675 = vector.broadcast %cst_257 : f32 to vector<32x16xf32>
    %676 = vector.broadcast %cst_258 : f32 to vector<32x16xf32>
    %677 = arith.select %674, %675, %676 : vector<32x16xi1>, vector<32x16xf32>
    %678 = vector.extract_strided_slice %624 {offsets = [0, 384], sizes = [16, 128], strides = [1, 1]} : vector<16x512xf32> to vector<16x128xf32>
    %cst_259 = arith.constant dense<0.000000e+00> : vector<32x128xf32>
    %679 = tpu.matmul %677, %678, %cst_259 {dimension_numbers = #tpu.dot_dimension_numbers<[1], [0], [0], [1], [0, 0, 1, 1], [], []>} : vector<32x16xf32>, vector<16x128xf32>, vector<32x128xf32> -> vector<32x128xf32>
    %680 = arith.addf %668, %679 : vector<32x128xf32>
    %cst_260 = arith.constant dense<0.000000e+00> : vector<128xf32>
    %681 = vector.multi_reduction <add>, %623, %cst_260 [0] : vector<32x128xf32> to vector<128xf32>
    %682 = vector.shape_cast %681 : vector<128xf32> to vector<1x128xf32>
    %cst_261 = arith.constant 0.000000e+00 : f32
    %683 = vector.broadcast %cst_261 : f32 to vector<1x128xf32>
    %684 = arith.addf %683, %682 : vector<1x128xf32>
    %cst_262 = arith.constant dense<0.000000e+00> : vector<128xf32>
    %685 = vector.multi_reduction <add>, %680, %cst_262 [0] : vector<32x128xf32> to vector<128xf32>
    %686 = vector.shape_cast %685 : vector<128xf32> to vector<1x128xf32>
    %687 = arith.addf %684, %686 : vector<1x128xf32>
    %cst_263 = arith.constant 0.0166666675 : f32
    %688 = vector.broadcast %cst_263 : f32 to vector<1x128xf32>
    %689 = arith.mulf %687, %688 : vector<1x128xf32>
    %690 = tpu.iota {dimensions = array<i32: 0>} : vector<32x128xi32>
    %c30_i32_264 = arith.constant 30 : i32
    %691 = vector.broadcast %c30_i32_264 : i32 to vector<32x128xi32>
    %692 = arith.cmpi slt, %690, %691 : vector<32x128xi32>
    %693 = vector.broadcast %689 : vector<1x128xf32> to vector<32x128xf32>
    %694 = arith.subf %623, %693 : vector<32x128xf32>
    %cst_265 = arith.constant 0.000000e+00 : f32
    %695 = vector.broadcast %cst_265 : f32 to vector<32x128xf32>
    %696 = arith.select %692, %694, %695 : vector<32x128xi1>, vector<32x128xf32>
    %697 = vector.broadcast %689 : vector<1x128xf32> to vector<32x128xf32>
    %698 = arith.subf %680, %697 : vector<32x128xf32>
    %cst_266 = arith.constant 0.000000e+00 : f32
    %699 = vector.broadcast %cst_266 : f32 to vector<32x128xf32>
    %700 = arith.select %692, %698, %699 : vector<32x128xi1>, vector<32x128xf32>
    %701 = arith.mulf %696, %696 : vector<32x128xf32>
    %cst_267 = arith.constant dense<0.000000e+00> : vector<128xf32>
    %702 = vector.multi_reduction <add>, %701, %cst_267 [0] : vector<32x128xf32> to vector<128xf32>
    %703 = vector.shape_cast %702 : vector<128xf32> to vector<1x128xf32>
    %cst_268 = arith.constant 0.000000e+00 : f32
    %704 = vector.broadcast %cst_268 : f32 to vector<1x128xf32>
    %705 = arith.addf %704, %703 : vector<1x128xf32>
    %706 = arith.mulf %700, %700 : vector<32x128xf32>
    %cst_269 = arith.constant dense<0.000000e+00> : vector<128xf32>
    %707 = vector.multi_reduction <add>, %706, %cst_269 [0] : vector<32x128xf32> to vector<128xf32>
    %708 = vector.shape_cast %707 : vector<128xf32> to vector<1x128xf32>
    %709 = arith.addf %705, %708 : vector<1x128xf32>
    %cst_270 = arith.constant 0.0166666675 : f32
    %710 = vector.broadcast %cst_270 : f32 to vector<1x128xf32>
    %711 = arith.mulf %709, %710 : vector<1x128xf32>
    %cst_271 = arith.constant 9.99999974E-6 : f32
    %712 = vector.broadcast %cst_271 : f32 to vector<1x128xf32>
    %713 = arith.addf %711, %712 : vector<1x128xf32>
    %714 = math.rsqrt %713 : vector<1x128xf32>
    %715 = arith.mulf %714, %565 : vector<1x128xf32>
    %716 = vector.broadcast %715 : vector<1x128xf32> to vector<32x128xf32>
    %717 = arith.mulf %696, %716 : vector<32x128xf32>
    %718 = vector.broadcast %566 : vector<1x128xf32> to vector<32x128xf32>
    %719 = arith.addf %717, %718 : vector<32x128xf32>
    %cst_272 = arith.constant 0.000000e+00 : f32
    %720 = vector.broadcast %cst_272 : f32 to vector<32x128xf32>
    %721 = arith.maximumf %719, %720 : vector<32x128xf32>
    %722 = vector.broadcast %715 : vector<1x128xf32> to vector<32x128xf32>
    %723 = arith.mulf %700, %722 : vector<32x128xf32>
    %724 = vector.broadcast %566 : vector<1x128xf32> to vector<32x128xf32>
    %725 = arith.addf %723, %724 : vector<32x128xf32>
    %cst_273 = arith.constant 0.000000e+00 : f32
    %726 = vector.broadcast %cst_273 : f32 to vector<32x128xf32>
    %727 = arith.maximumf %725, %726 : vector<32x128xf32>
    %c0_274 = arith.constant 0 : index
    %c0_275 = arith.constant 0 : index
    %728 = vector.load %arg7[%c0_274, %c0_275] : memref<128x128xf32, #tpu.memory_space<vmem>>, vector<128x128xf32>
    %cst_276 = arith.constant dense<0.000000e+00> : vector<32x128xf32>
    %729 = tpu.matmul %721, %728, %cst_276 {dimension_numbers = #tpu.dot_dimension_numbers<[1], [0], [0], [1], [0, 0, 1, 1], [], []>} : vector<32x128xf32>, vector<128x128xf32>, vector<32x128xf32> -> vector<32x128xf32>
    %730 = math.tanh %729 : vector<32x128xf32>
    %c0_277 = arith.constant 0 : index
    %c0_278 = arith.constant 0 : index
    %731 = vector.load %arg8[%c0_277, %c0_278] : memref<64x128xf32, #tpu.memory_space<vmem>>, vector<32x128xf32>
    tpu.vector_store %arg8[%c0_277, %c0_278], %730 {strides = array<i32>} : memref<64x128xf32, #tpu.memory_space<vmem>>, vector<32x128xf32>,
    %cst_279 = arith.constant dense<0.000000e+00> : vector<32x128xf32>
    %732 = tpu.matmul %727, %728, %cst_279 {dimension_numbers = #tpu.dot_dimension_numbers<[1], [0], [0], [1], [0, 0, 1, 1], [], []>} : vector<32x128xf32>, vector<128x128xf32>, vector<32x128xf32> -> vector<32x128xf32>
    %733 = math.tanh %732 : vector<32x128xf32>
    %c32 = arith.constant 32 : index
    %c0_280 = arith.constant 0 : index
    %734 = vector.load %arg8[%c32, %c0_280] : memref<64x128xf32, #tpu.memory_space<vmem>>, vector<32x128xf32>
    tpu.vector_store %arg8[%c32, %c0_280], %733 {strides = array<i32>} : memref<64x128xf32, #tpu.memory_space<vmem>>, vector<32x128xf32>,
    return
  }
  func.func @transform_0(%arg0: i32) -> (i32, i32, i32) {
    %c0_i32 = arith.constant 0 : i32
    %c0_i32_0 = arith.constant 0 : i32
    %c0_i32_1 = arith.constant 0 : i32
    %c0_i32_2 = arith.constant 0 : i32
    return %c0_i32, %c0_i32_0, %c0_i32_1 : i32, i32, i32
  }
  func.func @transform_1(%arg0: i32) -> (i32, i32) {
    %c0_i32 = arith.constant 0 : i32
    %c0_i32_0 = arith.constant 0 : i32
    %c0_i32_1 = arith.constant 0 : i32
    return %c0_i32, %c0_i32_0 : i32, i32
  }
  func.func @transform_2(%arg0: i32) -> (i32, i32) {
    %c0_i32 = arith.constant 0 : i32
    %c0_i32_0 = arith.constant 0 : i32
    %c0_i32_1 = arith.constant 0 : i32
    return %c0_i32, %c0_i32_0 : i32, i32
  }
  func.func @transform_3(%arg0: i32) -> (i32, i32) {
    %c0_i32 = arith.constant 0 : i32
    %c0_i32_0 = arith.constant 0 : i32
    %c0_i32_1 = arith.constant 0 : i32
    return %c0_i32, %c0_i32_0 : i32, i32
  }
  func.func @transform_4(%arg0: i32) -> (i32, i32) {
    %c0_i32 = arith.constant 0 : i32
    %c0_i32_0 = arith.constant 0 : i32
    %c0_i32_1 = arith.constant 0 : i32
    return %c0_i32, %c0_i32_0 : i32, i32
  }
  func.func @transform_5(%arg0: i32) -> (i32, i32) {
    %c0_i32 = arith.constant 0 : i32
    %c0_i32_0 = arith.constant 0 : i32
    %c0_i32_1 = arith.constant 0 : i32
    return %c0_i32, %c0_i32_0 : i32, i32
  }
  func.func @transform_6(%arg0: i32) -> (i32, i32) {
    %c0_i32 = arith.constant 0 : i32
    %c0_i32_0 = arith.constant 0 : i32
    %c0_i32_1 = arith.constant 0 : i32
    return %c0_i32, %c0_i32_0 : i32, i32
  }
  func.func @transform_7(%arg0: i32) -> (i32, i32) {
    %c0_i32 = arith.constant 0 : i32
    %c0_i32_0 = arith.constant 0 : i32
    %c0_i32_1 = arith.constant 0 : i32
    return %c0_i32, %c0_i32_0 : i32, i32
  }
}

</mosaic_0001>

<bundles_post_ra>
// kernel: _lambda_.1
= control target key start
LH: loop header
LB: loop body
LE: loop exit
PB: predicated region body
PF: predicated region fallthrough
CT: control target
= control target key end

     0   :  { %12 = vsyncpa [#allocation3], 0  ;;  %s8943_s0 = inlined_call_operand.vmem [shape: f32[2,1,8], index: 0, kind: input, shape index: {}]   ;;  %s8944_s1 = inlined_call_operand.hbm [shape: f32[8,1280], index: 1, kind: input, shape index: {}]   ;;  %s8945_s2 = inlined_call_operand.hbm [shape: f32[256,512], index: 2, kind: input, shape index: {}]   ;;  %s8946_s3 = inlined_call_operand.hbm [shape: f32[128,1024], index: 3, kind: input, shape index: {}]   ;;  %s8947_s4 = inlined_call_operand.hbm [shape: f32[128,512], index: 4, kind: input, shape index: {}]   ;;  %s8948_s5 = inlined_call_operand.vmem [shape: f32[8,256], index: 5, kind: input, shape index: {}]   ;;  %s8949_s6 = inlined_call_operand.hbm [shape: f32[128,128], index: 6, kind: input, shape index: {}]   ;;  %s8950_s7 = inlined_call_operand.vmem [shape: f32[64,128], index: 7, kind: output, shape index: {}]  }
   0x1   :  { %13 = vsyncpa [#allocation5], 0 }
   0x2   :  { %14 = vsyncpa [#allocation8], 0  ;;  %s7421_s24 = smov [#allocation4]   ;;  %s7305_s28 = scalar_lea.hbm %s8945_s2, 16384 }
   0x3   :  { %s32_s25 = sshll.u32 %s7421_s24, 4  ;;  %p7306_p0 = scmp.ne.s32.totalorder %s8945_s2, %s7305_s28  ;;  %s33_s25 = int_to_ptr.vmem [resolvable:$true] %s32_s25 }
   0x4   :  { %p7309_p1 = scmp.lt.u32.totalorder %s7305_s28, %s8945_s2 }
   0x6   :  { %p7311_p2 = pnand %p7309_p1, %p7306_p0 }
   0x8   :  { %7314 = shalt.err (!%p7311_p2)
}
   0x9   :  { %s7315_s10 = scalar_lea.vmem %s33_s25, 16384  ;;  %p7320_p4 = scmp.lt.s32.totalorder %s33_s25, %s33_s25 }
   0xa   :  { %p7316_p3 = scmp.ne.s32.totalorder %s33_s25, %s7315_s10  ;;  %p7321_p5 = scmp.lt.s32.totalorder %s7315_s10, %s7315_s10 }
   0xc   :  { %p7322_p6 = por %p7321_p5, %p7320_p4 }
   0xe   :  { %p7323_p7 = pnand %p7322_p6, %p7316_p3 }
  0x10   :  { %7326 = shalt.err (!%p7323_p7)
}
  0x11   :  { %s7422_s11 = smov 512   ;;  %s7423_s12 = smov 32  }
  0x12   :  { %38 = dma.hbm_to_vmem [thread:$0]  %s8945_s2, 16384, %s33_s25, [#allocation5], %s7422_s11, %s7422_s11, %s7423_s12  }
  0x13   :  { %s7424_s15 = smov [#allocation7]   ;;  %s7425_s17 = smov [#allocation2]  }
  0x14   :  { %s56_s16 = sshll.u32 %s7424_s15, 4  ;;  %s23_s18 = sshll.u32 %s7425_s17, 4  ;;  %s57_s16 = int_to_ptr.vmem [resolvable:$true] %s56_s16  ;;  %s24_s18 = int_to_ptr.vmem [resolvable:$true] %s23_s18 }
  0x15   :  { %s7327_s21 = scalar_lea.hbm %s8947_s4, 8192 }
  0x16   :  { %p7328_p8 = scmp.ne.s32.totalorder %s8947_s4, %s7327_s21  ;;  %p7331_p9 = scmp.lt.u32.totalorder %s7327_s21, %s8947_s4 }
  0x18   :  { %p7333_p10 = pnand %p7331_p9, %p7328_p8 }
  0x1a   :  { %7336 = shalt.err (!%p7333_p10)
}
  0x1b   :  { %s7337_s2 = scalar_lea.vmem %s57_s16, 8192  ;;  %p7342_p12 = scmp.lt.s32.totalorder %s57_s16, %s57_s16 }
  0x1c   :  { %p7338_p11 = scmp.ne.s32.totalorder %s57_s16, %s7337_s2  ;;  %p7343_p13 = scmp.lt.s32.totalorder %s7337_s2, %s7337_s2 }
  0x1e   :  { %p7344_p0 = por %p7343_p13, %p7342_p12 }
  0x20   :  { %p7345_p1 = pnand %p7344_p0, %p7338_p11 }
  0x22   :  { %7348 = shalt.err (!%p7345_p1)
}
  0x23   :  { %62 = dma.hbm_to_vmem [thread:$0]  %s8947_s4, 8192, %s57_s16, [#allocation8], %s7422_s11, %s7422_s11, %s7423_s12  }
  0x24   :  { %s7349_s30 = scalar_lea.hbm %s8944_s1, 1280 }
  0x25   :  { %p7350_p2 = scmp.ne.s32.totalorder %s8944_s1, %s7349_s30  ;;  %p7353_p3 = scmp.lt.u32.totalorder %s7349_s30, %s8944_s1 }
  0x27   :  { %p7355_p4 = pnand %p7353_p3, %p7350_p2 }
  0x29   :  { %7358 = shalt.err (!%p7355_p4)
}
  0x2a   :  { %s7359_s14 = scalar_lea.vmem %s24_s18, 1280  ;;  %p7364_p6 = scmp.lt.s32.totalorder %s24_s18, %s24_s18 }
  0x2b   :  { %p7360_p5 = scmp.ne.s32.totalorder %s24_s18, %s7359_s14  ;;  %p7365_p7 = scmp.lt.s32.totalorder %s7359_s14, %s7359_s14 }
  0x2d   :  { %p7366_p8 = por %p7365_p7, %p7364_p6 }
  0x2f   :  { %p7367_p9 = pnand %p7366_p8, %p7360_p5 }
  0x31   :  { %7370 = shalt.err (!%p7367_p9)
}
  0x32   :  { %26 = dma.hbm_to_vmem [thread:$0]  %s8944_s1, 1280, %s24_s18, [#allocation3]  }
  0x33   :  { %s7426_s12 = smov [#allocation6]   ;;  %s7371_s19 = scalar_lea.hbm %s8946_s3, 16384 }
  0x34   :  { %s44_s15 = sshll.u32 %s7426_s12, 4  ;;  %p7372_p10 = scmp.ne.s32.totalorder %s8946_s3, %s7371_s19  ;;  %s45_s15 = int_to_ptr.vmem [resolvable:$true] %s44_s15 }
  0x35   :  { %p7375_p11 = scmp.lt.u32.totalorder %s7371_s19, %s8946_s3 }
  0x37   :  { %p7377_p12 = pnand %p7375_p11, %p7372_p10 }
  0x39   :  { %7380 = shalt.err (!%p7377_p12)
}
  0x3a   :  { %s7381_s24 = scalar_lea.vmem %s45_s15, 16384  ;;  %p7386_p0 = scmp.lt.s32.totalorder %s45_s15, %s45_s15 }
  0x3b   :  { %p7382_p13 = scmp.ne.s32.totalorder %s45_s15, %s7381_s24  ;;  %p7387_p1 = scmp.lt.s32.totalorder %s7381_s24, %s7381_s24 }
  0x3d   :  { %p7388_p2 = por %p7387_p1, %p7386_p0 }
  0x3f   :  { %p7389_p3 = pnand %p7388_p2, %p7382_p13 }
  0x41   :  { %7392 = shalt.err (!%p7389_p3)
}
  0x42   :  { %s7427_s1 = smov 1024   ;;  %s7428_s18 = smov 64  }
  0x43   :  { %50 = dma.hbm_to_vmem [thread:$0]  %s8946_s3, 16384, %s45_s15, [#allocation5], %s7427_s1, %s7427_s1, %s7428_s18  }
  0x44   :  { %s7429_s25 = smov [#allocation9]   ;;  %s7393_s30 = scalar_lea.hbm %s8949_s6, 2048 }
  0x45   :  { %s70_s27 = sshll.u32 %s7429_s25, 4  ;;  %p7394_p4 = scmp.ne.s32.totalorder %s8949_s6, %s7393_s30  ;;  %s71_s27 = int_to_ptr.vmem [resolvable:$true] %s70_s27 }
  0x46   :  { %p7397_p5 = scmp.lt.u32.totalorder %s7393_s30, %s8949_s6 }
  0x48   :  { %p7399_p6 = pnand %p7397_p5, %p7394_p4 }
  0x4a   :  { %7402 = shalt.err (!%p7399_p6)
}
  0x4b   :  { %s7403_s14 = scalar_lea.vmem %s71_s27, 2048  ;;  %p7408_p8 = scmp.lt.s32.totalorder %s71_s27, %s71_s27 }
  0x4c   :  { %p7404_p7 = scmp.ne.s32.totalorder %s71_s27, %s7403_s14  ;;  %p7409_p9 = scmp.lt.s32.totalorder %s7403_s14, %s7403_s14 }
  0x4e   :  { %p7410_p10 = por %p7409_p9, %p7408_p8 }
  0x50   :  { %p7411_p11 = pnand %p7410_p10, %p7404_p7 }
  0x52   :  { %7414 = shalt.err (!%p7411_p11)
}
  0x53   :  { %s7430_s3 = smov 128   ;;  %s7431_s4 = smov 8  }
  0x54   :  { %76 = dma.hbm_to_vmem [thread:$0]  %s8949_s6, 2048, %s71_s27, [#allocation8], %s7430_s3, %s7430_s3, %s7431_s4  }
  0x55   :  { %7415 = dma.done.wait [#allocation3], 1280  }
  0x56   :  { %7416 = vsyncadd [#allocation3], 4294966016 }
  0x57   :  { %7417 = dma.done.wait [#allocation5], 32768  }
  0x58   :  { %7418 = vsyncadd [#allocation5], 4294934528 }
  0x59   :  { %7419 = dma.done.wait [#allocation8], 10240  }
  0x5a   :  { %7420 = vsyncadd [#allocation8], 4294957056  ;;  %v8951_v0 = vmov 0.0   ;;  %v96_v1 = vld [vmem:[#allocation2 + $0x8] sm:$0xff]  ;;  %v95_v2 = vld [vmem:[#allocation2] sm:$0xff]  ;;  %vm108_vm0 = vcmask 64512  }
  0x5b   :  { %176 = vmatprep.mubr.f32.mxu1 %v8951_v0  ;;  %318 = vmatprep.mubr.f32.mxu0 %v8951_v0  ;;  %v92_v3 = vld [vmem:[%s8943_s0] sm:$0x1]  ;;  %v98_v4 = vld [vmem:[#allocation2 + $0x18] sm:$0xff]  ;;  %v100_v5 = vld [vmem:[#allocation2 + $0x28] sm:$0xff] }
  0x5c   :  { %112 = vmatprep.subr.mxu1 %v96_v1  ;;  %v97_v6 = vld [vmem:[#allocation2 + $0x10] sm:$0xff]  ;;  %254 = vmatprep.subr.mxu0 %v100_v5  ;;  %v99_v7 = vld [vmem:[#allocation2 + $0x20] sm:$0xff]  ;;  %v102_v8 = vld [vmem:[#allocation2 + $0x38] sm:$0xff] }
  0x5d   :  { %113 = vmatpush1.msra.mxu1 %v95_v2  ;;  %v104_v9 = vld [vmem:[#allocation2 + $0x48] sm:$0xff]  ;;  %v103_v10 = vld [vmem:[#allocation2 + $0x40] sm:$0xff]  ;;  %255 = vmatpush1.msra.mxu0 %v99_v7  ;;  %v101_v11 = vld [vmem:[#allocation2 + $0x30] sm:$0xff] }
  0x5e   :  { %5829 = vmatmul.mubr.msk.f32.vlgmr.msra.gmra.mrb[0].mxu1 %vm108_vm0, %v92_v3  ;;  %183 = vmatprep.subr.mxu1 %v98_v4  ;;  %v5827_v12 = vld [vmem:[%s8943_s0 + $0x1] sm:$0x1]  ;;  %v1076_v13 = vld [vmem:[#allocation4 + $0x18] sm:$0xff]  ;;  %v1074_v16 = vld [vmem:[#allocation4 + $0x8] sm:$0xff] }
  0x5f   :  { %184 = vmatpush1.msra.mxu1 %v97_v6  ;;  %247 = vmatprep.mubr.f32.mxu1 %v8951_v0  ;;  %v1080_v14 = vld [vmem:[#allocation4 + $0x38] sm:$0xff]  ;;  %v1078_v17 = vld [vmem:[#allocation4 + $0x28] sm:$0xff]  ;;  %v1075_v18 = vld [vmem:[#allocation4 + $0x10] sm:$0xff] }
  0x60   :  { %325 = vmatprep.subr.mxu1 %v102_v8  ;;  %5831 = vmatmul.mubr.msk.f32.vlgmr.msra.gmra.mrb[0].mxu0 %vm108_vm0, %v92_v3  ;;  %v7559_v15 = vpack.c.bf16 %v1080_v14, %v1076_v13  ;;  %v7561_v19 = vpack.c.bf16 %v1078_v17, %v1074_v16  ;;  %v1079_v20 = vld [vmem:[#allocation4 + $0x30] sm:$0xff]  ;;  %v1073_v21 = vld [vmem:[#allocation4] sm:$0xff]  ;;  %v1084_v25 = vld [vmem:[#allocation4 + $0x58] sm:$0xff] }
  0x61   :  { %396 = vmatprep.subr.mxu0 %v104_v9  ;;  %460 = vmatprep.mubr.f32.mxu0 %v8951_v0  ;;  %v1077_v22 = vld [vmem:[#allocation4 + $0x20] sm:$0xff]  ;;  %v7564_v23 = vpack.c.bf16 %v1079_v20, %v1075_v18  ;;  %v1088_v26 = vld [vmem:[#allocation4 + $0x78] sm:$0xff]  ;;  %v1082_v28 = vld [vmem:[#allocation4 + $0x48] sm:$0xff] }
  0x62   :  { %5830 = vmatmul.mubr.msk.f32.vlgmr.msra.gmra.mrb[2].mxu1 %vm108_vm0, %v92_v3  ;;  %397 = vmatpush1.msra.mxu0 %v103_v10  ;;  %9016 = vst [vmem:[#allocation13_spill] sm:$0xff] %v7559_v15  ;;  %v7566_v24 = vpack.c.bf16 %v1077_v22, %v1073_v21  ;;  %v7571_v27 = vpack.c.bf16 %v1088_v26, %v1084_v25  ;;  %v1086_v29 = vld [vmem:[#allocation4 + $0x68] sm:$0xff]  ;;  %v1083_v30 = vld [vmem:[#allocation4 + $0x50] sm:$0xff]  ;;  %v1081_v33 = vld [vmem:[#allocation4 + $0x40] sm:$0xff] }
  0x63   :  { %326 = vmatpush1.msra.mxu1 %v101_v11  ;;  %389 = vmatprep.mubr.f32.mxu1 %v8951_v0  ;;  %9017 = vst [vmem:[#allocation14_spill] sm:$0xff] %v7564_v23  ;;  %v7573_v31 = vpack.c.bf16 %v1086_v29, %v1082_v28  ;;  %v1087_v32 = vld [vmem:[#allocation4 + $0x70] sm:$0xff]  ;;  %v1085_v34 = vld [vmem:[#allocation4 + $0x60] sm:$0xff]  ;;  %v1092_v37 = vld [vmem:[#allocation4 + $0x98] sm:$0xff] }
  0x64   :  { %537 = vmatprep.subr.mxu1 %v96_v1  ;;  %5833 = vmatmul.mubr.msk.f32.vlgmr.msra.gmra.mrb[2].mxu0 %vm108_vm0, %v92_v3  ;;  %9018 = vst [vmem:[#allocation15_spill] sm:$0xff] %v7571_v27  ;;  %v7576_v35 = vpack.c.bf16 %v1087_v32, %v1083_v30  ;;  %v7578_v36 = vpack.c.bf16 %v1085_v34, %v1081_v33  ;;  %v1096_v38 = vld [vmem:[#allocation4 + $0xb8] sm:$0xff]  ;;  %v1090_v40 = vld [vmem:[#allocation4 + $0x88] sm:$0xff]  ;;  %v1091_v42 = vld [vmem:[#allocation4 + $0x90] sm:$0xff] }
  0x65   :  { %608 = vmatprep.subr.mxu0 %v98_v4  ;;  %672 = vmatprep.mubr.f32.mxu0 %v8951_v0  ;;  %v7583_v39 = vpack.c.bf16 %v1096_v38, %v1092_v37  ;;  %v1094_v41 = vld [vmem:[#allocation4 + $0xa8] sm:$0xff]  ;;  %v1095_v44 = vld [vmem:[#allocation4 + $0xb0] sm:$0xff]  ;;  %v1089_v45 = vld [vmem:[#allocation4 + $0x80] sm:$0xff] }
  0x66   :  { %5832 = vmatmul.mubr.msk.f32.vlgmr.msra.gmra.mrb[4].mxu1 %vm108_vm0, %v92_v3  ;;  %609 = vmatpush1.msra.mxu0 %v97_v6  ;;  %9019 = vst [vmem:[#allocation16_spill] sm:$0xff] %v7576_v35  ;;  %v7585_v43 = vpack.c.bf16 %v1094_v41, %v1090_v40  ;;  %v1093_v46 = vld [vmem:[#allocation4 + $0xa0] sm:$0xff]  ;;  %v7588_v47 = vpack.c.bf16 %v1095_v44, %v1091_v42  ;;  %v1100_v49 = vld [vmem:[#allocation4 + $0xd8] sm:$0xff]  ;;  %v1098_v52 = vld [vmem:[#allocation4 + $0xc8] sm:$0xff] }
  0x67   :  { %538 = vmatpush1.msra.mxu1 %v95_v2  ;;  %601 = vmatprep.mubr.f32.mxu1 %v8951_v0  ;;  %9020 = vst [vmem:[#allocation17_spill] sm:$0xff] %v7583_v39  ;;  %v7590_v48 = vpack.c.bf16 %v1093_v46, %v1089_v45  ;;  %v1104_v50 = vld [vmem:[#allocation4 + $0xf8] sm:$0xff]  ;;  %v1102_v53 = vld [vmem:[#allocation4 + $0xe8] sm:$0xff]  ;;  %v1099_v54 = vld [vmem:[#allocation4 + $0xd0] sm:$0xff] }
  0x68   :  { %679 = vmatprep.subr.mxu1 %v100_v5  ;;  %5835 = vmatmul.mubr.msk.f32.vlgmr.msra.gmra.mrb[4].mxu0 %vm108_vm0, %v5827_v12  ;;  %9021 = vst [vmem:[#allocation18_spill] sm:$0xff] %v7588_v47  ;;  %v7595_v51 = vpack.c.bf16 %v1104_v50, %v1100_v49  ;;  %v7597_v55 = vpack.c.bf16 %v1102_v53, %v1098_v52  ;;  %v1103_v56 = vld [vmem:[#allocation4 + $0xf0] sm:$0xff]  ;;  %v1097_v57 = vld [vmem:[#allocation4 + $0xc0] sm:$0xff]  ;;  %v1108_v61 = vld [vmem:[#allocation4 + $0x118] sm:$0xff] }
  0x69   :  { %750 = vmatprep.subr.mxu0 %v102_v8  ;;  %814 = vmatprep.mubr.f32.mxu0 %v8951_v0  ;;  %v1101_v58 = vld [vmem:[#allocation4 + $0xe0] sm:$0xff]  ;;  %v7600_v59 = vpack.c.bf16 %v1103_v56, %v1099_v54  ;;  %v1112_v62 = vld [vmem:[#allocation4 + $0x138] sm:$0xff]  ;;  %v1106_v1 = vld [vmem:[#allocation4 + $0x108] sm:$0xff] }
  0x6a   :  { %5834 = vmatmul.mubr.msk.f32.vlgmr.msra.gmra.mrb[6].mxu1 %vm108_vm0, %v5827_v12  ;;  %751 = vmatpush1.msra.mxu0 %v101_v11  ;;  %9022 = vst [vmem:[#allocation19_spill] sm:$0xff] %v7595_v51  ;;  %v7602_v60 = vpack.c.bf16 %v1101_v58, %v1097_v57  ;;  %v7607_v63 = vpack.c.bf16 %v1112_v62, %v1108_v61  ;;  %v1110_v2 = vld [vmem:[#allocation4 + $0x128] sm:$0xff]  ;;  %v1107_v3 = vld [vmem:[#allocation4 + $0x110] sm:$0xff]  ;;  %v1105_v6 = vld [vmem:[#allocation4 + $0x100] sm:$0xff] }
  0x6b   :  { %680 = vmatpush1.msra.mxu1 %v99_v7  ;;  %743 = vmatprep.mubr.f32.mxu1 %v8951_v0  ;;  %9023 = vst [vmem:[#allocation20_spill] sm:$0xff] %v7600_v59  ;;  %v7609_v4 = vpack.c.bf16 %v1110_v2, %v1106_v1  ;;  %v1111_v5 = vld [vmem:[#allocation4 + $0x130] sm:$0xff]  ;;  %v1109_v7 = vld [vmem:[#allocation4 + $0x120] sm:$0xff]  ;;  %v1120_v11 = vld [vmem:[#allocation4 + $0x178] sm:$0xff] }
  0x6c   :  { %821 = vmatprep.subr.mxu1 %v104_v9  ;;  %5837 = vmatmul.mubr.msk.f32.vlgmr.msra.gmra.mrb[6].mxu0 %vm108_vm0, %v5827_v12  ;;  %9024 = vst [vmem:[#allocation21_spill] sm:$0xff] %v7607_v63  ;;  %v7612_v8 = vpack.c.bf16 %v1111_v5, %v1107_v3  ;;  %v7614_v9 = vpack.c.bf16 %v1109_v7, %v1105_v6  ;;  %v1114_v13 = vld [vmem:[#allocation4 + $0x148] sm:$0xff]  ;;  %v1115_v16 = vld [vmem:[#allocation4 + $0x150] sm:$0xff]  ;;  %v1113_v20 = vld [vmem:[#allocation4 + $0x140] sm:$0xff] }
  0x6d   :  { %6404 = vmatprep.subr.bf16.mxu0 %v7561_v19  ;;  %v1118_v14 = vld [vmem:[#allocation4 + $0x168] sm:$0xff]  ;;  %v1119_v18 = vld [vmem:[#allocation4 + $0x170] sm:$0xff]  ;;  %v1117_v21 = vld [vmem:[#allocation4 + $0x160] sm:$0xff] }
  0x6e   :  { %5836 = vmatmul.mubr.msk.f32.vlgmr.msra.gmra.mrb[8].mxu1 %vm108_vm0, %v5827_v12  ;;  %6406 = vmatpush1.bf16.msra.mxu0 %v7566_v24  ;;  %9025 = vst [vmem:[#allocation22_spill] sm:$0xff] %v7612_v8  ;;  %v7621_v17 = vpack.c.bf16 %v1118_v14, %v1114_v13  ;;  %v7624_v22 = vpack.c.bf16 %v1119_v18, %v1115_v16  ;;  %v1124_v26 = vld [vmem:[#allocation4 + $0x198] sm:$0xff]  ;;  %v1122_v30 = vld [vmem:[#allocation4 + $0x188] sm:$0xff]  ;;  %v1123_v33 = vld [vmem:[#allocation4 + $0x190] sm:$0xff] }
  0x6f   :  { %822 = vmatpush1.msra.mxu1 %v103_v10  ;;  %885 = vmatprep.mubr.f32.mxu1 %v8951_v0  ;;  %v1116_v10 = vld [vmem:[#allocation4 + $0x158] sm:$0xff]  ;;  %v7626_v25 = vpack.c.bf16 %v1117_v21, %v1113_v20  ;;  %v1126_v32 = vld [vmem:[#allocation4 + $0x1a8] sm:$0xff]  ;;  %v1127_v37 = vld [vmem:[#allocation4 + $0x1b0] sm:$0xff] }
  0x70   :  { %6468 = vmatprep.subr.bf16.mxu1 %v7559_v15  ;;  %6408 = vmatprep.subr.bf16.mxu0 %v7573_v31  ;;  %9027 = vst [vmem:[#allocation24_spill] sm:$0xff] %v7624_v22  ;;  %v1128_v28 = vld [vmem:[#allocation4 + $0x1b8] sm:$0xff]  ;;  %v7633_v34 = vpack.c.bf16 %v1126_v32, %v1122_v30  ;;  %v1121_v38 = vld [vmem:[#allocation4 + $0x180] sm:$0xff]  ;;  %v7636_v41 = vpack.c.bf16 %v1127_v37, %v1123_v33  ;;  %v1130_v49 = vld [vmem:[#allocation4 + $0x1c8] sm:$0xff] }
  0x71   :  { %v7631_v29 = vpack.c.bf16 %v1128_v28, %v1124_v26  ;;  %v1125_v40 = vld [vmem:[#allocation4 + $0x1a0] sm:$0xff]  ;;  %v1132_v44 = vld [vmem:[#allocation4 + $0x1d8] sm:$0xff]  ;;  %v1134_v50 = vld [vmem:[#allocation4 + $0x1e8] sm:$0xff] }
  0x72   :  { %5838 = vmatmul.mubr.msk.f32.vlgmr.msra.gmra.mrb[10].mxu1 %vm108_vm0, %v5827_v12  ;;  %6410 = vmatpush1.bf16.msra.mxu0 %v7578_v36  ;;  %v7619_v12 = vpack.c.bf16 %v1120_v11, %v1116_v10  ;;  %9029 = vst [vmem:[#allocation26_spill] sm:$0xff] %v7636_v41  ;;  %v7638_v42 = vpack.c.bf16 %v1125_v40, %v1121_v38  ;;  %v1136_v45 = vld [vmem:[#allocation4 + $0x1f8] sm:$0xff]  ;;  %v1131_v52 = vld [vmem:[#allocation4 + $0x1d0] sm:$0xff]  ;;  %v1129_v56 = vld [vmem:[#allocation4 + $0x1c0] sm:$0xff] }
  0x73   :  { %6470 = vmatpush1.bf16.msra.mxu1 %v7564_v23  ;;  %6412 = vmatprep.subr.bf16.mxu0 %v7585_v43  ;;  %9028 = vst [vmem:[#allocation25_spill] sm:$0xff] %v7631_v29  ;;  %v7643_v46 = vpack.c.bf16 %v1136_v45, %v1132_v44  ;;  %v7645_v53 = vpack.c.bf16 %v1134_v50, %v1130_v49  ;;  %v1135_v54 = vld [vmem:[#allocation4 + $0x1f0] sm:$0xff]  ;;  %v1133_v57 = vld [vmem:[#allocation4 + $0x1e0] sm:$0xff]  ;;  %v1140_v62 = vld [vmem:[#allocation4 + $0x218] sm:$0xff] }
  0x74   :  { %6472 = vmatprep.subr.bf16.mxu1 %v7571_v27  ;;  %9026 = vst [vmem:[#allocation23_spill] sm:$0xff] %v7619_v12  ;;  %v7648_v58 = vpack.c.bf16 %v1135_v54, %v1131_v52  ;;  %v7650_v61 = vpack.c.bf16 %v1133_v57, %v1129_v56  ;;  %v1144_v1 = vld [vmem:[#allocation4 + $0x238] sm:$0xff]  ;;  %v1138_v3 = vld [vmem:[#allocation4 + $0x208] sm:$0xff]  ;;  %v1139_v6 = vld [vmem:[#allocation4 + $0x210] sm:$0xff] }
  0x75   :  { %9030 = vst [vmem:[#allocation27_spill] sm:$0xff] %v7643_v46  ;;  %v7655_v2 = vpack.c.bf16 %v1144_v1, %v1140_v62  ;;  %v1142_v5 = vld [vmem:[#allocation4 + $0x228] sm:$0xff]  ;;  %v1143_v10 = vld [vmem:[#allocation4 + $0x230] sm:$0xff]  ;;  %v1137_v11 = vld [vmem:[#allocation4 + $0x200] sm:$0xff] }
  0x76   :  { %6414 = vmatpush1.bf16.msra.mxu0 %v7590_v48  ;;  %9031 = vst [vmem:[#allocation28_spill] sm:$0xff] %v7648_v58  ;;  %v7657_v7 = vpack.c.bf16 %v1142_v5, %v1138_v3  ;;  %v1141_v13 = vld [vmem:[#allocation4 + $0x220] sm:$0xff]  ;;  %v7660_v14 = vpack.c.bf16 %v1143_v10, %v1139_v6  ;;  %v1148_v18 = vld [vmem:[#allocation4 + $0x258] sm:$0xff]  ;;  %v1146_v26 = vld [vmem:[#allocation4 + $0x248] sm:$0xff] }
  0x77   :  { %6474 = vmatpush1.bf16.msra.mxu1 %v7576_v35  ;;  %6416 = vmatprep.subr.bf16.mxu0 %v7597_v55  ;;  %9032 = vst [vmem:[#allocation29_spill] sm:$0xff] %v7655_v2  ;;  %v7662_v16 = vpack.c.bf16 %v1141_v13, %v1137_v11  ;;  %v1152_v20 = vld [vmem:[#allocation4 + $0x278] sm:$0xff]  ;;  %v1150_v28 = vld [vmem:[#allocation4 + $0x268] sm:$0xff]  ;;  %v1147_v30 = vld [vmem:[#allocation4 + $0x250] sm:$0xff] }
  0x78   :  { %6476 = vmatprep.subr.bf16.mxu1 %v7583_v39  ;;  %9033 = vst [vmem:[#allocation30_spill] sm:$0xff] %v7660_v14  ;;  %v7667_v21 = vpack.c.bf16 %v1152_v20, %v1148_v18  ;;  %v7669_v32 = vpack.c.bf16 %v1150_v28, %v1146_v26  ;;  %v1151_v33 = vld [vmem:[#allocation4 + $0x270] sm:$0xff]  ;;  %v1145_v37 = vld [vmem:[#allocation4 + $0x240] sm:$0xff]  ;;  %v1156_v45 = vld [vmem:[#allocation4 + $0x298] sm:$0xff] }
  0x79   :  { %v1149_v38 = vld [vmem:[#allocation4 + $0x260] sm:$0xff]  ;;  %v7672_v40 = vpack.c.bf16 %v1151_v33, %v1147_v30  ;;  %v1160_v49 = vld [vmem:[#allocation4 + $0x2b8] sm:$0xff]  ;;  %v1154_v50 = vld [vmem:[#allocation4 + $0x288] sm:$0xff] }
  0x7a   :  { %6418 = vmatpush1.bf16.msra.mxu0 %v7602_v60  ;;  %9034 = vst [vmem:[#allocation31_spill] sm:$0xff] %v7667_v21  ;;  %v7674_v44 = vpack.c.bf16 %v1149_v38, %v1145_v37  ;;  %v7677_v52 = vpack.c.bf16 %v1160_v49, %v1156_v45  ;;  %v1158_v54 = vld [vmem:[#allocation4 + $0x2a8] sm:$0xff]  ;;  %v1155_v56 = vld [vmem:[#allocation4 + $0x290] sm:$0xff]  ;;  %v1153_v3 = vld [vmem:[#allocation4 + $0x280] sm:$0xff] }
  0x7b   :  { %6478 = vmatpush1.bf16.msra.mxu1 %v7588_v47  ;;  %6420 = vmatprep.subr.bf16.mxu0 %v7609_v4  ;;  %9035 = vst [vmem:[#allocation32_spill] sm:$0xff] %v7672_v40  ;;  %v1159_v57 = vld [vmem:[#allocation4 + $0x2b0] sm:$0xff]  ;;  %v7681_v62 = vpack.c.bf16 %v1158_v54, %v1154_v50  ;;  %v1157_v5 = vld [vmem:[#allocation4 + $0x2a0] sm:$0xff]  ;;  %v1164_v6 = vld [vmem:[#allocation4 + $0x2d8] sm:$0xff] }
  0x7c   :  { %6480 = vmatprep.subr.bf16.mxu1 %v7595_v51  ;;  %9036 = vst [vmem:[#allocation33_spill] sm:$0xff] %v7677_v52  ;;  %v7683_v1 = vpack.c.bf16 %v1159_v57, %v1155_v56  ;;  %v7686_v10 = vpack.c.bf16 %v1157_v5, %v1153_v3  ;;  %v1168_v11 = vld [vmem:[#allocation4 + $0x2f8] sm:$0xff]  ;;  %v1162_v13 = vld [vmem:[#allocation4 + $0x2c8] sm:$0xff]  ;;  %v1163_v28 = vld [vmem:[#allocation4 + $0x2d0] sm:$0xff] }
  0x7d   :  { %v1166_v18 = vld [vmem:[#allocation4 + $0x2e8] sm:$0xff]  ;;  %v7689_v20 = vpack.c.bf16 %v1168_v11, %v1164_v6  ;;  %v1167_v30 = vld [vmem:[#allocation4 + $0x2f0] sm:$0xff]  ;;  %v1161_v33 = vld [vmem:[#allocation4 + $0x2c0] sm:$0xff] }
  0x7e   :  { %6422 = vmatpush1.bf16.msra.mxu0 %v7614_v9  ;;  %9037 = vst [vmem:[#allocation34_spill] sm:$0xff] %v7683_v1  ;;  %v7691_v26 = vpack.c.bf16 %v1166_v18, %v1162_v13  ;;  %v1165_v37 = vld [vmem:[#allocation4 + $0x2e0] sm:$0xff]  ;;  %v1172_v38 = vld [vmem:[#allocation4 + $0x318] sm:$0xff]  ;;  %v7695_v49 = vpack.c.bf16 %v1167_v30, %v1163_v28  ;;  %v1170_v54 = vld [vmem:[#allocation4 + $0x308] sm:$0xff] }
  0x7f   :  { %6482 = vmatpush1.bf16.msra.mxu1 %v7600_v59  ;;  %6424 = vmatprep.subr.bf16.mxu0 %v7621_v17  ;;  %9038 = vst [vmem:[#allocation35_spill] sm:$0xff] %v7689_v20  ;;  %v1176_v45 = vld [vmem:[#allocation4 + $0x338] sm:$0xff]  ;;  %v7697_v50 = vpack.c.bf16 %v1165_v37, %v1161_v33  ;;  %v1174_v56 = vld [vmem:[#allocation4 + $0x328] sm:$0xff]  ;;  %v1171_v57 = vld [vmem:[#allocation4 + $0x310] sm:$0xff] }
  0x80   :  { %6484 = vmatprep.subr.bf16.mxu1 %v7607_v63  ;;  %9039 = vst [vmem:[#allocation36_spill] sm:$0xff] %v7695_v49  ;;  %v7701_v3 = vpack.c.bf16 %v1176_v45, %v1172_v38  ;;  %v7703_v5 = vpack.c.bf16 %v1174_v56, %v1170_v54  ;;  %v1175_v6 = vld [vmem:[#allocation4 + $0x330] sm:$0xff]  ;;  %v1169_v11 = vld [vmem:[#allocation4 + $0x300] sm:$0xff]  ;;  %v1180_v18 = vld [vmem:[#allocation4 + $0x358] sm:$0xff] }
  0x81   :  { %v1173_v13 = vld [vmem:[#allocation4 + $0x320] sm:$0xff]  ;;  %v1184_v0 = vld [vmem:[#allocation4 + $0x378] sm:$0xff]  ;;  %v1178_v28 = vld [vmem:[#allocation4 + $0x348] sm:$0xff]  ;;  %v7707_v33 = vpack.c.bf16 %v1175_v6, %v1171_v57 }
  0x82   :  { %6426 = vmatpush1.bf16.msra.mxu0 %v7626_v25  ;;  %9040 = vst [vmem:[#allocation37_spill] sm:$0xff] %v7701_v3  ;;  %v1182_v30 = vld [vmem:[#allocation4 + $0x368] sm:$0xff]  ;;  %v7709_v37 = vpack.c.bf16 %v1173_v13, %v1169_v11  ;;  %v1183_v38 = vld [vmem:[#allocation4 + $0x370] sm:$0xff]  ;;  %v7713_v45 = vpack.c.bf16 %v1184_v0, %v1180_v18  ;;  %v1177_v56 = vld [vmem:[#allocation4 + $0x340] sm:$0xff] }
  0x83   :  { %6486 = vmatpush1.bf16.msra.mxu1 %v7612_v8  ;;  %6428 = vmatprep.subr.bf16.mxu0 %v7633_v34  ;;  %9041 = vst [vmem:[#allocation38_spill] sm:$0xff] %v7707_v33  ;;  %v7715_v54 = vpack.c.bf16 %v1182_v30, %v1178_v28  ;;  %v1187_v11 = vld [vmem:[#allocation4 + $0x390] sm:$0xff]  ;;  %v1185_v28 = vld [vmem:[#allocation4 + $0x380] sm:$0xff] }
  0x84   :  { %6488 = vmatprep.subr.bf16.mxu1 %v7619_v12  ;;  %9042 = vst [vmem:[#allocation39_spill] sm:$0xff] %v7713_v45  ;;  %v1191_v13 = vld [vmem:[#allocation4 + $0x3b0] sm:$0xff]  ;;  %v1189_v30 = vld [vmem:[#allocation4 + $0x3a0] sm:$0xff] }
  0x86   :  { %6430 = vmatpush1.bf16.msra.mxu0 %v7638_v42 }
  0x87   :  { %6490 = vmatpush1.bf16.msra.mxu1 %v7624_v22  ;;  %6432 = vmatprep.subr.bf16.mxu0 %v7645_v53 }
  0x88   :  { %6492 = vmatprep.subr.bf16.mxu1 %v7631_v29 }
  0x8a   :  { %6434 = vmatpush1.bf16.msra.mxu0 %v7650_v61 }
  0x8b   :  { %6494 = vmatpush1.bf16.msra.mxu1 %v7636_v41  ;;  %6436 = vmatprep.subr.bf16.mxu0 %v7657_v7 }
  0x8c   :  { %6496 = vmatprep.subr.bf16.mxu1 %v7643_v46 }
  0x8e   :  { %6438 = vmatpush1.bf16.msra.mxu0 %v7662_v16 }
  0x8f   :  { %6498 = vmatpush1.bf16.msra.mxu1 %v7648_v58  ;;  %6440 = vmatprep.subr.bf16.mxu0 %v7669_v32 }
  0x90   :  { %6500 = vmatprep.subr.bf16.mxu1 %v7655_v2  ;;  %v1198_v2 = vld [vmem:[#allocation4 + $0x3e8] sm:$0xff] }
  0x92   :  { %6442 = vmatpush1.bf16.msra.mxu0 %v7674_v44 }
  0x93   :  { %6502 = vmatpush1.bf16.msra.mxu1 %v7660_v14  ;;  %6444 = vmatprep.subr.bf16.mxu0 %v7681_v62  ;;  %v1194_v14 = vld [vmem:[#allocation4 + $0x3c8] sm:$0xff] }
  0x94   :  { %6504 = vmatprep.subr.bf16.mxu1 %v7667_v21  ;;  %v1190_v21 = vld [vmem:[#allocation4 + $0x3a8] sm:$0xff] }
  0x96   :  { %6446 = vmatpush1.bf16.msra.mxu0 %v7686_v10 }
  0x97   :  { %6506 = vmatpush1.bf16.msra.mxu1 %v7672_v40  ;;  %6448 = vmatprep.subr.bf16.mxu0 %v7691_v26  ;;  %v1186_v40 = vld [vmem:[#allocation4 + $0x388] sm:$0xff] }
  0x98   :  { %6508 = vmatprep.subr.bf16.mxu1 %v7677_v52  ;;  %v1188_v52 = vld [vmem:[#allocation4 + $0x398] sm:$0xff]  ;;  %v7727_v18 = vpack.c.bf16 %v1190_v21, %v1186_v40  ;;  %v7739_v40 = vpack.c.bf16 %v1198_v2, %v1194_v14  ;;  %v8963_v2 = vlaneseq }
  0x9a   :  { %6450 = vmatpush1.bf16.msra.mxu0 %v7697_v50  ;;  %v7753_v14 = vshrl.u32 %v8963_v2, 7 }
  0x9b   :  { %6510 = vmatpush1.bf16.msra.mxu1 %v7683_v1  ;;  %6452 = vmatprep.subr.bf16.mxu0 %v7703_v5  ;;  %v1181_v1 = vld [vmem:[#allocation4 + $0x360] sm:$0xff] }
  0x9c   :  { %6512 = vmatprep.subr.bf16.mxu1 %v7689_v20  ;;  %v1179_v20 = vld [vmem:[#allocation4 + $0x350] sm:$0xff]  ;;  %v7721_v6 = vpack.c.bf16 %v1181_v1, %v1177_v56  ;;  %v7731_v1 = vpack.c.bf16 %v1191_v13, %v1187_v11  ;;  %v1197_v56 = vld [vmem:[#allocation4 + $0x3e0] sm:$0xff]  ;;  %vm477_vm1 = vcmp.eq.s32.totalorder %v7753_v14, 0  ;;  %vm490_vm2 = vcmp.eq.s32.totalorder %v7753_v14, 1 }
  0x9d   :  { %v7719_v57 = vpack.c.bf16 %v1183_v38, %v1179_v20  ;;  %v7733_v20 = vpack.c.bf16 %v1189_v30, %v1185_v28  ;;  %v1195_v38 = vld [vmem:[#allocation4 + $0x3d0] sm:$0xff]  ;;  %vm503_vm3 = vcmp.eq.s32.totalorder %v7753_v14, 2  ;;  %vm516_vm4 = vcmp.eq.s32.totalorder %v7753_v14, 3 }
  0x9e   :  { %6454 = vmatpush1.bf16.msra.mxu0 %v7709_v37  ;;  %9045 = vst [vmem:[#allocation42_spill] sm:$0xff] %v7731_v1  ;;  %vm529_vm5 = vcmp.eq.s32.totalorder %v7753_v14, 4  ;;  %vm982_vm6 = vcmp.lt.s32.totalorder %v7753_v14, 5 }
  0x9f   :  { %6514 = vmatpush1.bf16.msra.mxu1 %v7695_v49  ;;  %v1192_v49 = vld [vmem:[#allocation4 + $0x3b8] sm:$0xff]  ;;  %9043 = vst [vmem:[#allocation40_spill] sm:$0xff] %v7719_v57  ;;  %6456 = vmatprep.subr.bf16.mxu0 %v7715_v54 }
  0xa0   :  { %6516 = vmatprep.subr.bf16.mxu1 %v7701_v3  ;;  %v7725_v0 = vpack.c.bf16 %v1192_v49, %v1188_v52  ;;  %v1196_v3 = vld [vmem:[#allocation4 + $0x3d8] sm:$0xff]  ;;  %v1199_v52 = vld [vmem:[#allocation4 + $0x3f0] sm:$0xff]  ;;  %v1193_v49 = vld [vmem:[#allocation4 + $0x3c0] sm:$0xff] }
  0xa1   :  { %v7743_v11 = vpack.c.bf16 %v1199_v52, %v1195_v38  ;;  %v7745_v13 = vpack.c.bf16 %v1197_v56, %v1193_v49 }
  0xa2   :  { %9044 = vst [vmem:[#allocation41_spill] sm:$0xff] %v7725_v0  ;;  %6458 = vmatpush1.bf16.msra.mxu0 %v7721_v6 }
  0xa3   :  { %6518 = vmatpush1.bf16.msra.mxu1 %v7707_v33  ;;  %v1200_v33 = vld [vmem:[#allocation4 + $0x3f8] sm:$0xff]  ;;  %6460 = vmatprep.subr.bf16.mxu0 %v7727_v18  ;;  %9047 = vst [vmem:[#allocation44_spill] sm:$0xff] %v7743_v11  ;;  %9048 = vst [vmem:[#allocation45_spill] sm:$0xff] %v7745_v13 }
  0xa4   :  { %6520 = vmatprep.subr.bf16.mxu1 %v7713_v45  ;;  %v7737_v21 = vpack.c.bf16 %v1200_v33, %v1196_v3  ;;  %v7756_v3 = vsub.s32 0, %v7753_v14 }
  0xa6   :  { %9046 = vst [vmem:[#allocation43_spill] sm:$0xff] %v7737_v21  ;;  %6462 = vmatpush1.bf16.msra.mxu0 %v7733_v20 }
  0xa7   :  { %6522 = vmatpush1.bf16.msra.mxu1 %v7719_v57  ;;  %6464 = vmatprep.subr.bf16.mxu0 %v7739_v40 }
  0xa8   :  { %6524 = vmatprep.subr.bf16.mxu1 %v7725_v0 }
  0xaa   :  { %6466 = vmatpush1.bf16.msra.mxu0 %v7745_v13 }
  0xab   :  { %6526 = vmatpush1.bf16.msra.mxu1 %v7731_v1 }
  0xac   :  { %6528 = vmatprep.subr.bf16.mxu1 %v7737_v21 }
  0xaf   :  { %6530 = vmatpush1.bf16.msra.mxu1 %v7743_v11 }
  0xb0   :  { %6532 = vmatprep.subr.bf16.mxu1 %v7561_v19 }
 0x131   :  { %v178_v33 = vpop.f32.mrb[0].mxu1 }
 0x132   :  { %v180_v28 = vpop.f32.mrb[1].mxu1  ;;  %v472_v30 = vrot.slane %v178_v33, %v7756_v3 }
 0x133   :  { %v476_v38 = vrot.slane %v180_v28, %v7756_v3  ;;  %v320_v52 = vpop.f32.mrb[0].mxu0 }
 0x134   :  { %v498_v19 = vrot.slane %v320_v52, %v7756_v3  ;;  %v322_v56 = vpop.f32.mrb[1].mxu0  ;;  %v478_v28 = vsel %vm477_vm1, %v472_v30, 0.0 }
 0x135   :  { %v249_v49 = vpop.f32.mrb[2].mxu1  ;;  %v502_v21 = vrot.slane %v322_v56, %v7756_v3  ;;  %v479_v52 = vsel %vm477_vm1, %v476_v38, 0.0 }
 0x136   :  { %v485_v2 = vrot.slane %v249_v49, %v7756_v3  ;;  %v251_v11 = vpop.f32.mrb[3].mxu1  ;;  %v504_v49 = vsel %vm503_vm3, %v498_v19, 0.0 }
 0x137   :  { %v489_v33 = vrot.slane %v251_v11, %v7756_v3  ;;  %v462_v0 = vpop.f32.mrb[2].mxu0  ;;  %v505_v57 = vsel %vm503_vm3, %v502_v21, 0.0 }
 0x138   :  { %v491_v1 = vsel %vm490_vm2, %v485_v2, 0.0  ;;  %v524_v30 = vrot.slane %v462_v0, %v7756_v3  ;;  %v464_v58 = vpop.f32.mrb[3].mxu0 }
 0x139   :  { %v493_v56 = vadd.f32 %v491_v1, %v478_v28  ;;  %v492_v11 = vsel %vm490_vm2, %v489_v33, 0.0  ;;  %v391_v45 = vpop.f32.mrb[4].mxu1  ;;  %v528_v2 = vrot.slane %v464_v58, %v7756_v3 }
 0x13a   :  { %v494_v46 = vadd.f32 %v492_v11, %v479_v52  ;;  %v511_v38 = vrot.slane %v391_v45, %v7756_v3  ;;  %v393_v41 = vpop.f32.mrb[5].mxu1  ;;  %v530_v21 = vsel %vm529_vm5, %v524_v30, 0.0 }
 0x13b   :  { %v506_v29 = vadd.f32 %v504_v49, %v493_v56  ;;  %v515_v19 = vrot.slane %v393_v41, %v7756_v3  ;;  %v674_v28 = vpop.f32.mrb[4].mxu0  ;;  %v531_v45 = vsel %vm529_vm5, %v528_v2, 0.0 }
 0x13c   :  { %v507_v1 = vadd.f32 %v505_v57, %v494_v46  ;;  %v517_v33 = vsel %vm516_vm4, %v511_v38, 0.0  ;;  %v907_v58 = vrot.slane %v674_v28, %v7756_v3  ;;  %v676_v49 = vpop.f32.mrb[5].mxu0 }
 0x13d   :  { %v519_v22 = vadd.f32 %v517_v33, %v506_v29  ;;  %v518_v0 = vsel %vm516_vm4, %v515_v19, 0.0  ;;  %v603_v52 = vpop.f32.mrb[6].mxu1  ;;  %v911_v56 = vrot.slane %v676_v49, %v7756_v3 }
 0x13e   :  { %v520_v41 = vadd.f32 %v518_v0, %v507_v1  ;;  %v895_v46 = vrot.slane %v603_v52, %v7756_v3  ;;  %v605_v57 = vpop.f32.mrb[7].mxu1  ;;  %v912_v29 = vsel %vm490_vm2, %v907_v58, 0.0 }
 0x13f   :  { %v7796_v11 = vadd.f32 %v530_v21, %v519_v22  ;;  %v899_v30 = vrot.slane %v605_v57, %v7756_v3  ;;  %v913_v19 = vsel %vm490_vm2, %v911_v56, 0.0  ;;  %v816_v1 = vpop.f32.mrb[6].mxu0 }
 0x140   :  { %v7801_v38 = vadd.f32 %v531_v45, %v520_v41  ;;  %v900_v2 = vsel %vm477_vm1, %v895_v46, 0.0  ;;  %v931_v0 = vrot.slane %v816_v1, %v7756_v3  ;;  %v818_v52 = vpop.f32.mrb[7].mxu0 }
 0x141   :  { %v952_v33 = vrot.slane %v7796_v11, 4  ;;  %v914_v28 = vadd.f32 %v912_v29, %v900_v2  ;;  %v901_v22 = vsel %vm477_vm1, %v899_v30, 0.0  ;;  %v745_v21 = vpop.f32.mrb[8].mxu1  ;;  %v935_v46 = vrot.slane %v818_v52, %v7756_v3 }
 0x142   :  { %v958_v45 = vrot.slane %v7801_v38, 4  ;;  %v915_v58 = vadd.f32 %v913_v19, %v901_v22  ;;  %v919_v49 = vrot.slane %v745_v21, %v7756_v3  ;;  %v747_v41 = vpop.f32.mrb[9].mxu1  ;;  %v936_v29 = vsel %vm516_vm4, %v931_v0, 0.0 }
 0x143   :  { %v923_v57 = vrot.slane %v747_v41, %v7756_v3  ;;  %v953_v30 = vadd.f32 %v952_v33, %v7796_v11  ;;  %v937_v19 = vsel %vm516_vm4, %v935_v46, 0.0 }
 0x144   :  { %v924_v56 = vsel %vm503_vm3, %v919_v49, 0.0  ;;  %v959_v21 = vadd.f32 %v958_v45, %v7801_v38 }
 0x145   :  { %v926_v2 = vadd.f32 %v924_v56, %v914_v28  ;;  %v925_v1 = vsel %vm503_vm3, %v923_v57, 0.0  ;;  %v887_v22 = vpop.f32.mrb[10].mxu1  ;;  %v954_v28 = vrot.slane %v953_v30, 2 }
 0x146   :  { %v927_v52 = vadd.f32 %v925_v1, %v915_v58  ;;  %v943_v41 = vrot.slane %v887_v22, %v7756_v3  ;;  %v889_v12 = vpop.f32.mrb[11].mxu1  ;;  %v960_v46 = vrot.slane %v959_v21, 2 }
 0x147   :  { %v938_v49 = vadd.f32 %v936_v29, %v926_v2  ;;  %v947_v8 = vrot.slane %v889_v12, %v7756_v3  ;;  %v955_v58 = vadd.f32 %v954_v28, %v953_v30 }
 0x148   :  { %v939_v0 = vadd.f32 %v937_v19, %v927_v52  ;;  %v948_v33 = vsel %vm529_vm5, %v943_v41, 0.0  ;;  %v961_v22 = vadd.f32 %v960_v46, %v959_v21 }
 0x149   :  { %v950_v56 = vadd.f32 %v948_v33, %v938_v49  ;;  %v949_v57 = vsel %vm529_vm5, %v947_v8, 0.0  ;;  %v956_v12 = vrot.slane %v955_v58, 1 }
 0x14a   :  { %v951_v63 = vadd.f32 %v949_v57, %v939_v0  ;;  %v962_v52 = vrot.slane %v961_v22, 1 }
 0x14b   :  { %v966_v59 = vrot.slane %v950_v56, 4  ;;  %v957_v49 = vadd.f32 %v956_v12, %v955_v58 }
 0x14c   :  { %v972_v45 = vrot.slane %v951_v63, 4  ;;  %v963_v35 = vadd.f32 %v962_v52, %v961_v22 }
 0x14d   :  { %v967_v1 = vadd.f32 %v966_v59, %v950_v56 }
 0x14e   :  { %v973_v51 = vadd.f32 %v972_v45, %v951_v63 }
 0x14f   :  { %v968_v29 = vrot.slane %v967_v1, 2 }
 0x150   :  { %v974_v2 = vrot.slane %v973_v51, 2 }
 0x151   :  { %v969_v19 = vadd.f32 %v968_v29, %v967_v1 }
 0x152   :  { %v975_v47 = vadd.f32 %v974_v2, %v973_v51 }
 0x153   :  { %v970_v41 = vrot.slane %v969_v19, 1 }
 0x154   :  { %v976_v39 = vrot.slane %v975_v47, 1 }
 0x155   :  { %v971_v33 = vadd.f32 %v970_v41, %v969_v19 }
 0x156   :  { %v977_v8 = vadd.f32 %v976_v39, %v975_v47 }
 0x157   :  { %v978_v27 = vadd.f32 %v971_v33, %v957_v49 }
 0x158   :  { %v979_v0 = vadd.f32 %v977_v8, %v963_v35 }
 0x159   :  { %v980_v57 = vmul.f32 0.1, %v978_v27 }
 0x15a   :  { %v981_v59 = vmul.f32 0.1, %v979_v0 }
 0x15b   :  { %v983_v30 = vsub.f32 %v7796_v11, %v980_v57  ;;  %v987_v21 = vsub.f32 %v950_v56, %v980_v57 }
 0x15c   :  { %v988_v28 = vsub.f32 %v951_v63, %v981_v59  ;;  %v984_v46 = vsub.f32 %v7801_v38, %v981_v59 }
 0x15d   :  { %v989_v45 = vsel %vm982_vm6, %v987_v21, 0.0  ;;  %v985_v51 = vsel %vm982_vm6, %v983_v30, 0.0 }
 0x15e   :  { %v1007_v1 = vmul.f32 %v989_v45, %v989_v45  ;;  %v990_v29 = vsel %vm982_vm6, %v988_v28, 0.0  ;;  %v986_v58 = vsel %vm982_vm6, %v984_v46, 0.0  ;;  %v991_v2 = vmul.f32 %v985_v51, %v985_v51 }
 0x15f   :  { %v1008_v22 = vmul.f32 %v990_v29, %v990_v29  ;;  %v992_v39 = vmul.f32 %v986_v58, %v986_v58 }
 0x160   :  { %v1009_v47 = vrot.slane %v1007_v1, 4  ;;  %v993_v35 = vrot.slane %v991_v2, 4 }
 0x161   :  { %v1015_v27 = vrot.slane %v1008_v22, 4  ;;  %v999_v12 = vrot.slane %v992_v39, 4 }
 0x162   :  { %v1010_v19 = vadd.f32 %v1009_v47, %v1007_v1  ;;  %v994_v52 = vadd.f32 %v993_v35, %v991_v2 }
 0x163   :  { %v1016_v41 = vadd.f32 %v1015_v27, %v1008_v22  ;;  %v1000_v11 = vadd.f32 %v999_v12, %v992_v39  ;;  %v105_v27 = vld [vmem:[%s8948_s5] ss:$8 sm:$0x3]  ;;  %v1036_v12 = vsub.s32 1, %v7753_v14 }
 0x164   :  { %v1011_v56 = vrot.slane %v1010_v19, 2  ;;  %v995_v63 = vrot.slane %v994_v52, 2 }
 0x165   :  { %v1017_v49 = vrot.slane %v1016_v41, 2  ;;  %v1001_v38 = vrot.slane %v1000_v11, 2 }
 0x166   :  { %v1012_v33 = vadd.f32 %v1011_v56, %v1010_v19  ;;  %v996_v8 = vadd.f32 %v995_v63, %v994_v52  ;;  %v1033_v19 = vrot.slane %v105_v27, %v7756_v3  ;;  %v1037_v52 = vrot.slane %v105_v27, %v1036_v12  ;;  %v9075_v27 = vld [vmem:[#allocation29_spill] sm:$0xff] }
 0x167   :  { %v1018_v0 = vadd.f32 %v1017_v49, %v1016_v41  ;;  %v1002_v57 = vadd.f32 %v1001_v38, %v1000_v11 }
 0x168   :  { %v1013_v59 = vrot.slane %v1012_v33, 1  ;;  %v997_v30 = vrot.slane %v996_v8, 1 }
 0x169   :  { %v1019_v21 = vrot.slane %v1018_v0, 1  ;;  %v1003_v28 = vrot.slane %v1002_v57, 1 }
 0x16a   :  { %v1014_v46 = vadd.f32 %v1013_v59, %v1012_v33  ;;  %v998_v23 = vadd.f32 %v997_v30, %v996_v8 }
 0x16b   :  { %v1020_v15 = vadd.f32 %v1019_v21, %v1018_v0  ;;  %v1004_v13 = vadd.f32 %v1003_v28, %v1002_v57 }
 0x16c   :  { %v1021_v1 = vadd.f32 %v1014_v46, %v998_v23 }
 0x16d   :  { %v1022_v2 = vadd.f32 %v1020_v15, %v1004_v13  ;;  %v5828_v15 = vld [vmem:[%s8948_s5 + $0x1] ss:$8 sm:$0x3] }
 0x16e   :  { %v1023_v22 = vmul.f32 0.1, %v1021_v1  ;;  %v1056_v56 = vrot.slane %v5828_v15, %v7756_v3  ;;  %v1060_v38 = vrot.slane %v5828_v15, %v1036_v12  ;;  %v9076_v12 = vld [vmem:[#allocation30_spill] sm:$0xff]  ;;  %v9078_v15 = vld [vmem:[#allocation32_spill] sm:$0xff] }
 0x16f   :  { %v1024_v39 = vmul.f32 0.1, %v1022_v2 }
 0x170   :  { %v1025_v47 = vadd.f32 1e-05, %v1023_v22  ;;  %v9071_v22 = vld [vmem:[#allocation25_spill] sm:$0xff] }
 0x171   :  { %v1026_v35 = vadd.f32 1e-05, %v1024_v39  ;;  %v9072_v39 = vld [vmem:[#allocation26_spill] sm:$0xff] }
 0x172   :  { %7279 = vrsqrt.f32 %v1025_v47  ;;  %v9073_v47 = vld [vmem:[#allocation27_spill] sm:$0xff] }
 0x173   :  { %7281 = vrsqrt.f32 %v1026_v35  ;;  %v9074_v35 = vld [vmem:[#allocation28_spill] sm:$0xff] }
 0x17c   :  { %v7280_v41 = vpop.eup %7279 }
 0x17d   :  { %v7282_v23 = vpop.eup %7281  ;;  %v1040_v13 = vmul.f32 %v7280_v41, %v1033_v19  ;;  %v9077_v19 = vld [vmem:[#allocation31_spill] sm:$0xff] }
 0x17e   :  { %v1041_v11 = vmul.f32 %v7282_v23, %v1037_v52  ;;  %v9079_v23 = vld [vmem:[#allocation33_spill] sm:$0xff] }
 0x17f   :  { %v1045_v63 = vrot.slane %v1040_v13, %v7756_v3  ;;  %v9080_v13 = vld [vmem:[#allocation34_spill] sm:$0xff] }
 0x180   :  { %v1049_v49 = vrot.slane %v1041_v11, %v7756_v3  ;;  %v9066_v3 = vld [vmem:[#allocation20_spill] sm:$0xff]  ;;  %v9081_v11 = vld [vmem:[#allocation35_spill] sm:$0xff] }
 0x181   :  { %v1050_v33 = vmul.f32 %v1045_v63, %v985_v51  ;;  %v1067_v8 = vmul.f32 %v1045_v63, %v989_v45  ;;  %v9067_v45 = vld [vmem:[#allocation21_spill] sm:$0xff]  ;;  %v9068_v51 = vld [vmem:[#allocation22_spill] sm:$0xff] }
 0x182   :  { %v1051_v0 = vmul.f32 %v1049_v49, %v986_v58  ;;  %v1068_v57 = vmul.f32 %v1049_v49, %v990_v29  ;;  %v9069_v29 = vld [vmem:[#allocation23_spill] sm:$0xff]  ;;  %v9070_v58 = vld [vmem:[#allocation24_spill] sm:$0xff]  ;;  %v9083_v63 = vld [vmem:[#allocation37_spill] sm:$0xff] }
 0x183   :  { %v1063_v59 = vadd.f32 %v1056_v56, %v1050_v33  ;;  %v7845_v30 = vadd.f32 %v1067_v8, %v1056_v56  ;;  %v9082_v56 = vld [vmem:[#allocation36_spill] sm:$0xff]  ;;  %v9084_v49 = vld [vmem:[#allocation38_spill] sm:$0xff]  ;;  %v9087_v8 = vld [vmem:[#allocation41_spill] sm:$0xff] }
 0x184   :  { %v1064_v21 = vadd.f32 %v1060_v38, %v1051_v0  ;;  %v7847_v28 = vadd.f32 %v1068_v57, %v1060_v38  ;;  %v9085_v38 = vld [vmem:[#allocation39_spill] sm:$0xff]  ;;  %v9086_v33 = vld [vmem:[#allocation40_spill] sm:$0xff]  ;;  %v9088_v0 = vld [vmem:[#allocation42_spill] sm:$0xff] }
 0x185   :  { %v1065_v1 = vmax.f32 %v1063_v59, 0.0  ;;  %v9089_v57 = vld [vmem:[#allocation43_spill] sm:$0xff]  ;;  %v9090_v59 = vld [vmem:[#allocation44_spill] sm:$0xff] }
 0x186   :  { %v1066_v46 = vmax.f32 %v1064_v21, 0.0  ;;  %v1072_v2 = vmax.f32 %v7847_v28, 0.0 }
 0x188   :  { %1267 = vmatprep.mubr.f32.mxu0 %v1066_v46  ;;  %1338 = vmatprep.mubr.f32.mxu1 %v1066_v46 }
 0x189   :  { %1268 = vmatmul.mubr.f32.vlgmr.msra.gmra.mrb[8].mxu0 %v1065_v1  ;;  %1339 = vmatmul.mubr.f32.vlgmr.msra.gmra.mrb[12].mxu1 %v1065_v1 }
 0x18a   :  { %6534 = vmatpush1.bf16.msra.mxu1 %v7566_v24  ;;  %1773 = vmatprep.mubr.f32.mxu1 %v1072_v2  ;;  %v9049_v24 = vld [vmem:[#allocation45_spill] sm:$0xff] }
 0x18b   :  { %6536 = vmatprep.subr.bf16.mxu1 %v7573_v31  ;;  %v1071_v31 = vmax.f32 %v7845_v30, 0.0  ;;  %v2217_v30 = vld [vmem:[#allocation6 + $0x8] sm:$0xff] }
 0x18e   :  { %6538 = vmatpush1.bf16.msra.mxu1 %v7578_v36  ;;  %v9050_v36 = vlaneseq }
 0x18f   :  { %6540 = vmatprep.subr.bf16.mxu1 %v7585_v43 }
 0x190   :  { %v7887_v43 = vand.u32 127, %v9050_v36 }
 0x192   :  { %6542 = vmatpush1.bf16.msra.mxu1 %v7590_v48  ;;  %v7890_v48 = vmul.u32 2, %v7887_v43  ;;  %vm1348_vm7 = vcmp.lt.s32.totalorder %v7887_v43, 5 }
 0x193   :  { %6544 = vmatprep.subr.bf16.mxu1 %v7597_v55  ;;  %v9052_v55 = vmov 0.0  }
 0x194   :  { %9051 = vst [vmem:[#allocation45_spill] sm:$0xff] %v7890_v48  ;;  %vm1361_vm8 = vcmp.eq.s32.totalorder %v7753_v14, %v7890_v48 }
 0x195   :  { %vm1363_vm9 = vmand %vm1348_vm7, %vm1361_vm8 }
 0x196   :  { %6546 = vmatpush1.bf16.msra.mxu1 %v7602_v60  ;;  %v1365_v60 = vsel %vm1363_vm9, 1.0, %v9052_v55 }
 0x197   :  { %6548 = vmatprep.subr.bf16.mxu1 %v7609_v4  ;;  %6097 = vmatprep.mubr.msk.f32.mxu0 %vm108_vm0, %v1365_v60  ;;  %v7904_v4 = vadd.s32 8, %v7753_v14 }
 0x199   :  { %9053 = vst [vmem:[#allocation46_spill] sm:$0xff] %v7904_v4  ;;  %vm1350_vm10 = vcmp.lt.s32.totalorder %v7904_v4, 10  ;;  %vm1362_vm12 = vcmp.eq.s32.totalorder %v7904_v4, %v7890_v48 }
 0x19a   :  { %6550 = vmatpush1.bf16.msra.mxu1 %v7614_v9  ;;  %v7908_v9 = vadd.s32 4294967295, %v7890_v48  ;;  %vm7914_vm11 = vmand %vm1348_vm7, %vm1350_vm10 }
 0x19b   :  { %6552 = vmatprep.subr.bf16.mxu1 %v7621_v17  ;;  %vm1364_vm14 = vmand %vm7914_vm11, %vm1362_vm12  ;;  %v2216_v17 = vld [vmem:[#allocation6] sm:$0xff] }
 0x19c   :  { %9054 = vst [vmem:[#allocation47_spill] sm:$0xff] %v7908_v9  ;;  %vm1355_vm13 = vcmp.eq.s32.totalorder %v7753_v14, %v7908_v9  ;;  %vm1356_vm1 = vcmp.eq.s32.totalorder %v7904_v4, %v7908_v9 }
 0x19d   :  { %vm1357_vm15 = vmand %vm1348_vm7, %vm1355_vm13 }
 0x19e   :  { %6554 = vmatpush1.bf16.msra.mxu1 %v7626_v25  ;;  %vm1358_vm3 = vmand %vm7914_vm11, %vm1356_vm1 }
 0x19f   :  { %6556 = vmatprep.subr.bf16.mxu1 %v7633_v34 }
 0x1a2   :  { %6558 = vmatpush1.bf16.msra.mxu1 %v7638_v42  ;;  %v7933_v42 = vadd.s32 1, %v7890_v48 }
 0x1a3   :  { %6560 = vmatprep.subr.bf16.mxu1 %v7645_v53 }
 0x1a4   :  { %9057 = vst [vmem:[#allocation48_spill] sm:$0xff] %v7933_v42  ;;  %vm1530_vm2 = vcmp.eq.s32.totalorder %v7753_v14, %v7933_v42  ;;  %vm1531_vm5 = vcmp.eq.s32.totalorder %v7904_v4, %v7933_v42 }
 0x1a5   :  { %vm1532_vm4 = vmand %vm1348_vm7, %vm1530_vm2 }
 0x1a6   :  { %6562 = vmatpush1.bf16.msra.mxu1 %v7650_v61  ;;  %vm1533_vm9 = vmand %vm7914_vm11, %vm1531_vm5 }
 0x1a7   :  { %6564 = vmatprep.subr.bf16.mxu1 %v7657_v7  ;;  %v1366_v7 = vsel %vm1364_vm14, 1.0, %v9052_v55 }
 0x1aa   :  { %6566 = vmatpush1.bf16.msra.mxu1 %v7662_v16  ;;  %v1359_v16 = vsel %vm1357_vm15, 1.0, %v9052_v55 }
 0x1ab   :  { %6568 = vmatprep.subr.bf16.mxu1 %v7669_v32  ;;  %v7954_v32 = vadd.s32 2, %v7890_v48  ;;  %v2261_v48 = vld [vmem:[#allocation6 + $0x168] sm:$0xff] }
 0x1ad   :  { %9058 = vst [vmem:[#allocation49_spill] sm:$0xff] %v7954_v32  ;;  %vm9015_vm6 = vcmp.eq.s32.totalorder %v7753_v14, %v7954_v32  ;;  %vm9014_vm15 = vcmp.eq.s32.totalorder %v7904_v4, %v7954_v32  ;;  %v2287_v4 = vld [vmem:[#allocation6 + $0x238] sm:$0xff] }
 0x1ae   :  { %6570 = vmatpush1.bf16.msra.mxu1 %v7674_v44  ;;  %v1360_v44 = vsel %vm1358_vm3, 1.0, %v9052_v55  ;;  %vm1622_vm14 = vmand %vm1348_vm7, %vm9015_vm6  ;;  %vm2672_vm3 = vcmask 130048  }
 0x1af   :  { %6572 = vmatprep.subr.bf16.mxu1 %v7681_v62  ;;  %v1534_v62 = vsel %vm1532_vm4, 1.0, %v9052_v55  ;;  %vm1623_vm7 = vmand %vm7914_vm11, %vm9014_vm15 }
 0x1b2   :  { %6574 = vmatpush1.bf16.msra.mxu1 %v7686_v10  ;;  %v1535_v10 = vsel %vm1533_vm9, 1.0, %v9052_v55 }
 0x1b3   :  { %6576 = vmatprep.subr.bf16.mxu1 %v7691_v26  ;;  %v7976_v26 = vsel %vm1622_vm14, 1.0, %v9052_v55 }
 0x1b6   :  { %6578 = vmatpush1.bf16.msra.mxu1 %v7697_v50  ;;  %v9059_v50 = vld [vmem:[#allocation13_spill] sm:$0xff] }
 0x1b7   :  { %6580 = vmatprep.subr.bf16.mxu1 %v7703_v5  ;;  %v1625_v5 = vsel %vm1623_vm7, 1.0, %v9052_v55 }
 0x1ba   :  { %6582 = vmatpush1.bf16.msra.mxu1 %v7709_v37  ;;  %v9060_v37 = vld [vmem:[#allocation14_spill] sm:$0xff] }
 0x1bb   :  { %6584 = vmatprep.subr.bf16.mxu1 %v7715_v54  ;;  %v9061_v54 = vld [vmem:[#allocation15_spill] sm:$0xff] }
 0x1be   :  { %6586 = vmatpush1.bf16.msra.mxu1 %v7721_v6  ;;  %v9062_v6 = vld [vmem:[#allocation16_spill] sm:$0xff] }
 0x1bf   :  { %6588 = vmatprep.subr.bf16.mxu1 %v7727_v18  ;;  %v9063_v18 = vld [vmem:[#allocation17_spill] sm:$0xff] }
 0x1c2   :  { %6590 = vmatpush1.bf16.msra.mxu1 %v7733_v20  ;;  %v9064_v20 = vld [vmem:[#allocation18_spill] sm:$0xff] }
 0x1c3   :  { %6592 = vmatprep.subr.bf16.mxu1 %v7739_v40  ;;  %v9065_v40 = vld [vmem:[#allocation19_spill] sm:$0xff] }
 0x1c6   :  { %6594 = vmatpush1.bf16.msra.mxu1 %v9049_v24  ;;  %v2225_v24 = vld [vmem:[#allocation6 + $0x48] sm:$0xff] }
 0x1c7   :  { %v8044_v36 = vpack.c.bf16 %v2225_v24, %v2217_v30  ;;  %v2280_v30 = vld [vmem:[#allocation6 + $0x200] sm:$0xff] }
 0x1c8   :  { %v2288_v24 = vld [vmem:[#allocation6 + $0x240] sm:$0xff] }
 0x1c9   :  { %1774 = vmatmul.mubr.f32.vlgmr.msra.gmra.mrb[14].mxu1 %v1071_v31 }
 0x1ca   :  { %6117 = vmatprep.mubr.msk.f32.mxu1 %vm108_vm0, %v1365_v60  ;;  %v2227_v60 = vld [vmem:[#allocation6 + $0x58] sm:$0xff] }
 0x25c   :  { %v1269_v25 = vpop.f32.mrb[8].mxu0  ;;  %v1340_v34 = vpop.f32.mrb[12].mxu1 }
 0x25d   :  { %v1271_v53 = vpop.f32.mrb[9].mxu0  ;;  %v1342_v61 = vpop.f32.mrb[13].mxu1 }
 0x25e   :  { %6095 = vmatprep.subr.mxu0 %v1271_v53 }
 0x25f   :  { %6096 = vmatpush3.msra.mxu0 %v1271_v53 }
 0x260   :  { %6098 = vmatmul.mubr.msk.f32.vlgmr.msra.gmra.mrb[10].mxu0 %vm108_vm0, %v1366_v7  ;;  %6100 = vmatprep.subr.mxu0 %v1269_v25 }
 0x261   :  { %6101 = vmatpush3.msra.mxu0 %v1269_v25  ;;  %6102 = vmatprep.mubr.msk.f32.mxu0 %vm108_vm0, %v1359_v16  ;;  %v2224_v25 = vld [vmem:[#allocation6 + $0x40] sm:$0xff] }
 0x262   :  { %6105 = vmatprep.subr.mxu0 %v1340_v34  ;;  %v8048_v53 = vpack.c.bf16 %v2224_v25, %v2216_v17  ;;  %v2282_v17 = vld [vmem:[#allocation6 + $0x210] sm:$0xff] }
 0x263   :  { %v2290_v25 = vld [vmem:[#allocation6 + $0x250] sm:$0xff] }
 0x268   :  { %6103 = vmatmul.mubr.msk.f32.vlgmr.msra.gmra.mrb[10].mxu0 %vm108_vm0, %v1360_v44 }
 0x269   :  { %6106 = vmatpush3.msra.mxu0 %v1340_v34  ;;  %6107 = vmatprep.mubr.msk.f32.mxu0 %vm108_vm0, %v1534_v62 }
 0x26a   :  { %6110 = vmatprep.subr.mxu0 %v1342_v61 }
 0x270   :  { %6108 = vmatmul.mubr.msk.f32.vlgmr.msra.gmra.mrb[10].mxu0 %vm108_vm0, %v1535_v10 }
 0x271   :  { %6111 = vmatpush3.msra.mxu0 %v1342_v61  ;;  %6112 = vmatprep.mubr.msk.f32.mxu0 %vm108_vm0, %v7976_v26  ;;  %v2218_v61 = vld [vmem:[#allocation6 + $0x10] sm:$0xff] }
 0x272   :  { %6596 = vmatprep.subr.bf16.mxu0 %v9059_v50  ;;  %v2243_v50 = vld [vmem:[#allocation6 + $0xd8] sm:$0xff] }
 0x278   :  { %6113 = vmatmul.mubr.msk.f32.vlgmr.msra.gmra.mrb[10].mxu0 %vm108_vm0, %v1625_v5 }
 0x279   :  { %6598 = vmatpush1.bf16.msra.mxu0 %v9060_v37  ;;  %1844 = vmatprep.mubr.f32.mxu0 %v1072_v2  ;;  %v2240_v37 = vld [vmem:[#allocation6 + $0xc0] sm:$0xff] }
 0x27a   :  { %6600 = vmatprep.subr.bf16.mxu0 %v9061_v54 }
 0x27d   :  { %6602 = vmatpush1.bf16.msra.mxu0 %v9062_v6 }
 0x27e   :  { %6604 = vmatprep.subr.bf16.mxu0 %v9063_v18  ;;  %v2234_v18 = vld [vmem:[#allocation6 + $0x90] sm:$0xff] }
 0x281   :  { %6606 = vmatpush1.bf16.msra.mxu0 %v9064_v20  ;;  %v2242_v20 = vld [vmem:[#allocation6 + $0xd0] sm:$0xff] }
 0x282   :  { %6608 = vmatprep.subr.bf16.mxu0 %v9065_v40  ;;  %v8063_v40 = vpack.c.bf16 %v2242_v20, %v2234_v18 }
 0x285   :  { %6610 = vmatpush1.bf16.msra.mxu0 %v9066_v3  ;;  %v2249_v3 = vld [vmem:[#allocation6 + $0x108] sm:$0xff] }
 0x286   :  { %6612 = vmatprep.subr.bf16.mxu0 %v9067_v45  ;;  %v2257_v45 = vld [vmem:[#allocation6 + $0x148] sm:$0xff] }
 0x289   :  { %6614 = vmatpush1.bf16.msra.mxu0 %v9068_v51  ;;  %v2251_v51 = vld [vmem:[#allocation6 + $0x118] sm:$0xff] }
 0x28a   :  { %6616 = vmatprep.subr.bf16.mxu0 %v9069_v29  ;;  %v8068_v29 = vpack.c.bf16 %v2257_v45, %v2249_v3  ;;  %v2298_v3 = vld [vmem:[#allocation6 + $0x290] sm:$0xff] }
 0x28b   :  { %v2306_v45 = vld [vmem:[#allocation6 + $0x2d0] sm:$0xff] }
 0x28d   :  { %6618 = vmatpush1.bf16.msra.mxu0 %v9070_v58  ;;  %v2259_v58 = vld [vmem:[#allocation6 + $0x158] sm:$0xff] }
 0x28e   :  { %6620 = vmatprep.subr.bf16.mxu0 %v9071_v22  ;;  %v2248_v22 = vld [vmem:[#allocation6 + $0x100] sm:$0xff] }
 0x291   :  { %6622 = vmatpush1.bf16.msra.mxu0 %v9072_v39  ;;  %v2256_v39 = vld [vmem:[#allocation6 + $0x140] sm:$0xff] }
 0x292   :  { %6624 = vmatprep.subr.bf16.mxu0 %v9073_v47  ;;  %v8070_v47 = vpack.c.bf16 %v2259_v58, %v2251_v51  ;;  %v8111_v51 = vpack.c.bf16 %v2306_v45, %v2298_v3  ;;  %v2313_v58 = vld [vmem:[#allocation6 + $0x308] sm:$0xff]  ;;  %v2231_v45 = vld [vmem:[#allocation6 + $0x78] sm:$0xff] }
 0x295   :  { %6626 = vmatpush1.bf16.msra.mxu0 %v9074_v35  ;;  %v8072_v35 = vpack.c.bf16 %v2256_v39, %v2248_v22  ;;  %v2321_v22 = vld [vmem:[#allocation6 + $0x348] sm:$0xff]  ;;  %v2315_v39 = vld [vmem:[#allocation6 + $0x318] sm:$0xff] }
 0x296   :  { %6628 = vmatprep.subr.bf16.mxu0 %v9075_v27  ;;  %v2250_v27 = vld [vmem:[#allocation6 + $0x110] sm:$0xff] }
 0x299   :  { %6630 = vmatpush1.bf16.msra.mxu0 %v9076_v12  ;;  %v2258_v12 = vld [vmem:[#allocation6 + $0x150] sm:$0xff] }
 0x29a   :  { %6632 = vmatprep.subr.bf16.mxu0 %v9077_v19  ;;  %v8075_v19 = vpack.c.bf16 %v2258_v12, %v2250_v27  ;;  %v8116_v27 = vpack.c.bf16 %v2321_v22, %v2313_v58  ;;  %v2323_v12 = vld [vmem:[#allocation6 + $0x358] sm:$0xff] }
 0x29c   :  { %v1775_v52 = vpop.f32.mrb[14].mxu1 }
 0x29d   :  { %v1777_v41 = vpop.f32.mrb[15].mxu1  ;;  %6634 = vmatpush1.bf16.msra.mxu0 %v9078_v15  ;;  %v2267_v15 = vld [vmem:[#allocation6 + $0x198] sm:$0xff] }
 0x29e   :  { %6115 = vmatprep.subr.mxu1 %v1777_v41  ;;  %6636 = vmatprep.subr.bf16.mxu0 %v9079_v23 }
 0x29f   :  { %6116 = vmatpush3.msra.mxu1 %v1777_v41  ;;  %v2273_v41 = vld [vmem:[#allocation6 + $0x1c8] sm:$0xff] }
 0x2a0   :  { %6120 = vmatprep.subr.mxu1 %v1775_v52  ;;  %6118 = vmatmul.mubr.msk.f32.vlgmr.msra.gmra.mrb[16].mxu1 %vm108_vm0, %v1366_v7  ;;  %v2226_v7 = vld [vmem:[#allocation6 + $0x50] sm:$0xff] }
 0x2a1   :  { %6638 = vmatpush1.bf16.msra.mxu0 %v9080_v13  ;;  %6121 = vmatpush3.msra.mxu1 %v1775_v52  ;;  %v2265_v52 = vld [vmem:[#allocation6 + $0x188] sm:$0xff]  ;;  %v2275_v13 = vld [vmem:[#allocation6 + $0x1d8] sm:$0xff] }
 0x2a2   :  { %6640 = vmatprep.subr.bf16.mxu0 %v9081_v11  ;;  %6122 = vmatprep.mubr.msk.f32.mxu1 %vm108_vm0, %v1359_v16  ;;  %v8051_v16 = vpack.c.bf16 %v2226_v7, %v2218_v61  ;;  %v8080_v23 = vpack.c.bf16 %v2273_v41, %v2265_v52  ;;  %v2264_v11 = vld [vmem:[#allocation6 + $0x180] sm:$0xff]  ;;  %v8099_v61 = vpack.c.bf16 %v2290_v25, %v2282_v17  ;;  %v2297_v7 = vld [vmem:[#allocation6 + $0x288] sm:$0xff] }
 0x2a3   :  { %v2312_v52 = vld [vmem:[#allocation6 + $0x300] sm:$0xff] }
 0x2a4   :  { %v2320_v41 = vld [vmem:[#allocation6 + $0x340] sm:$0xff] }
 0x2a5   :  { %6642 = vmatpush1.bf16.msra.mxu0 %v9082_v56  ;;  %v2272_v56 = vld [vmem:[#allocation6 + $0x1c0] sm:$0xff] }
 0x2a6   :  { %6644 = vmatprep.subr.bf16.mxu0 %v9083_v63  ;;  %v8082_v63 = vpack.c.bf16 %v2275_v13, %v2267_v15  ;;  %v8118_v15 = vpack.c.bf16 %v2323_v12, %v2315_v39  ;;  %v8120_v13 = vpack.c.bf16 %v2320_v41, %v2312_v52 }
 0x2a8   :  { %6123 = vmatmul.mubr.msk.f32.vlgmr.msra.gmra.mrb[16].mxu1 %vm108_vm0, %v1360_v44  ;;  %v2233_v44 = vld [vmem:[#allocation6 + $0x88] sm:$0xff] }
 0x2a9   :  { %6646 = vmatpush1.bf16.msra.mxu0 %v9084_v49  ;;  %6127 = vmatprep.mubr.msk.f32.mxu1 %vm108_vm0, %v1534_v62  ;;  %v2241_v62 = vld [vmem:[#allocation6 + $0xc8] sm:$0xff]  ;;  %v8084_v49 = vpack.c.bf16 %v2272_v56, %v2264_v11  ;;  %v2314_v11 = vld [vmem:[#allocation6 + $0x310] sm:$0xff] }
 0x2aa   :  { %6648 = vmatprep.subr.bf16.mxu0 %v9085_v38  ;;  %v2266_v38 = vld [vmem:[#allocation6 + $0x190] sm:$0xff] }
 0x2ab   :  { %v2322_v56 = vld [vmem:[#allocation6 + $0x350] sm:$0xff] }
 0x2ad   :  { %6650 = vmatpush1.bf16.msra.mxu0 %v9086_v33  ;;  %v2274_v33 = vld [vmem:[#allocation6 + $0x1d0] sm:$0xff] }
 0x2ae   :  { %6652 = vmatprep.subr.bf16.mxu0 %v9087_v8  ;;  %v8087_v8 = vpack.c.bf16 %v2274_v33, %v2266_v38  ;;  %v8123_v38 = vpack.c.bf16 %v2322_v56, %v2314_v11  ;;  %v2329_v33 = vld [vmem:[#allocation6 + $0x388] sm:$0xff] }
 0x2b1   :  { %6654 = vmatpush1.bf16.msra.mxu0 %v9088_v0  ;;  %v2281_v0 = vld [vmem:[#allocation6 + $0x208] sm:$0xff] }
 0x2b2   :  { %6656 = vmatprep.subr.bf16.mxu0 %v9089_v57  ;;  %v2289_v57 = vld [vmem:[#allocation6 + $0x248] sm:$0xff] }
 0x2b5   :  { %6658 = vmatpush1.bf16.msra.mxu0 %v9090_v59  ;;  %v2283_v59 = vld [vmem:[#allocation6 + $0x218] sm:$0xff] }
 0x2b6   :  { %6660 = vmatprep.subr.bf16.mxu0 %v8044_v36 }
 0x2b8   :  { %1845 = vmatmul.mubr.f32.vlgmr.msra.gmra.mrb[12].mxu0 %v1071_v31  ;;  %v2219_v31 = vld [vmem:[#allocation6 + $0x18] sm:$0xff] }
 0x2b9   :  { %2410 = vmatprep.mubr.f32.mxu0 %v9052_v55  ;;  %v8046_v34 = vpack.c.bf16 %v2227_v60, %v2219_v31  ;;  %6662 = vmatpush1.bf16.msra.mxu0 %v8048_v53  ;;  %v8096_v60 = vpack.c.bf16 %v2288_v24, %v2280_v30  ;;  %v2328_v30 = vld [vmem:[#allocation6 + $0x380] sm:$0xff] }
 0x2ba   :  { %v2336_v24 = vld [vmem:[#allocation6 + $0x3c0] sm:$0xff] }
 0x2bb   :  { %v8132_v25 = vpack.c.bf16 %v2336_v24, %v2328_v30 }
 0x34b   :  { %v8031_v21 = vpop.f32.mrb[10].mxu0 }
 0x34c   :  { %v8033_v28 = vpop.f32.mrb[11].mxu0 }
 0x34d   :  { %v8037_v46 = vadd.f32 %v8031_v21, %v8033_v28 }
 0x34f   :  { %v2156_v22 = vrot.slane %v8037_v46, 4 }
 0x351   :  { %v2157_v39 = vadd.f32 %v2156_v22, %v8037_v46 }
 0x353   :  { %v2158_v41 = vrot.slane %v2157_v39, 2 }
 0x38b   :  { %v1846_v1 = vpop.f32.mrb[12].mxu0 }
 0x38c   :  { %v1848_v2 = vpop.f32.mrb[13].mxu0  ;;  %6125 = vmatprep.subr.mxu1 %v1846_v1 }
 0x38d   :  { %6126 = vmatpush3.msra.mxu1 %v1846_v1  ;;  %v8092_v1 = vpack.c.bf16 %v2289_v57, %v2281_v0  ;;  %v2337_v0 = vld [vmem:[#allocation6 + $0x3c8] sm:$0xff]  ;;  %v2331_v57 = vld [vmem:[#allocation6 + $0x398] sm:$0xff] }
 0x38e   :  { %6128 = vmatmul.mubr.msk.f32.vlgmr.msra.gmra.mrb[16].mxu1 %vm108_vm0, %v1535_v10  ;;  %6130 = vmatprep.subr.mxu1 %v1848_v2  ;;  %v2235_v10 = vld [vmem:[#allocation6 + $0x98] sm:$0xff] }
 0x38f   :  { %6131 = vmatpush3.msra.mxu1 %v1848_v2  ;;  %6132 = vmatprep.mubr.msk.f32.mxu1 %vm108_vm0, %v7976_v26  ;;  %v8056_v26 = vpack.c.bf16 %v2241_v62, %v2233_v44  ;;  %v8058_v54 = vpack.c.bf16 %v2243_v50, %v2235_v10  ;;  %v2291_v2 = vld [vmem:[#allocation6 + $0x258] sm:$0xff]  ;;  %v2305_v44 = vld [vmem:[#allocation6 + $0x2c8] sm:$0xff] }
 0x390   :  { %6692 = vmatprep.subr.bf16.mxu1 %v8046_v34  ;;  %v8094_v31 = vpack.c.bf16 %v2291_v2, %v2283_v59  ;;  %v2299_v62 = vld [vmem:[#allocation6 + $0x298] sm:$0xff]  ;;  %v8104_v10 = vpack.c.bf16 %v2305_v44, %v2297_v7  ;;  %v8128_v59 = vpack.c.bf16 %v2337_v0, %v2329_v33  ;;  %v2330_v7 = vld [vmem:[#allocation6 + $0x390] sm:$0xff]  ;;  %v2159_v33 = vadd.f32 %v2158_v41, %v2157_v39 }
 0x391   :  { %6664 = vmatprep.subr.bf16.mxu0 %v8056_v26  ;;  %v2307_v50 = vld [vmem:[#allocation6 + $0x2d8] sm:$0xff]  ;;  %v2338_v44 = vld [vmem:[#allocation6 + $0x3d0] sm:$0xff] }
 0x392   :  { %v8106_v18 = vpack.c.bf16 %v2307_v50, %v2299_v62  ;;  %v2339_v2 = vld [vmem:[#allocation6 + $0x3d8] sm:$0xff]  ;;  %v8135_v62 = vpack.c.bf16 %v2338_v44, %v2330_v7  ;;  %v2221_v50 = vld [vmem:[#allocation6 + $0x28] sm:$0xff] }
 0x393   :  { %v8130_v17 = vpack.c.bf16 %v2339_v2, %v2331_v57  ;;  %v2160_v2 = vrot.slane %v2159_v33, 1 }
 0x395   :  { %v2161_v7 = vadd.f32 %v2160_v2, %v2159_v33 }
 0x396   :  { %6133 = vmatmul.mubr.msk.f32.vlgmr.msra.gmra.mrb[16].mxu1 %vm108_vm0, %v1625_v5  ;;  %v2232_v5 = vld [vmem:[#allocation6 + $0x80] sm:$0xff]  ;;  %vm2654_vm0 = vcmp.lt.s32.totalorder %v7887_v43, 10 }
 0x397   :  { %2487 = vmatprep.mubr.f32.mxu1 %v9052_v55  ;;  %6694 = vmatpush1.bf16.msra.mxu1 %v8051_v16  ;;  %v8060_v6 = vpack.c.bf16 %v2240_v37, %v2232_v5  ;;  %v2296_v5 = vld [vmem:[#allocation6 + $0x280] sm:$0xff] }
 0x398   :  { %6696 = vmatprep.subr.bf16.mxu1 %v8058_v54  ;;  %v2304_v37 = vld [vmem:[#allocation6 + $0x2c0] sm:$0xff] }
 0x399   :  { %6666 = vmatpush1.bf16.msra.mxu0 %v8060_v6  ;;  %v8108_v20 = vpack.c.bf16 %v2304_v37, %v2296_v5  ;;  %v2229_v5 = vld [vmem:[#allocation6 + $0x68] sm:$0xff]  ;;  %v2223_v37 = vld [vmem:[#allocation6 + $0x38] sm:$0xff] }
 0x39a   :  { %6668 = vmatprep.subr.bf16.mxu0 %v8068_v29  ;;  %v8140_v3 = vpack.c.bf16 %v2229_v5, %v2221_v50  ;;  %v8142_v58 = vpack.c.bf16 %v2231_v45, %v2223_v37 }
 0x39b   :  { %6698 = vmatpush1.bf16.msra.mxu1 %v8063_v40 }
 0x39c   :  { %6700 = vmatprep.subr.bf16.mxu1 %v8070_v47  ;;  %9091 = vst [vmem:[#allocation13_spill] sm:$0xff] %v8140_v3 }
 0x39d   :  { %6670 = vmatpush1.bf16.msra.mxu0 %v8072_v35 }
 0x39e   :  { %6672 = vmatprep.subr.bf16.mxu0 %v8080_v23 }
 0x39f   :  { %6702 = vmatpush1.bf16.msra.mxu1 %v8075_v19 }
 0x3a0   :  { %6704 = vmatprep.subr.bf16.mxu1 %v8082_v63 }
 0x3a1   :  { %6674 = vmatpush1.bf16.msra.mxu0 %v8084_v49 }
 0x3a2   :  { %6676 = vmatprep.subr.bf16.mxu0 %v8092_v1 }
 0x3a3   :  { %6706 = vmatpush1.bf16.msra.mxu1 %v8087_v8 }
 0x3a4   :  { %6708 = vmatprep.subr.bf16.mxu1 %v8094_v31 }
 0x3a5   :  { %6678 = vmatpush1.bf16.msra.mxu0 %v8096_v60 }
 0x3a6   :  { %6680 = vmatprep.subr.bf16.mxu0 %v8104_v10 }
 0x3a7   :  { %6710 = vmatpush1.bf16.msra.mxu1 %v8099_v61 }
 0x3a8   :  { %6712 = vmatprep.subr.bf16.mxu1 %v8106_v18 }
 0x3a9   :  { %6682 = vmatpush1.bf16.msra.mxu0 %v8108_v20 }
 0x3aa   :  { %6684 = vmatprep.subr.bf16.mxu0 %v8116_v27 }
 0x3ab   :  { %6714 = vmatpush1.bf16.msra.mxu1 %v8111_v51 }
 0x3ac   :  { %6716 = vmatprep.subr.bf16.mxu1 %v8118_v15 }
 0x3ad   :  { %6686 = vmatpush1.bf16.msra.mxu0 %v8120_v13 }
 0x3ae   :  { %6688 = vmatprep.subr.bf16.mxu0 %v8128_v59 }
 0x3af   :  { %6718 = vmatpush1.bf16.msra.mxu1 %v8123_v38 }
 0x3b0   :  { %6720 = vmatprep.subr.bf16.mxu1 %v8130_v17 }
 0x3b1   :  { %6690 = vmatpush1.bf16.msra.mxu0 %v8132_v25 }
 0x3b2   :  { %6724 = vmatprep.subr.bf16.mxu0 %v8140_v3  ;;  %v2255_v3 = vld [vmem:[#allocation6 + $0x138] sm:$0xff] }
 0x3b3   :  { %6722 = vmatpush1.bf16.msra.mxu1 %v8135_v62 }
 0x3b4   :  { %6756 = vmatprep.subr.bf16.mxu1 %v8142_v58 }
 0x469   :  { %v6134_v12 = vpop.f32.mrb[16].mxu1 }
 0x46a   :  { %v2144_v52 = vpop.f32.mrb[17].mxu1 }
 0x46b   :  { %v2163_v11 = vadd.f32 %v6134_v12, %v2144_v52 }
 0x46d   :  { %v2164_v56 = vrot.slane %v2163_v11, 4 }
 0x46f   :  { %v2165_v0 = vadd.f32 %v2164_v56, %v2163_v11 }
 0x471   :  { %v2166_v57 = vrot.slane %v2165_v0, 2 }
 0x473   :  { %v2167_v30 = vadd.f32 %v2166_v57, %v2165_v0 }
 0x475   :  { %v2168_v24 = vrot.slane %v2167_v30, 1 }
 0x477   :  { %v2169_v44 = vadd.f32 %v2168_v24, %v2167_v30 }
 0x479   :  { %v2170_v50 = vadd.f32 %v2169_v44, %v2161_v7 }
 0x47b   :  { %v2171_v5 = vmul.f32 0.05, %v2170_v50 }
 0x47d   :  { %v2172_v37 = vsub.f32 %v8033_v28, %v2171_v5  ;;  %v2173_v45 = vsub.f32 %v8031_v21, %v2171_v5  ;;  %v2176_v46 = vsub.f32 %v2144_v52, %v2171_v5  ;;  %v2177_v22 = vsub.f32 %v6134_v12, %v2171_v5 }
 0x47f   :  { %v2175_v32 = vsel %vm1350_vm10, %v2173_v45, 0.0  ;;  %v2179_v39 = vsel %vm1350_vm10, %v2177_v22, 0.0  ;;  %v2180_v41 = vmul.f32 %v2172_v37, %v2172_v37  ;;  %v2190_v11 = vmul.f32 %v2176_v46, %v2176_v46 }
 0x480   :  { %v2181_v56 = vmul.f32 %v2175_v32, %v2175_v32  ;;  %v2191_v0 = vmul.f32 %v2179_v39, %v2179_v39  ;;  %vm2666_vm10 = vcmp.eq.s32.totalorder %v7753_v14, %v7887_v43 }
 0x481   :  { %vm2668_vm11 = vmand %vm2654_vm0, %vm2666_vm10 }
 0x482   :  { %v2182_v33 = vadd.f32 %v2181_v56, %v2180_v41  ;;  %v2192_v57 = vadd.f32 %v2191_v0, %v2190_v11  ;;  %v1201_v41 = vld [vmem:[%s8948_s5 + $0x2] ss:$0 sm:$0xff]  ;;  %v1202_v0 = vld [vmem:[%s8948_s5 + $0x3] ss:$0 sm:$0xff] }
 0x484   :  { %v2183_v2 = vrot.slane %v2182_v33, 4  ;;  %v2193_v30 = vrot.slane %v2192_v57, 4 }
 0x486   :  { %v2184_v24 = vadd.f32 %v2183_v2, %v2182_v33  ;;  %v2194_v28 = vadd.f32 %v2193_v30, %v2192_v57  ;;  %v2220_v33 = vld [vmem:[#allocation6 + $0x20] sm:$0xff] }
 0x488   :  { %v2185_v7 = vrot.slane %v2184_v24, 2  ;;  %v2195_v21 = vrot.slane %v2194_v28, 2 }
 0x48a   :  { %v2186_v52 = vadd.f32 %v2185_v7, %v2184_v24  ;;  %v2196_v12 = vadd.f32 %v2195_v21, %v2194_v28  ;;  %v2228_v24 = vld [vmem:[#allocation6 + $0x60] sm:$0xff]  ;;  %v2222_v28 = vld [vmem:[#allocation6 + $0x30] sm:$0xff]  ;;  %v2237_v21 = vld [vmem:[#allocation6 + $0xa8] sm:$0xff] }
 0x48b   :  { %v2230_v7 = vld [vmem:[#allocation6 + $0x70] sm:$0xff] }
 0x48c   :  { %v2187_v44 = vrot.slane %v2186_v52, 1  ;;  %v2197_v50 = vrot.slane %v2196_v12, 1 }
 0x48e   :  { %v2188_v5 = vadd.f32 %v2187_v44, %v2186_v52  ;;  %v2198_v45 = vadd.f32 %v2197_v50, %v2196_v12  ;;  %v2245_v12 = vld [vmem:[#allocation6 + $0xe8] sm:$0xff]  ;;  %v2239_v44 = vld [vmem:[#allocation6 + $0xb8] sm:$0xff] }
 0x48f   :  { %v2247_v50 = vld [vmem:[#allocation6 + $0xf8] sm:$0xff] }
 0x490   :  { %v2199_v42 = vadd.f32 %v2198_v45, %v2188_v5  ;;  %v8164_v45 = vpack.c.bf16 %v2228_v24, %v2220_v33  ;;  %v2252_v24 = vld [vmem:[#allocation6 + $0x120] sm:$0xff] }
 0x492   :  { %v2200_v22 = vmul.f32 0.05, %v2199_v42  ;;  %9092 = vst [vmem:[#allocation14_spill] sm:$0xff] %v8164_v45 }
 0x494   :  { %v2201_v9 = vadd.f32 1e-05, %v2200_v22  ;;  %v8166_v22 = vpack.c.bf16 %v2230_v7, %v2222_v28  ;;  %v2260_v28 = vld [vmem:[#allocation6 + $0x160] sm:$0xff] }
 0x496   :  { %7283 = vrsqrt.f32 %v2201_v9 }
 0x4a0   :  { %v7284_v11 = vpop.eup %7283 }
 0x4a1   :  { %v2203_v56 = vmul.f32 %v7284_v11, %v1201_v41  ;;  %v2238_v11 = vld [vmem:[#allocation6 + $0xb0] sm:$0xff] }
 0x4a3   :  { %v2210_v57 = vmul.f32 %v2203_v56, %v2176_v46  ;;  %v2211_v2 = vmul.f32 %v2203_v56, %v2179_v39  ;;  %v2204_v30 = vmul.f32 %v2203_v56, %v2172_v37  ;;  %v2205_v42 = vmul.f32 %v2203_v56, %v2175_v32  ;;  %v2236_v46 = vld [vmem:[#allocation6 + $0xa0] sm:$0xff]  ;;  %v2246_v32 = vld [vmem:[#allocation6 + $0xf0] sm:$0xff]  ;;  %v2253_v56 = vld [vmem:[#allocation6 + $0x128] sm:$0xff] }
 0x4a4   :  { %v2244_v39 = vld [vmem:[#allocation6 + $0xe0] sm:$0xff] }
 0x4a5   :  { %v8160_v9 = vadd.f32 %v2210_v57, %v1202_v0  ;;  %v2206_v52 = vadd.f32 %v2204_v30, %v1202_v0  ;;  %v8162_v5 = vadd.f32 %v2211_v2, %v1202_v0  ;;  %v2207_v41 = vadd.f32 %v2205_v42, %v1202_v0  ;;  %v2263_v2 = vld [vmem:[#allocation6 + $0x178] sm:$0xff] }
 0x4a6   :  { %v8170_v57 = vpack.c.bf16 %v2245_v12, %v2237_v21  ;;  %v8172_v30 = vpack.c.bf16 %v2247_v50, %v2239_v44  ;;  %v8178_v33 = vpack.c.bf16 %v2244_v39, %v2236_v46  ;;  %v8180_v0 = vpack.c.bf16 %v2246_v32, %v2238_v11  ;;  %v2262_v12 = vld [vmem:[#allocation6 + $0x170] sm:$0xff]  ;;  %v2269_v44 = vld [vmem:[#allocation6 + $0x1a8] sm:$0xff]  ;;  %v2271_v46 = vld [vmem:[#allocation6 + $0x1b8] sm:$0xff] }
 0x4a7   :  { %v8168_v37 = vmax.f32 %v2206_v52, 0.0  ;;  %v8184_v7 = vmax.f32 %v2207_v41, 0.0  ;;  %v8186_v42 = vpack.c.bf16 %v2261_v48, %v2253_v56  ;;  %v8188_v21 = vpack.c.bf16 %v2263_v2, %v2255_v3  ;;  %v2254_v52 = vld [vmem:[#allocation6 + $0x130] sm:$0xff]  ;;  %v2277_v50 = vld [vmem:[#allocation6 + $0x1e8] sm:$0xff]  ;;  %v2279_v39 = vld [vmem:[#allocation6 + $0x1f8] sm:$0xff] }
 0x4a8   :  { %9093 = vst [vmem:[#allocation15_spill] sm:$0xff] %v8170_v57  ;;  %9094 = vst [vmem:[#allocation16_spill] sm:$0xff] %v8178_v33  ;;  %v8196_v48 = vpack.c.bf16 %v2260_v28, %v2252_v24  ;;  %v8198_v3 = vpack.c.bf16 %v2262_v12, %v2254_v52  ;;  %v2268_v41 = vld [vmem:[#allocation6 + $0x1a0] sm:$0xff]  ;;  %v8202_v32 = vpack.c.bf16 %v2277_v50, %v2269_v44  ;;  %v2270_v2 = vld [vmem:[#allocation6 + $0x1b0] sm:$0xff] }
 0x4a9   :  { %2411 = vmatmul.mubr.f32.vlgmr.msra.gmra.mrb[14].mxu0 %v8168_v37  ;;  %2488 = vmatmul.mubr.f32.vlgmr.msra.gmra.mrb[18].mxu1 %v8168_v37  ;;  %9095 = vst [vmem:[#allocation17_spill] sm:$0xff] %v8180_v0  ;;  %9096 = vst [vmem:[#allocation18_spill] sm:$0xff] %v8186_v42  ;;  %v2276_v11 = vld [vmem:[#allocation6 + $0x1e0] sm:$0xff]  ;;  %v8204_v56 = vpack.c.bf16 %v2279_v39, %v2271_v46  ;;  %v2286_v46 = vld [vmem:[#allocation6 + $0x230] sm:$0xff] }
 0x4aa   :  { %6726 = vmatpush1.bf16.msra.mxu0 %v8164_v45  ;;  %6758 = vmatpush1.bf16.msra.mxu1 %v8166_v22  ;;  %9097 = vst [vmem:[#allocation19_spill] sm:$0xff] %v8188_v21  ;;  %9098 = vst [vmem:[#allocation20_spill] sm:$0xff] %v8196_v48  ;;  %v2285_v45 = vld [vmem:[#allocation6 + $0x228] sm:$0xff]  ;;  %v8210_v24 = vpack.c.bf16 %v2276_v11, %v2268_v41  ;;  %v2284_v52 = vld [vmem:[#allocation6 + $0x220] sm:$0xff] }
 0x4ab   :  { %2416 = vmatprep.mubr.f32.mxu0 %v9052_v55  ;;  %2493 = vmatprep.mubr.f32.mxu1 %v9052_v55  ;;  %9099 = vst [vmem:[#allocation21_spill] sm:$0xff] %v8198_v3  ;;  %9100 = vst [vmem:[#allocation22_spill] sm:$0xff] %v8202_v32  ;;  %v2292_v12 = vld [vmem:[#allocation6 + $0x260] sm:$0xff]  ;;  %v2294_v39 = vld [vmem:[#allocation6 + $0x270] sm:$0xff] }
 0x4ac   :  { %6728 = vmatprep.subr.bf16.mxu0 %v8170_v57  ;;  %6760 = vmatprep.subr.bf16.mxu1 %v8172_v30  ;;  %9101 = vst [vmem:[#allocation23_spill] sm:$0xff] %v8204_v56  ;;  %v2278_v57 = vld [vmem:[#allocation6 + $0x1f0] sm:$0xff]  ;;  %9102 = vst [vmem:[#allocation24_spill] sm:$0xff] %v8210_v24  ;;  %v8224_v41 = vpack.c.bf16 %v2294_v39, %v2286_v46  ;;  %v2300_v11 = vld [vmem:[#allocation6 + $0x2a0] sm:$0xff] }
 0x4ad   :  { %2417 = vmatmul.mubr.f32.gmra.mrb[16].mxu0 %v8184_v7  ;;  %2494 = vmatmul.mubr.f32.gmra.mrb[20].mxu1 %v8184_v7  ;;  %v8212_v28 = vpack.c.bf16 %v2278_v57, %v2270_v2  ;;  %v8222_v57 = vpack.c.bf16 %v2292_v12, %v2284_v52  ;;  %v2308_v2 = vld [vmem:[#allocation6 + $0x2e0] sm:$0xff] }
 0x4ae   :  { %6730 = vmatpush1.bf16.msra.mxu0 %v8178_v33  ;;  %6762 = vmatpush1.bf16.msra.mxu1 %v8180_v0  ;;  %v2293_v33 = vld [vmem:[#allocation6 + $0x268] sm:$0xff]  ;;  %v2295_v0 = vld [vmem:[#allocation6 + $0x278] sm:$0xff]  ;;  %9107 = vst [vmem:[#allocation29_spill] sm:$0xff] %v8224_v41  ;;  %v8234_v52 = vpack.c.bf16 %v2308_v2, %v2300_v11  ;;  %v2316_v46 = vld [vmem:[#allocation6 + $0x320] sm:$0xff] }
 0x4af   :  { %6732 = vmatprep.subr.bf16.mxu0 %v8186_v42  ;;  %6764 = vmatprep.subr.bf16.mxu1 %v8188_v21  ;;  %9103 = vst [vmem:[#allocation25_spill] sm:$0xff] %v8212_v28  ;;  %v8216_v44 = vpack.c.bf16 %v2293_v33, %v2285_v45  ;;  %v8218_v50 = vpack.c.bf16 %v2295_v0, %v2287_v4  ;;  %v2301_v42 = vld [vmem:[#allocation6 + $0x2a8] sm:$0xff]  ;;  %v2303_v21 = vld [vmem:[#allocation6 + $0x2b8] sm:$0xff]  ;;  %9106 = vst [vmem:[#allocation28_spill] sm:$0xff] %v8222_v57 }
 0x4b0   :  { %2564 = vmatprep.mubr.f32.mxu0 %v9052_v55  ;;  %2641 = vmatprep.mubr.f32.mxu1 %v9052_v55  ;;  %v2302_v33 = vld [vmem:[#allocation6 + $0x2b0] sm:$0xff]  ;;  %v2324_v39 = vld [vmem:[#allocation6 + $0x360] sm:$0xff] }
 0x4b1   :  { %9104 = vst [vmem:[#allocation26_spill] sm:$0xff] %v8216_v44  ;;  %9105 = vst [vmem:[#allocation27_spill] sm:$0xff] %v8218_v50  ;;  %v2310_v0 = vld [vmem:[#allocation6 + $0x2f0] sm:$0xff]  ;;  %v8246_v11 = vpack.c.bf16 %v2324_v39, %v2316_v46 }
 0x4b2   :  { %6734 = vmatpush1.bf16.msra.mxu0 %v8196_v48  ;;  %6766 = vmatpush1.bf16.msra.mxu1 %v8198_v3  ;;  %v2309_v48 = vld [vmem:[#allocation6 + $0x2e8] sm:$0xff]  ;;  %v2311_v3 = vld [vmem:[#allocation6 + $0x2f8] sm:$0xff]  ;;  %v8236_v12 = vpack.c.bf16 %v2310_v0, %v2302_v33  ;;  %v2332_v33 = vld [vmem:[#allocation6 + $0x3a0] sm:$0xff] }
 0x4b3   :  { %6736 = vmatprep.subr.bf16.mxu0 %v8202_v32  ;;  %6768 = vmatprep.subr.bf16.mxu1 %v8204_v56  ;;  %v8228_v4 = vpack.c.bf16 %v2309_v48, %v2301_v42  ;;  %v8230_v45 = vpack.c.bf16 %v2311_v3, %v2303_v21  ;;  %v2317_v32 = vld [vmem:[#allocation6 + $0x328] sm:$0xff]  ;;  %v2319_v56 = vld [vmem:[#allocation6 + $0x338] sm:$0xff]  ;;  %v2318_v48 = vld [vmem:[#allocation6 + $0x330] sm:$0xff] }
 0x4b4   :  { %v2326_v3 = vld [vmem:[#allocation6 + $0x370] sm:$0xff] }
 0x4b5   :  { %v8248_v2 = vpack.c.bf16 %v2326_v3, %v2318_v48  ;;  %v2342_v0 = vld [vmem:[#allocation6 + $0x3f0] sm:$0xff] }
 0x4b6   :  { %6738 = vmatpush1.bf16.msra.mxu0 %v8210_v24  ;;  %6770 = vmatpush1.bf16.msra.mxu1 %v8212_v28  ;;  %v2325_v24 = vld [vmem:[#allocation6 + $0x368] sm:$0xff]  ;;  %v2327_v28 = vld [vmem:[#allocation6 + $0x378] sm:$0xff] }
 0x4b7   :  { %6740 = vmatprep.subr.bf16.mxu0 %v8216_v44  ;;  %6772 = vmatprep.subr.bf16.mxu1 %v8218_v50  ;;  %v8240_v42 = vpack.c.bf16 %v2325_v24, %v2317_v32  ;;  %v8242_v21 = vpack.c.bf16 %v2327_v28, %v2319_v56  ;;  %v2333_v44 = vld [vmem:[#allocation6 + $0x3a8] sm:$0xff]  ;;  %v2335_v50 = vld [vmem:[#allocation6 + $0x3b8] sm:$0xff]  ;;  %v2340_v24 = vld [vmem:[#allocation6 + $0x3e0] sm:$0xff] }
 0x4b8   :  { %v2334_v28 = vld [vmem:[#allocation6 + $0x3b0] sm:$0xff]  ;;  %v8258_v46 = vpack.c.bf16 %v2340_v24, %v2332_v33  ;;  %v3195_v33 = vadd.s32 5, %v7887_v43 }
 0x4b9   :  { %v8260_v39 = vpack.c.bf16 %v2342_v0, %v2334_v28  ;;  %v3285_v28 = vadd.s32 6, %v7887_v43 }
 0x4ba   :  { %6742 = vmatpush1.bf16.msra.mxu0 %v8222_v57  ;;  %6774 = vmatpush1.bf16.msra.mxu1 %v8224_v41  ;;  %v2341_v57 = vld [vmem:[#allocation6 + $0x3e8] sm:$0xff]  ;;  %v2343_v41 = vld [vmem:[#allocation6 + $0x3f8] sm:$0xff] }
 0x4bb   :  { %6744 = vmatprep.subr.bf16.mxu0 %v8228_v4  ;;  %6776 = vmatprep.subr.bf16.mxu1 %v8230_v45  ;;  %v8252_v32 = vpack.c.bf16 %v2341_v57, %v2333_v44  ;;  %v8254_v56 = vpack.c.bf16 %v2343_v41, %v2335_v50 }
 0x4be   :  { %6746 = vmatpush1.bf16.msra.mxu0 %v8234_v52  ;;  %6778 = vmatpush1.bf16.msra.mxu1 %v8236_v12 }
 0x4bf   :  { %6748 = vmatprep.subr.bf16.mxu0 %v8240_v42  ;;  %6780 = vmatprep.subr.bf16.mxu1 %v8242_v21 }
 0x4c2   :  { %6750 = vmatpush1.bf16.msra.mxu0 %v8246_v11  ;;  %6782 = vmatpush1.bf16.msra.mxu1 %v8248_v2 }
 0x4c3   :  { %6752 = vmatprep.subr.bf16.mxu0 %v8252_v32  ;;  %6784 = vmatprep.subr.bf16.mxu1 %v8254_v56 }
 0x4c6   :  { %6754 = vmatpush1.bf16.msra.mxu0 %v8258_v46  ;;  %6786 = vmatpush1.bf16.msra.mxu1 %v8260_v39 }
 0x4c7   :  { %6820 = vmatprep.subr.bf16.mxu1 %v8044_v36  ;;  %v8290_v36 = vmax.f32 %v8160_v9, 0.0 }
 0x4c9   :  { %2565 = vmatmul.mubr.f32.vlgmr.msra.gmra.mrb[18].mxu0 %v8168_v37  ;;  %2642 = vmatmul.mubr.f32.vlgmr.msra.gmra.mrb[22].mxu1 %v8168_v37  ;;  %v3105_v37 = vadd.s32 4, %v7887_v43 }
 0x4ca   :  { %6822 = vmatpush1.bf16.msra.mxu1 %v8048_v53  ;;  %2570 = vmatprep.mubr.f32.mxu0 %v9052_v55  ;;  %v8297_v53 = vmax.f32 %v8162_v5, 0.0 }
 0x4cb   :  { %2647 = vmatprep.mubr.f32.mxu1 %v9052_v55  ;;  %6824 = vmatprep.subr.bf16.mxu1 %v8056_v26  ;;  %v9109_v26 = vld [vmem:[#allocation19_spill] sm:$0xff] }
 0x4cd   :  { %2571 = vmatmul.mubr.f32.gmra.mrb[20].mxu0 %v8184_v7  ;;  %2648 = vmatmul.mubr.f32.gmra.mrb[24].mxu1 %v8184_v7 }
 0x4ce   :  { %6826 = vmatpush1.bf16.msra.mxu1 %v8060_v6  ;;  %3439 = vmatprep.mubr.f32.mxu1 %v9052_v55  ;;  %v9111_v6 = vld [vmem:[#allocation23_spill] sm:$0xff] }
 0x4cf   :  { %6828 = vmatprep.subr.bf16.mxu1 %v8068_v29  ;;  %v9113_v29 = vld [vmem:[#allocation27_spill] sm:$0xff] }
 0x4d2   :  { %6830 = vmatpush1.bf16.msra.mxu1 %v8072_v35 }
 0x4d3   :  { %6832 = vmatprep.subr.bf16.mxu1 %v8080_v23  ;;  %v9115_v23 = vld [vmem:[#allocation46_spill] sm:$0xff] }
 0x4d4   :  { %vm2656_vm4 = vcmp.lt.s32.totalorder %v9115_v23, 15  ;;  %vm2667_vm14 = vcmp.eq.s32.totalorder %v9115_v23, %v7887_v43 }
 0x4d5   :  { %vm8355_vm9 = vmand %vm2654_vm0, %vm2656_vm4 }
 0x4d6   :  { %6834 = vmatpush1.bf16.msra.mxu1 %v8084_v49  ;;  %vm2669_vm10 = vmand %vm8355_vm9, %vm2667_vm14 }
 0x4d7   :  { %6836 = vmatprep.subr.bf16.mxu1 %v8092_v1  ;;  %v9121_v1 = vld [vmem:[#allocation16_spill] sm:$0xff] }
 0x4da   :  { %6838 = vmatpush1.bf16.msra.mxu1 %v8096_v60 }
 0x4db   :  { %6840 = vmatprep.subr.bf16.mxu1 %v8104_v10 }
 0x4de   :  { %6842 = vmatpush1.bf16.msra.mxu1 %v8108_v20 }
 0x4df   :  { %6844 = vmatprep.subr.bf16.mxu1 %v8116_v27 }
 0x4e2   :  { %6846 = vmatpush1.bf16.msra.mxu1 %v8120_v13  ;;  %v8368_v13 = vsel %vm2669_vm10, 1.0, %v9052_v55 }
 0x4e3   :  { %6848 = vmatprep.subr.bf16.mxu1 %v8128_v59  ;;  %v2925_v59 = vadd.s32 2, %v7887_v43 }
 0x4e5   :  { %vm2926_vm6 = vcmp.eq.s32.totalorder %v7753_v14, %v2925_v59 }
 0x4e6   :  { %6850 = vmatpush1.bf16.msra.mxu1 %v8132_v25 }
 0x4e7   :  { %6852 = vmatprep.subr.bf16.mxu1 %v8046_v34  ;;  %v8322_v34 = vsel %vm2668_vm11, 1.0, %v9052_v55 }
 0x4e8   :  { %6139 = vmatprep.mubr.msk.f32.mxu0 %vm2672_vm3, %v8322_v34 }
 0x4e9   :  { %3440 = vmatmul.mubr.f32.vlgmr.msra.gmra.mrb[26].mxu1 %v8290_v36 }
 0x4ea   :  { %6854 = vmatpush1.bf16.msra.mxu1 %v8051_v16  ;;  %3445 = vmatprep.mubr.f32.mxu1 %v9052_v55  ;;  %v9108_v16 = vld [vmem:[#allocation17_spill] sm:$0xff] }
 0x4eb   :  { %6856 = vmatprep.subr.bf16.mxu1 %v8058_v54  ;;  %v9110_v54 = vld [vmem:[#allocation21_spill] sm:$0xff] }
 0x4ed   :  { %3446 = vmatmul.mubr.f32.gmra.mrb[28].mxu1 %v8297_v53 }
 0x4ee   :  { %6858 = vmatpush1.bf16.msra.mxu1 %v8063_v40  ;;  %3516 = vmatprep.mubr.f32.mxu1 %v9052_v55  ;;  %v9112_v40 = vld [vmem:[#allocation25_spill] sm:$0xff] }
 0x4ef   :  { %6860 = vmatprep.subr.bf16.mxu1 %v8070_v47  ;;  %v9114_v47 = vld [vmem:[#allocation29_spill] sm:$0xff] }
 0x4f2   :  { %6862 = vmatpush1.bf16.msra.mxu1 %v8075_v19 }
 0x4f3   :  { %6864 = vmatprep.subr.bf16.mxu1 %v8082_v63  ;;  %v2659_v63 = vadd.s32 4294967295, %v7887_v43 }
 0x4f5   :  { %vm2660_vm7 = vcmp.eq.s32.totalorder %v7753_v14, %v2659_v63  ;;  %vm2661_vm15 = vcmp.eq.s32.totalorder %v9115_v23, %v2659_v63  ;;  %v9119_v63 = vld [vmem:[#allocation14_spill] sm:$0xff] }
 0x4f6   :  { %6866 = vmatpush1.bf16.msra.mxu1 %v8087_v8  ;;  %vm2662_vm11 = vmand %vm2654_vm0, %vm2660_vm7 }
 0x4f7   :  { %6868 = vmatprep.subr.bf16.mxu1 %v8094_v31  ;;  %vm2663_vm7 = vmand %vm8355_vm9, %vm2661_vm15 }
 0x4fa   :  { %6870 = vmatpush1.bf16.msra.mxu1 %v8099_v61 }
 0x4fb   :  { %6872 = vmatprep.subr.bf16.mxu1 %v8106_v18 }
 0x4fe   :  { %6874 = vmatpush1.bf16.msra.mxu1 %v8111_v51 }
 0x4ff   :  { %6876 = vmatprep.subr.bf16.mxu1 %v8118_v15  ;;  %v2835_v15 = vadd.s32 1, %v7887_v43 }
 0x501   :  { %vm2836_vm14 = vcmp.eq.s32.totalorder %v7753_v14, %v2835_v15 }
 0x502   :  { %6878 = vmatpush1.bf16.msra.mxu1 %v8123_v38  ;;  %v8371_v38 = vsel %vm2662_vm11, 1.0, %v9052_v55  ;;  %vm2838_vm10 = vmand %vm2654_vm0, %vm2836_vm14  ;;  %vm2837_vm11 = vcmp.eq.s32.totalorder %v9115_v23, %v2835_v15 }
 0x503   :  { %6880 = vmatprep.subr.bf16.mxu1 %v8130_v17  ;;  %v8385_v17 = vsel %vm2663_vm7, 1.0, %v9052_v55  ;;  %v8388_v25 = vsel %vm2838_vm10, 1.0, %v9052_v55  ;;  %vm2839_vm15 = vmand %vm8355_vm9, %vm2837_vm11  ;;  %vm2927_vm7 = vcmp.eq.s32.totalorder %v9115_v23, %v2925_v59 }
 0x504   :  { %vm2928_vm14 = vmand %vm2654_vm0, %vm2926_vm6 }
 0x505   :  { %v8405_v9 = vsel %vm2928_vm14, 1.0, %v9052_v55  ;;  %vm2929_vm6 = vmand %vm8355_vm9, %vm2927_vm7  ;;  %vm3106_vm14 = vcmp.eq.s32.totalorder %v7753_v14, %v3105_v37 }
 0x506   :  { %6882 = vmatpush1.bf16.msra.mxu1 %v8135_v62  ;;  %v3015_v62 = vadd.s32 3, %v7887_v43  ;;  %v8419_v44 = vsel %vm2929_vm6, 1.0, %v9052_v55  ;;  %vm3107_vm6 = vcmp.eq.s32.totalorder %v9115_v23, %v3105_v37  ;;  %v4363_v37 = vld [vmem:[#allocation7 + $0x38] sm:$0xff] }
 0x507   :  { %6916 = vmatprep.subr.bf16.mxu1 %v8142_v58  ;;  %v8402_v58 = vsel %vm2839_vm15, 1.0, %v9052_v55 }
 0x508   :  { %vm3016_vm10 = vcmp.eq.s32.totalorder %v7753_v14, %v3015_v62  ;;  %vm3017_vm15 = vcmp.eq.s32.totalorder %v9115_v23, %v3015_v62 }
 0x509   :  { %3517 = vmatmul.mubr.f32.vlgmr.msra.gmra.mrb[30].mxu1 %v8290_v36  ;;  %vm3018_vm11 = vmand %vm2654_vm0, %vm3016_vm10 }
 0x50a   :  { %6918 = vmatpush1.bf16.msra.mxu1 %v8166_v22  ;;  %3522 = vmatprep.mubr.f32.mxu1 %v9052_v55  ;;  %v8422_v50 = vsel %vm3018_vm11, 1.0, %v9052_v55  ;;  %vm3019_vm7 = vmand %vm8355_vm9, %vm3017_vm15  ;;  %vm3196_vm11 = vcmp.eq.s32.totalorder %v7753_v14, %v3195_v33 }
 0x50b   :  { %6920 = vmatprep.subr.bf16.mxu1 %v8172_v30  ;;  %vm3108_vm10 = vmand %vm2654_vm0, %vm3106_vm14 }
 0x50c   :  { %v8439_v24 = vsel %vm3108_vm10, 1.0, %v9052_v55  ;;  %vm3109_vm15 = vmand %vm8355_vm9, %vm3107_vm6  ;;  %vm3286_vm10 = vcmp.eq.s32.totalorder %v7753_v14, %v3285_v28 }
 0x50d   :  { %3523 = vmatmul.mubr.f32.gmra.mrb[32].mxu1 %v8297_v53  ;;  %vm3198_vm14 = vmand %vm2654_vm0, %vm3196_vm11  ;;  %v8453_v0 = vsel %vm3109_vm15, 1.0, %v9052_v55  ;;  %vm3287_vm15 = vcmp.eq.s32.totalorder %v9115_v23, %v3285_v28  ;;  %v4366_v28 = vld [vmem:[#allocation7 + $0x50] sm:$0xff] }
 0x50e   :  { %6922 = vmatpush1.bf16.msra.mxu1 %v9108_v16  ;;  %3670 = vmatprep.mubr.f32.mxu1 %v9052_v55  ;;  %vm3288_vm11 = vmand %vm2654_vm0, %vm3286_vm10 }
 0x50f   :  { %6924 = vmatprep.subr.bf16.mxu1 %v9109_v26  ;;  %v8472_v26 = vsel %vm3288_vm11, 1.0, %v9052_v55  ;;  %vm3289_vm0 = vmand %vm8355_vm9, %vm3287_vm15 }
 0x512   :  { %6926 = vmatpush1.bf16.msra.mxu1 %v9110_v54  ;;  %v9118_v54 = vld [vmem:[#allocation13_spill] sm:$0xff] }
 0x513   :  { %6928 = vmatprep.subr.bf16.mxu1 %v9111_v6 }
 0x516   :  { %6930 = vmatpush1.bf16.msra.mxu1 %v9112_v40 }
 0x517   :  { %6932 = vmatprep.subr.bf16.mxu1 %v9113_v29  ;;  %v8483_v29 = vsel %vm3289_vm0, 1.0, %v9052_v55 }
 0x51a   :  { %6934 = vmatpush1.bf16.msra.mxu1 %v9114_v47 }
 0x51b   :  { %6936 = vmatprep.subr.bf16.mxu1 %v8230_v45 }
 0x51e   :  { %6938 = vmatpush1.bf16.msra.mxu1 %v8236_v12 }
 0x51f   :  { %6940 = vmatprep.subr.bf16.mxu1 %v8242_v21 }
 0x522   :  { %6942 = vmatpush1.bf16.msra.mxu1 %v8248_v2 }
 0x523   :  { %6944 = vmatprep.subr.bf16.mxu1 %v8254_v56  ;;  %v8436_v56 = vsel %vm3019_vm7, 1.0, %v9052_v55  ;;  %vm3197_vm7 = vcmp.eq.s32.totalorder %v9115_v23, %v3195_v33 }
 0x524   :  { %vm3199_vm6 = vmand %vm8355_vm9, %vm3197_vm7 }
 0x525   :  { %v8469_v16 = vsel %vm3199_vm6, 1.0, %v9052_v55 }
 0x526   :  { %6946 = vmatpush1.bf16.msra.mxu1 %v8260_v39  ;;  %v8456_v39 = vsel %vm3198_vm14, 1.0, %v9052_v55 }
 0x529   :  { %3671 = vmatmul.mubr.f32.vlgmr.msra.gmra.mrb[34].mxu1 %v8290_v36 }
 0x52a   :  { %3676 = vmatprep.mubr.f32.mxu1 %v9052_v55 }
 0x52d   :  { %3677 = vmatmul.mubr.f32.gmra.mrb[36].mxu1 %v8297_v53 }
 0x52e   :  { %4486 = vmatprep.mubr.f32.mxu1 %v9052_v55 }
 0x57c   :  { %v2412_v35 = vpop.f32.mrb[14].mxu0  ;;  %v2489_v19 = vpop.f32.mrb[18].mxu1 }
 0x57d   :  { %v2414_v49 = vpop.f32.mrb[15].mxu0  ;;  %v2491_v8 = vpop.f32.mrb[19].mxu1 }
 0x580   :  { %v2418_v31 = vpop.f32.mrb[16].mxu0  ;;  %v2495_v60 = vpop.f32.mrb[20].mxu1 }
 0x581   :  { %v6791_v61 = vpack.c.bf16 %v2418_v31, %v2412_v35  ;;  %v6795_v10 = vpack.c.bf16 %v2495_v60, %v2489_v19  ;;  %v2420_v18 = vpop.f32.mrb[17].mxu0  ;;  %v2497_v20 = vpop.f32.mrb[21].mxu1  ;;  %v9122_v31 = vld [vmem:[#allocation18_spill] sm:$0xff]  ;;  %v9123_v60 = vld [vmem:[#allocation20_spill] sm:$0xff] }
 0x582   :  { %v6787_v51 = vpack.c.bf16 %v2420_v18, %v2414_v49  ;;  %v6799_v27 = vpack.c.bf16 %v2497_v20, %v2491_v8  ;;  %v9120_v8 = vld [vmem:[#allocation15_spill] sm:$0xff]  ;;  %v9126_v18 = vld [vmem:[#allocation26_spill] sm:$0xff]  ;;  %v9127_v20 = vld [vmem:[#allocation28_spill] sm:$0xff] }
 0x584   :  { %6788 = vmatprep.subr.bf16.mxu0 %v6787_v51 }
 0x585   :  { %6790 = vmatpush3.bf16.msra.mxu0 %v6787_v51 }
 0x586   :  { %6792 = vmatprep.subr.bf16.mxu0 %v6791_v61 }
 0x588   :  { %6140 = vmatmul.mubr.msk.f32.vlgmr.msra.gmra.mrb[22].mxu0 %vm2672_vm3, %v8368_v13 }
 0x589   :  { %6794 = vmatpush3.bf16.msra.mxu0 %v6791_v61  ;;  %6146 = vmatprep.mubr.msk.f32.mxu0 %vm2672_vm3, %v8371_v38  ;;  %v9124_v61 = vld [vmem:[#allocation22_spill] sm:$0xff] }
 0x58a   :  { %6796 = vmatprep.subr.bf16.mxu0 %v6795_v10 }
 0x590   :  { %6147 = vmatmul.mubr.msk.f32.vlgmr.msra.gmra.mrb[22].mxu0 %vm2672_vm3, %v8385_v17 }
 0x591   :  { %6798 = vmatpush3.bf16.msra.mxu0 %v6795_v10  ;;  %6153 = vmatprep.mubr.msk.f32.mxu0 %vm2672_vm3, %v8388_v25  ;;  %v9125_v10 = vld [vmem:[#allocation24_spill] sm:$0xff] }
 0x592   :  { %6800 = vmatprep.subr.bf16.mxu0 %v6799_v27 }
 0x598   :  { %6154 = vmatmul.mubr.msk.f32.vlgmr.msra.gmra.mrb[22].mxu0 %vm2672_vm3, %v8402_v58 }
 0x599   :  { %6802 = vmatpush3.bf16.msra.mxu0 %v6799_v27  ;;  %6160 = vmatprep.mubr.msk.f32.mxu0 %vm2672_vm3, %v8405_v9 }
 0x59c   :  { %v2566_v5 = vpop.f32.mrb[18].mxu0  ;;  %v2643_v22 = vpop.f32.mrb[22].mxu1 }
 0x59d   :  { %v2568_v30 = vpop.f32.mrb[19].mxu0  ;;  %v2645_v7 = vpop.f32.mrb[23].mxu1 }
 0x5a0   :  { %v2572_v57 = vpop.f32.mrb[20].mxu0  ;;  %v2649_v41 = vpop.f32.mrb[24].mxu1  ;;  %6161 = vmatmul.mubr.msk.f32.vlgmr.msra.gmra.mrb[22].mxu0 %vm2672_vm3, %v8419_v44 }
 0x5a1   :  { %v6803_v45 = vpack.c.bf16 %v2572_v57, %v2566_v5  ;;  %v6811_v12 = vpack.c.bf16 %v2649_v41, %v2643_v22  ;;  %v2574_v21 = vpop.f32.mrb[21].mxu0  ;;  %v2651_v48 = vpop.f32.mrb[25].mxu1  ;;  %6167 = vmatprep.mubr.msk.f32.mxu0 %vm2672_vm3, %v8422_v50  ;;  %v4359_v22 = vld [vmem:[#allocation7 + $0x18] sm:$0xff]  ;;  %v4362_v41 = vld [vmem:[#allocation7 + $0x30] sm:$0xff] }
 0x5a2   :  { %v6807_v3 = vpack.c.bf16 %v2574_v21, %v2568_v30  ;;  %v6815_v2 = vpack.c.bf16 %v2651_v48, %v2645_v7  ;;  %v8547_v30 = vpack.c.bf16 %v4363_v37, %v4359_v22  ;;  %v4357_v7 = vld [vmem:[#allocation7 + $0x8] sm:$0xff]  ;;  %v4392_v22 = vld [vmem:[#allocation7 + $0x120] sm:$0xff] }
 0x5a3   :  { %6804 = vmatprep.subr.bf16.mxu0 %v6803_v45 }
 0x5a4   :  { %6806 = vmatpush3.bf16.msra.mxu0 %v6803_v45  ;;  %v4356_v45 = vld [vmem:[#allocation7] sm:$0xff] }
 0x5a5   :  { %6808 = vmatprep.subr.bf16.mxu0 %v6807_v3 }
 0x5a8   :  { %6168 = vmatmul.mubr.msk.f32.vlgmr.msra.gmra.mrb[22].mxu0 %vm2672_vm3, %v8436_v56 }
 0x5a9   :  { %6810 = vmatpush3.bf16.msra.mxu0 %v6807_v3  ;;  %6174 = vmatprep.mubr.msk.f32.mxu0 %vm2672_vm3, %v8439_v24  ;;  %v4367_v3 = vld [vmem:[#allocation7 + $0x58] sm:$0xff] }
 0x5aa   :  { %6812 = vmatprep.subr.bf16.mxu0 %v6811_v12 }
 0x5b0   :  { %6175 = vmatmul.mubr.msk.f32.vlgmr.msra.gmra.mrb[22].mxu0 %vm2672_vm3, %v8453_v0 }
 0x5b1   :  { %6814 = vmatpush3.bf16.msra.mxu0 %v6811_v12  ;;  %6181 = vmatprep.mubr.msk.f32.mxu0 %vm2672_vm3, %v8456_v39  ;;  %v4360_v12 = vld [vmem:[#allocation7 + $0x20] sm:$0xff] }
 0x5b2   :  { %6816 = vmatprep.subr.bf16.mxu0 %v6815_v2  ;;  %v8554_v48 = vpack.c.bf16 %v4360_v12, %v4356_v45  ;;  %v4397_v45 = vld [vmem:[#allocation7 + $0x148] sm:$0xff] }
 0x5b3   :  { %v4401_v12 = vld [vmem:[#allocation7 + $0x168] sm:$0xff] }
 0x5b8   :  { %6182 = vmatmul.mubr.msk.f32.vlgmr.msra.gmra.mrb[22].mxu0 %vm2672_vm3, %v8469_v16 }
 0x5b9   :  { %6818 = vmatpush3.bf16.msra.mxu0 %v6815_v2  ;;  %6188 = vmatprep.mubr.msk.f32.mxu0 %vm2672_vm3, %v8472_v26  ;;  %v4371_v2 = vld [vmem:[#allocation7 + $0x78] sm:$0xff] }
 0x5ba   :  { %6884 = vmatprep.subr.bf16.mxu0 %v9118_v54  ;;  %v8559_v33 = vpack.c.bf16 %v4371_v2, %v4367_v3  ;;  %v4398_v3 = vld [vmem:[#allocation7 + $0x150] sm:$0xff]  ;;  %v8609_v2 = vpack.c.bf16 %v4401_v12, %v4397_v45 }
 0x5bc   :  { %v3441_v6 = vpop.f32.mrb[26].mxu1 }
 0x5bd   :  { %v3443_v40 = vpop.f32.mrb[27].mxu1 }
 0x5c0   :  { %v3447_v47 = vpop.f32.mrb[28].mxu1  ;;  %6189 = vmatmul.mubr.msk.f32.vlgmr.msra.gmra.mrb[22].mxu0 %vm2672_vm3, %v8483_v29 }
 0x5c1   :  { %v6951_v35 = vpack.c.bf16 %v3447_v47, %v3441_v6  ;;  %v3449_v19 = vpop.f32.mrb[29].mxu1  ;;  %6886 = vmatpush1.bf16.msra.mxu0 %v9119_v63  ;;  %3593 = vmatprep.mubr.f32.mxu0 %v9052_v55  ;;  %v4374_v63 = vld [vmem:[#allocation7 + $0x90] sm:$0xff] }
 0x5c2   :  { %v6947_v49 = vpack.c.bf16 %v3449_v19, %v3443_v40  ;;  %6888 = vmatprep.subr.bf16.mxu0 %v9120_v8  ;;  %v4375_v40 = vld [vmem:[#allocation7 + $0x98] sm:$0xff]  ;;  %v4377_v19 = vld [vmem:[#allocation7 + $0xa8] sm:$0xff]  ;;  %v4378_v8 = vld [vmem:[#allocation7 + $0xb0] sm:$0xff] }
 0x5c5   :  { %6890 = vmatpush1.bf16.msra.mxu0 %v9121_v1  ;;  %v4372_v1 = vld [vmem:[#allocation7 + $0x80] sm:$0xff] }
 0x5c6   :  { %6892 = vmatprep.subr.bf16.mxu0 %v9122_v31  ;;  %v4376_v31 = vld [vmem:[#allocation7 + $0xa0] sm:$0xff] }
 0x5c9   :  { %6894 = vmatpush1.bf16.msra.mxu0 %v9123_v60  ;;  %v8576_v60 = vpack.c.bf16 %v4378_v8, %v4374_v63  ;;  %v4406_v63 = vld [vmem:[#allocation7 + $0x190] sm:$0xff] }
 0x5ca   :  { %6896 = vmatprep.subr.bf16.mxu0 %v9124_v61  ;;  %v8578_v61 = vpack.c.bf16 %v4376_v31, %v4372_v1  ;;  %v4410_v1 = vld [vmem:[#allocation7 + $0x1b0] sm:$0xff]  ;;  %v4404_v31 = vld [vmem:[#allocation7 + $0x180] sm:$0xff] }
 0x5cd   :  { %6898 = vmatpush1.bf16.msra.mxu0 %v9125_v10  ;;  %v4383_v10 = vld [vmem:[#allocation7 + $0xd8] sm:$0xff] }
 0x5ce   :  { %6900 = vmatprep.subr.bf16.mxu0 %v9126_v18  ;;  %v4387_v18 = vld [vmem:[#allocation7 + $0xf8] sm:$0xff] }
 0x5d1   :  { %6902 = vmatpush1.bf16.msra.mxu0 %v9127_v20  ;;  %v8583_v20 = vpack.c.bf16 %v4387_v18, %v4383_v10  ;;  %v4408_v10 = vld [vmem:[#allocation7 + $0x1a0] sm:$0xff]  ;;  %v8624_v18 = vpack.c.bf16 %v4410_v1, %v4406_v63 }
 0x5d2   :  { %6904 = vmatprep.subr.bf16.mxu0 %v8228_v4 }
 0x5d5   :  { %6906 = vmatpush1.bf16.msra.mxu0 %v8234_v52 }
 0x5d6   :  { %6908 = vmatprep.subr.bf16.mxu0 %v8240_v42 }
 0x5d9   :  { %6910 = vmatpush1.bf16.msra.mxu0 %v8246_v11 }
 0x5da   :  { %6912 = vmatprep.subr.bf16.mxu0 %v8252_v32 }
 0x5dc   :  { %v3518_v51 = vpop.f32.mrb[30].mxu1 }
 0x5dd   :  { %v3520_v27 = vpop.f32.mrb[31].mxu1  ;;  %6914 = vmatpush1.bf16.msra.mxu0 %v8258_v46 }
 0x5de   :  { %6948 = vmatprep.subr.bf16.mxu0 %v6947_v49 }
 0x5e0   :  { %v3524_v15 = vpop.f32.mrb[32].mxu1  ;;  %3594 = vmatmul.mubr.f32.vlgmr.msra.gmra.mrb[24].mxu0 %v8290_v36 }
 0x5e1   :  { %v6955_v59 = vpack.c.bf16 %v3524_v15, %v3518_v51  ;;  %v3526_v62 = vpop.f32.mrb[33].mxu1  ;;  %6950 = vmatpush3.bf16.msra.mxu0 %v6947_v49  ;;  %3599 = vmatprep.mubr.f32.mxu0 %v9052_v55  ;;  %v4381_v51 = vld [vmem:[#allocation7 + $0xc8] sm:$0xff]  ;;  %v4382_v15 = vld [vmem:[#allocation7 + $0xd0] sm:$0xff] }
 0x5e2   :  { %v6959_v4 = vpack.c.bf16 %v3526_v62, %v3520_v27  ;;  %6952 = vmatprep.subr.bf16.mxu0 %v6951_v35  ;;  %v4385_v27 = vld [vmem:[#allocation7 + $0xe8] sm:$0xff]  ;;  %v4386_v62 = vld [vmem:[#allocation7 + $0xf0] sm:$0xff] }
 0x5e4   :  { %3600 = vmatmul.mubr.f32.gmra.mrb[26].mxu0 %v8297_v53 }
 0x5e5   :  { %6195 = vmatprep.mubr.msk.f32.mxu0 %vm2672_vm3, %v8322_v34 }
 0x5e8   :  { %6196 = vmatmul.mubr.msk.f32.vlgmr.msra.gmra.mrb[28].mxu0 %vm2672_vm3, %v8368_v13 }
 0x5e9   :  { %6954 = vmatpush3.bf16.msra.mxu0 %v6951_v35  ;;  %6202 = vmatprep.mubr.msk.f32.mxu0 %vm2672_vm3, %v8371_v38  ;;  %v4373_v35 = vld [vmem:[#allocation7 + $0x88] sm:$0xff] }
 0x5ea   :  { %6956 = vmatprep.subr.bf16.mxu0 %v6955_v59  ;;  %v8573_v49 = vpack.c.bf16 %v4377_v19, %v4373_v35  ;;  %v4405_v35 = vld [vmem:[#allocation7 + $0x188] sm:$0xff] }
 0x5eb   :  { %v4409_v19 = vld [vmem:[#allocation7 + $0x1a8] sm:$0xff] }
 0x5ec   :  { %v8621_v8 = vpack.c.bf16 %v4409_v19, %v4405_v35 }
 0x5f0   :  { %6203 = vmatmul.mubr.msk.f32.vlgmr.msra.gmra.mrb[28].mxu0 %vm2672_vm3, %v8385_v17 }
 0x5f1   :  { %6958 = vmatpush3.bf16.msra.mxu0 %v6955_v59  ;;  %6209 = vmatprep.mubr.msk.f32.mxu0 %vm2672_vm3, %v8388_v25  ;;  %v8585_v59 = vpack.c.bf16 %v4385_v27, %v4381_v51  ;;  %v8626_v51 = vpack.c.bf16 %v4408_v10, %v4404_v31  ;;  %v4415_v27 = vld [vmem:[#allocation7 + $0x1d8] sm:$0xff] }
 0x5f2   :  { %6960 = vmatprep.subr.bf16.mxu0 %v6959_v4 }
 0x5f8   :  { %6210 = vmatmul.mubr.msk.f32.vlgmr.msra.gmra.mrb[28].mxu0 %vm2672_vm3, %v8402_v58 }
 0x5f9   :  { %6962 = vmatpush3.bf16.msra.mxu0 %v6959_v4  ;;  %6216 = vmatprep.mubr.msk.f32.mxu0 %vm2672_vm3, %v8405_v9  ;;  %v4380_v4 = vld [vmem:[#allocation7 + $0xc0] sm:$0xff] }
 0x5fc   :  { %v3672_v52 = vpop.f32.mrb[34].mxu1 }
 0x5fd   :  { %v3674_v42 = vpop.f32.mrb[35].mxu1 }
 0x600   :  { %v3678_v11 = vpop.f32.mrb[36].mxu1  ;;  %6217 = vmatmul.mubr.msk.f32.vlgmr.msra.gmra.mrb[28].mxu0 %vm2672_vm3, %v8419_v44  ;;  %v4361_v44 = vld [vmem:[#allocation7 + $0x28] sm:$0xff] }
 0x601   :  { %v6971_v32 = vpack.c.bf16 %v3678_v11, %v3672_v52  ;;  %v3680_v46 = vpop.f32.mrb[37].mxu1  ;;  %6223 = vmatprep.mubr.msk.f32.mxu0 %vm2672_vm3, %v8422_v50  ;;  %v4358_v50 = vld [vmem:[#allocation7 + $0x10] sm:$0xff]  ;;  %v8549_v57 = vpack.c.bf16 %v4361_v44, %v4357_v7  ;;  %v4384_v52 = vld [vmem:[#allocation7 + $0xe0] sm:$0xff]  ;;  %v4399_v44 = vld [vmem:[#allocation7 + $0x158] sm:$0xff] }
 0x602   :  { %v6975_v36 = vpack.c.bf16 %v3680_v46, %v3674_v42  ;;  %v8552_v21 = vpack.c.bf16 %v4362_v41, %v4358_v50  ;;  %v8588_v42 = vpack.c.bf16 %v4386_v62, %v4382_v15  ;;  %v8590_v11 = vpack.c.bf16 %v4384_v52, %v4380_v4  ;;  %v4395_v46 = vld [vmem:[#allocation7 + $0x138] sm:$0xff]  ;;  %v4413_v4 = vld [vmem:[#allocation7 + $0x1c8] sm:$0xff] }
 0x603   :  { %6980 = vmatprep.subr.bf16.mxu1 %v8549_v57  ;;  %v4403_v50 = vld [vmem:[#allocation7 + $0x178] sm:$0xff]  ;;  %v4417_v52 = vld [vmem:[#allocation7 + $0x1e8] sm:$0xff] }
 0x604   :  { %6982 = vmatpush1.bf16.msra.mxu1 %v8554_v48  ;;  %v8607_v41 = vpack.c.bf16 %v4403_v50, %v4399_v44  ;;  %v4419_v15 = vld [vmem:[#allocation7 + $0x1f8] sm:$0xff] }
 0x605   :  { %v8631_v62 = vpack.c.bf16 %v4419_v15, %v4415_v27 }
 0x693   :  { %v8524_v53 = vpop.f32.mrb[22].mxu0 }
 0x694   :  { %v8526_v34 = vpop.f32.mrb[23].mxu0 }
 0x695   :  { %v8530_v13 = vadd.f32 %v8524_v53, %v8526_v34 }
 0x6b3   :  { %v3595_v38 = vpop.f32.mrb[24].mxu0 }
 0x6b4   :  { %v3597_v17 = vpop.f32.mrb[25].mxu0 }
 0x6b7   :  { %v3601_v25 = vpop.f32.mrb[26].mxu0 }
 0x6b8   :  { %v6963_v58 = vpack.c.bf16 %v3601_v25, %v3595_v38  ;;  %v3603_v9 = vpop.f32.mrb[27].mxu0  ;;  %v4389_v38 = vld [vmem:[#allocation7 + $0x108] sm:$0xff]  ;;  %v4390_v25 = vld [vmem:[#allocation7 + $0x110] sm:$0xff] }
 0x6b9   :  { %v6967_v5 = vpack.c.bf16 %v3603_v9, %v3597_v17  ;;  %v4393_v17 = vld [vmem:[#allocation7 + $0x128] sm:$0xff]  ;;  %v4394_v9 = vld [vmem:[#allocation7 + $0x130] sm:$0xff] }
 0x6ba   :  { %6964 = vmatprep.subr.bf16.mxu0 %v6963_v58  ;;  %v8600_v37 = vpack.c.bf16 %v4394_v9, %v4390_v25  ;;  %v4416_v25 = vld [vmem:[#allocation7 + $0x1e0] sm:$0xff] }
 0x6bb   :  { %6966 = vmatpush3.bf16.msra.mxu0 %v6963_v58  ;;  %v8597_v58 = vpack.c.bf16 %v4393_v17, %v4389_v38  ;;  %v4418_v38 = vld [vmem:[#allocation7 + $0x1f0] sm:$0xff]  ;;  %v4412_v17 = vld [vmem:[#allocation7 + $0x1c0] sm:$0xff] }
 0x6bc   :  { %6968 = vmatprep.subr.bf16.mxu0 %v6967_v5 }
 0x6be   :  { %6224 = vmatmul.mubr.msk.f32.vlgmr.msra.gmra.mrb[28].mxu0 %vm2672_vm3, %v8436_v56  ;;  %v4365_v56 = vld [vmem:[#allocation7 + $0x48] sm:$0xff] }
 0x6bf   :  { %6970 = vmatpush3.bf16.msra.mxu0 %v6967_v5  ;;  %6230 = vmatprep.mubr.msk.f32.mxu0 %vm2672_vm3, %v8439_v24  ;;  %v4369_v24 = vld [vmem:[#allocation7 + $0x68] sm:$0xff]  ;;  %v4388_v5 = vld [vmem:[#allocation7 + $0x100] sm:$0xff] }
 0x6c0   :  { %6972 = vmatprep.subr.bf16.mxu0 %v6971_v32  ;;  %v8602_v7 = vpack.c.bf16 %v4392_v22, %v4388_v5  ;;  %v8638_v5 = vpack.c.bf16 %v4416_v25, %v4412_v17  ;;  %v4296_v22 = vrot.slane %v8530_v13, 4 }
 0x6c2   :  { %v4297_v44 = vadd.f32 %v4296_v22, %v8530_v13 }
 0x6c4   :  { %v4298_v12 = vrot.slane %v4297_v44, 2 }
 0x6c6   :  { %6231 = vmatmul.mubr.msk.f32.vlgmr.msra.gmra.mrb[28].mxu0 %vm2672_vm3, %v8453_v0  ;;  %v8561_v0 = vpack.c.bf16 %v4369_v24, %v4365_v56  ;;  %v4402_v56 = vld [vmem:[#allocation7 + $0x170] sm:$0xff]  ;;  %v4396_v24 = vld [vmem:[#allocation7 + $0x140] sm:$0xff] }
 0x6c7   :  { %6974 = vmatpush3.bf16.msra.mxu0 %v6971_v32  ;;  %6237 = vmatprep.mubr.msk.f32.mxu0 %vm2672_vm3, %v8456_v39  ;;  %v4370_v39 = vld [vmem:[#allocation7 + $0x70] sm:$0xff]  ;;  %v4391_v32 = vld [vmem:[#allocation7 + $0x118] sm:$0xff] }
 0x6c8   :  { %6976 = vmatprep.subr.bf16.mxu0 %v6975_v36  ;;  %v8564_v54 = vpack.c.bf16 %v4370_v39, %v4366_v28  ;;  %6984 = vmatprep.subr.bf16.mxu1 %v8561_v0  ;;  %v4400_v28 = vld [vmem:[#allocation7 + $0x160] sm:$0xff]  ;;  %v8612_v39 = vpack.c.bf16 %v4402_v56, %v4398_v3 }
 0x6ce   :  { %6238 = vmatmul.mubr.msk.f32.vlgmr.msra.gmra.mrb[28].mxu0 %vm2672_vm3, %v8469_v16  ;;  %v4364_v16 = vld [vmem:[#allocation7 + $0x40] sm:$0xff] }
 0x6cf   :  { %6978 = vmatpush3.bf16.msra.mxu0 %v6975_v36  ;;  %6244 = vmatprep.mubr.msk.f32.mxu0 %vm2672_vm3, %v8472_v26  ;;  %v4368_v26 = vld [vmem:[#allocation7 + $0x60] sm:$0xff]  ;;  %v8595_v36 = vpack.c.bf16 %v4395_v46, %v4391_v32  ;;  %v4414_v32 = vld [vmem:[#allocation7 + $0x1d0] sm:$0xff]  ;;  %v8633_v46 = vpack.c.bf16 %v4417_v52, %v4413_v4 }
 0x6d0   :  { %7012 = vmatprep.subr.bf16.mxu0 %v8547_v30  ;;  %v8566_v6 = vpack.c.bf16 %v4368_v26, %v4364_v16  ;;  %v8614_v16 = vpack.c.bf16 %v4400_v28, %v4396_v24  ;;  %v4407_v26 = vld [vmem:[#allocation7 + $0x198] sm:$0xff]  ;;  %v8636_v9 = vpack.c.bf16 %v4418_v38, %v4414_v32  ;;  %v4299_v24 = vadd.f32 %v4298_v12, %v4297_v44 }
 0x6d2   :  { %6986 = vmatpush1.bf16.msra.mxu1 %v8566_v6 }
 0x6d3   :  { %6988 = vmatprep.subr.bf16.mxu1 %v8573_v49 }
 0x6d6   :  { %6245 = vmatmul.mubr.msk.f32.vlgmr.msra.gmra.mrb[28].mxu0 %vm2672_vm3, %v8483_v29  ;;  %v4379_v29 = vld [vmem:[#allocation7 + $0xb8] sm:$0xff]  ;;  %6990 = vmatpush1.bf16.msra.mxu1 %v8578_v61 }
 0x6d7   :  { %4563 = vmatprep.mubr.f32.mxu0 %v9052_v55  ;;  %7014 = vmatpush1.bf16.msra.mxu0 %v8552_v21  ;;  %v8571_v47 = vpack.c.bf16 %v4379_v29, %v4375_v40  ;;  %v4411_v40 = vld [vmem:[#allocation7 + $0x1b8] sm:$0xff] }
 0x6d8   :  { %7016 = vmatprep.subr.bf16.mxu0 %v8559_v33  ;;  %6992 = vmatprep.subr.bf16.mxu1 %v8585_v59  ;;  %v8619_v29 = vpack.c.bf16 %v4411_v40, %v4407_v26  ;;  %v4300_v40 = vrot.slane %v4299_v24, 1 }
 0x6da   :  { %6994 = vmatpush1.bf16.msra.mxu1 %v8590_v11  ;;  %v4301_v63 = vadd.f32 %v4300_v40, %v4299_v24 }
 0x6db   :  { %7018 = vmatpush1.bf16.msra.mxu0 %v8564_v54  ;;  %6996 = vmatprep.subr.bf16.mxu1 %v8597_v58 }
 0x6dc   :  { %7020 = vmatprep.subr.bf16.mxu0 %v8571_v47 }
 0x6de   :  { %6998 = vmatpush1.bf16.msra.mxu1 %v8602_v7 }
 0x6df   :  { %7022 = vmatpush1.bf16.msra.mxu0 %v8576_v60  ;;  %7000 = vmatprep.subr.bf16.mxu1 %v8609_v2 }
 0x6e0   :  { %7024 = vmatprep.subr.bf16.mxu0 %v8583_v20 }
 0x6e2   :  { %7002 = vmatpush1.bf16.msra.mxu1 %v8614_v16 }
 0x6e3   :  { %7026 = vmatpush1.bf16.msra.mxu0 %v8588_v42  ;;  %7004 = vmatprep.subr.bf16.mxu1 %v8621_v8 }
 0x6e4   :  { %7028 = vmatprep.subr.bf16.mxu0 %v8595_v36 }
 0x6e6   :  { %7006 = vmatpush1.bf16.msra.mxu1 %v8626_v51 }
 0x6e7   :  { %7030 = vmatpush1.bf16.msra.mxu0 %v8600_v37  ;;  %7008 = vmatprep.subr.bf16.mxu1 %v8633_v46 }
 0x6e8   :  { %7032 = vmatprep.subr.bf16.mxu0 %v8607_v41 }
 0x6ea   :  { %7010 = vmatpush1.bf16.msra.mxu1 %v8638_v5 }
 0x6eb   :  { %7034 = vmatpush1.bf16.msra.mxu0 %v8612_v39 }
 0x6ec   :  { %7036 = vmatprep.subr.bf16.mxu0 %v8619_v29 }
 0x6ef   :  { %7038 = vmatpush1.bf16.msra.mxu0 %v8624_v18 }
 0x6f0   :  { %7040 = vmatprep.subr.bf16.mxu0 %v8631_v62 }
 0x6f3   :  { %7042 = vmatpush1.bf16.msra.mxu0 %v8636_v9 }
 0x6f4   :  { %7060 = vmatprep.subr.bf16.mxu0 %v8549_v57 }
 0x7a9   :  { %v6246_v50 = vpop.f32.mrb[28].mxu0 }
 0x7aa   :  { %v4284_v45 = vpop.f32.mrb[29].mxu0 }
 0x7ab   :  { %v4303_v3 = vadd.f32 %v6246_v50, %v4284_v45 }
 0x7ad   :  { %v4304_v56 = vrot.slane %v4303_v3, 4 }
 0x7af   :  { %v4305_v28 = vadd.f32 %v4304_v56, %v4303_v3 }
 0x7b1   :  { %v4306_v26 = vrot.slane %v4305_v28, 2 }
 0x7b3   :  { %v4307_v35 = vadd.f32 %v4306_v26, %v4305_v28 }
 0x7b5   :  { %v4308_v19 = vrot.slane %v4307_v35, 1 }
 0x7b7   :  { %v4309_v1 = vadd.f32 %v4308_v19, %v4307_v35 }
 0x7b9   :  { %v4310_v31 = vadd.f32 %v4309_v1, %v4301_v63 }
 0x7bb   :  { %v4311_v10 = vmul.f32 0.033333335, %v4310_v31  ;;  %v2344_v31 = vld [vmem:[%s8948_s5 + $0x4] ss:$0 sm:$0xff] }
 0x7bd   :  { %v4312_v57 = vsub.f32 %v8526_v34, %v4311_v10  ;;  %v4313_v27 = vsub.f32 %v8524_v53, %v4311_v10  ;;  %v4316_v13 = vsub.f32 %v4284_v45, %v4311_v10  ;;  %v4317_v15 = vsub.f32 %v6246_v50, %v4311_v10 }
 0x7bf   :  { %v4315_v4 = vsel %vm2656_vm4, %v4313_v27, 0.0  ;;  %v4319_v52 = vsel %vm2656_vm4, %v4317_v15, 0.0  ;;  %v4320_v32 = vmul.f32 %v4312_v57, %v4312_v57  ;;  %v4330_v38 = vmul.f32 %v4316_v13, %v4316_v13  ;;  %v2345_v15 = vld [vmem:[%s8948_s5 + $0x5] ss:$0 sm:$0xff] }
 0x7c0   :  { %v4321_v17 = vmul.f32 %v4315_v4, %v4315_v4  ;;  %v4331_v25 = vmul.f32 %v4319_v52, %v4319_v52  ;;  %vm4578_vm4 = vcmp.lt.s32.totalorder %v7887_v43, 15 }
 0x7c1   :  { %vm4599_vm9 = vmand %vm4578_vm4, %vm1361_vm8 }
 0x7c2   :  { %v4322_v22 = vadd.f32 %v4321_v17, %v4320_v32  ;;  %v4332_v44 = vadd.f32 %v4331_v25, %v4330_v38  ;;  %vm4600_vm7 = vmand %vm4578_vm4, %vm1362_vm12 }
 0x7c3   :  { %vm4589_vm15 = vmand %vm4578_vm4, %vm1355_vm13 }
 0x7c4   :  { %v4323_v12 = vrot.slane %v4322_v22, 4  ;;  %v4333_v3 = vrot.slane %v4332_v44, 4 }
 0x7c6   :  { %v4324_v56 = vadd.f32 %v4323_v12, %v4322_v22  ;;  %v4334_v34 = vadd.f32 %v4333_v3, %v4332_v44 }
 0x7c8   :  { %v4325_v24 = vrot.slane %v4324_v56, 2  ;;  %v4335_v53 = vrot.slane %v4334_v34, 2 }
 0x7ca   :  { %v4326_v45 = vadd.f32 %v4325_v24, %v4324_v56  ;;  %v4336_v50 = vadd.f32 %v4335_v53, %v4334_v34  ;;  %v8723_v24 = vsel %vm4600_vm7, 1.0, %v9052_v55  ;;  %vm4803_vm7 = vmand %vm4578_vm4, %vm1530_vm2 }
 0x7cc   :  { %v4327_v28 = vrot.slane %v4326_v45, 1  ;;  %v4337_v26 = vrot.slane %v4336_v50, 1 }
 0x7ce   :  { %v4328_v40 = vadd.f32 %v4327_v28, %v4326_v45  ;;  %v4338_v35 = vadd.f32 %v4337_v26, %v4336_v50  ;;  %v9131_v45 = vld [vmem:[#allocation47_spill] sm:$0xff]  ;;  %v8750_v28 = vsel %vm4589_vm15, 1.0, %v9052_v55 }
 0x7d0   :  { %v4339_v19 = vadd.f32 %v4338_v35, %v4328_v40  ;;  %v9132_v35 = vld [vmem:[#allocation48_spill] sm:$0xff] }
 0x7d2   :  { %v4340_v63 = vmul.f32 0.033333335, %v4339_v19 }
 0x7d4   :  { %v4341_v1 = vadd.f32 1e-05, %v4340_v63  ;;  %v4807_v63 = vsel %vm4803_vm7, 1.0, %v9052_v55 }
 0x7d6   :  { %7285 = vrsqrt.f32 %v4341_v1 }
 0x7e0   :  { %v7286_v10 = vpop.eup %7285 }
 0x7e1   :  { %v4343_v27 = vmul.f32 %v7286_v10, %v2344_v31  ;;  %v9133_v10 = vld [vmem:[#allocation49_spill] sm:$0xff] }
 0x7e2   :  { %vm9134_vm15 = vcmp.eq.s32.totalorder %v7753_v14, %v9133_v10 }
 0x7e3   :  { %v4350_v32 = vmul.f32 %v4343_v27, %v4316_v13  ;;  %v4344_v38 = vmul.f32 %v4343_v27, %v4312_v57  ;;  %v4345_v17 = vmul.f32 %v4343_v27, %v4315_v4  ;;  %v4351_v25 = vmul.f32 %v4343_v27, %v4319_v52 }
 0x7e5   :  { %v4346_v22 = vadd.f32 %v4344_v38, %v2345_v15  ;;  %v4347_v12 = vadd.f32 %v4345_v17, %v2345_v15 }
 0x7e7   :  { %v4348_v44 = vmax.f32 %v4346_v22, 0.0  ;;  %v4349_v3 = vmax.f32 %v4347_v12, 0.0  ;;  %v5621_v12 = vld [vmem:[#allocation9 + $0x18] sm:$0xff] }
 0x7e9   :  { %4487 = vmatmul.mubr.f32.vlgmr.msra.gmra.mrb[38].mxu1 %v4348_v44  ;;  %4564 = vmatmul.mubr.f32.vlgmr.msra.gmra.mrb[30].mxu0 %v4348_v44  ;;  %v5620_v44 = vld [vmem:[#allocation9 + $0x10] sm:$0xff] }
 0x7ea   :  { %7062 = vmatpush1.bf16.msra.mxu0 %v8554_v48  ;;  %4492 = vmatprep.mubr.f32.mxu1 %v9052_v55  ;;  %v8674_v48 = vadd.f32 %v4350_v32, %v2345_v15 }
 0x7eb   :  { %4569 = vmatprep.mubr.f32.mxu0 %v9052_v55  ;;  %7064 = vmatprep.subr.bf16.mxu0 %v8561_v0 }
 0x7ec   :  { %v4354_v0 = vmax.f32 %v8674_v48, 0.0  ;;  %v5622_v48 = vld [vmem:[#allocation9 + $0x20] sm:$0xff] }
 0x7ed   :  { %4493 = vmatmul.mubr.f32.gmra.mrb[40].mxu1 %v4349_v3  ;;  %4570 = vmatmul.mubr.f32.gmra.mrb[32].mxu0 %v4349_v3  ;;  %v7143_v3 = vpack.c.bf16 %v5621_v12, %v5620_v44 }
 0x7ee   :  { %7066 = vmatpush1.bf16.msra.mxu0 %v8566_v6  ;;  %5087 = vmatprep.mubr.f32.mxu0 %v9052_v55  ;;  %v8679_v6 = vadd.f32 %v4351_v25, %v2345_v15 }
 0x7ef   :  { %7068 = vmatprep.subr.bf16.mxu0 %v8573_v49 }
 0x7f0   :  { %v4355_v49 = vmax.f32 %v8679_v6, 0.0 }
 0x7f2   :  { %7070 = vmatpush1.bf16.msra.mxu0 %v8578_v61  ;;  %v9128_v61 = vld [vmem:[#allocation45_spill] sm:$0xff] }
 0x7f3   :  { %7072 = vmatprep.subr.bf16.mxu0 %v8585_v59  ;;  %v4603_v59 = vsel %vm4599_vm9, 1.0, %v9052_v55  ;;  %vm4590_vm9 = vmand %vm4578_vm4, %vm1356_vm1 }
 0x7f4   :  { %6251 = vmatprep.mubr.msk.f32.mxu1 %vm2672_vm3, %v4603_v59  ;;  %v4594_v26 = vsel %vm4590_vm9, 1.0, %v9052_v55 }
 0x7f6   :  { %7074 = vmatpush1.bf16.msra.mxu0 %v8590_v11  ;;  %v8697_v11 = vadd.s32 16, %v7753_v14 }
 0x7f7   :  { %7076 = vmatprep.subr.bf16.mxu0 %v8597_v58 }
 0x7f8   :  { %vm4597_vm14 = vcmp.eq.s32.totalorder %v8697_v11, %v9128_v61  ;;  %vm4587_vm0 = vcmp.eq.s32.totalorder %v8697_v11, %v9131_v45  ;;  %vm4912_vm9 = vcmp.eq.s32.totalorder %v8697_v11, %v9133_v10 }
 0x7f9   :  { %vm4601_vm10 = vmand %vm4578_vm4, %vm4597_vm14 }
 0x7fa   :  { %7078 = vmatpush1.bf16.msra.mxu0 %v8602_v7  ;;  %v8726_v53 = vsel %vm4601_vm10, 1.0, %v9052_v55  ;;  %vm4591_vm13 = vmand %vm4578_vm4, %vm4587_vm0  ;;  %vm4801_vm10 = vcmp.eq.s32.totalorder %v8697_v11, %v9132_v35  ;;  %v5626_v11 = vld [vmem:[#allocation9 + $0x40] sm:$0xff] }
 0x7fb   :  { %7080 = vmatprep.subr.bf16.mxu0 %v8609_v2  ;;  %v8700_v2 = vadd.s32 24, %v7753_v14  ;;  %v8762_v40 = vsel %vm4591_vm13, 1.0, %v9052_v55  ;;  %vm4805_vm2 = vmand %vm4578_vm4, %vm4801_vm10  ;;  %vm9135_vm13 = vcmp.eq.s32.totalorder %v9115_v23, %v9133_v10 }
 0x7fc   :  { %v8793_v31 = vsel %vm4805_vm2, 1.0, %v9052_v55  ;;  %vm4914_vm0 = vmand %vm4578_vm4, %vm9134_vm15 }
 0x7fd   :  { %vm4582_vm8 = vcmp.lt.s32.totalorder %v8700_v2, 30  ;;  %vm4598_vm12 = vcmp.eq.s32.totalorder %v8700_v2, %v9128_v61  ;;  %vm4588_vm14 = vcmp.eq.s32.totalorder %v8700_v2, %v9131_v45  ;;  %v8817_v14 = vsel %vm4914_vm0, 1.0, %v9052_v55  ;;  %v5625_v61 = vld [vmem:[#allocation9 + $0x38] sm:$0xff] }
 0x7fe   :  { %7082 = vmatpush1.bf16.msra.mxu0 %v8614_v16  ;;  %vm8716_vm6 = vmand %vm4578_vm4, %vm4582_vm8  ;;  %vm4913_vm7 = vcmp.eq.s32.totalorder %v8700_v2, %v9133_v10 }
 0x7ff   :  { %7084 = vmatprep.subr.bf16.mxu0 %v8621_v8  ;;  %vm4602_vm11 = vmand %vm8716_vm6, %vm4598_vm12 }
 0x800   :  { %v8742_v50 = vsel %vm4602_vm11, 1.0, %v9052_v55  ;;  %vm4592_vm1 = vmand %vm8716_vm6, %vm4588_vm14  ;;  %vm4802_vm11 = vcmp.eq.s32.totalorder %v8700_v2, %v9132_v35 }
 0x801   :  { %v4596_v19 = vsel %vm4592_vm1, 1.0, %v9052_v55  ;;  %vm4804_vm12 = vmand %vm4578_vm4, %vm1531_vm5 }
 0x802   :  { %7086 = vmatpush1.bf16.msra.mxu0 %v8626_v51  ;;  %v8790_v1 = vsel %vm4804_vm12, 1.0, %v9052_v55  ;;  %vm4806_vm5 = vmand %vm8716_vm6, %vm4802_vm11 }
 0x803   :  { %7088 = vmatprep.subr.bf16.mxu0 %v8633_v46  ;;  %v8809_v27 = vsel %vm4806_vm5, 1.0, %v9052_v55  ;;  %vm4915_vm14 = vmand %vm4578_vm4, %vm9135_vm13 }
 0x804   :  { %vm4916_vm1 = vmand %vm4578_vm4, %vm4912_vm9  ;;  %v8829_v23 = vsel %vm4915_vm14, 1.0, %v9052_v55 }
 0x805   :  { %v8832_v38 = vsel %vm4916_vm1, 1.0, %v9052_v55  ;;  %vm4917_vm4 = vmand %vm8716_vm6, %vm4913_vm7 }
 0x806   :  { %7090 = vmatpush1.bf16.msra.mxu0 %v8638_v5  ;;  %v4921_v25 = vsel %vm4917_vm4, 1.0, %v9052_v55 }
 0x809   :  { %5088 = vmatmul.mubr.f32.vlgmr.msra.gmra.mrb[34].mxu0 %v4354_v0 }
 0x80a   :  { %5093 = vmatprep.mubr.f32.mxu0 %v9052_v55 }
 0x80d   :  { %5094 = vmatmul.mubr.f32.gmra.mrb[36].mxu0 %v4355_v49 }
 0x80e   :  { %6291 = vmatprep.mubr.msk.f32.mxu0 %vm2672_vm3, %v4603_v59 }
 0x8bc   :  { %v4488_v58 = vpop.f32.mrb[38].mxu1  ;;  %v4565_v7 = vpop.f32.mrb[30].mxu0 }
 0x8bd   :  { %v4490_v16 = vpop.f32.mrb[39].mxu1  ;;  %v4567_v8 = vpop.f32.mrb[31].mxu0 }
 0x8c0   :  { %v4494_v51 = vpop.f32.mrb[40].mxu1  ;;  %v4571_v46 = vpop.f32.mrb[32].mxu0 }
 0x8c1   :  { %v7047_v5 = vpack.c.bf16 %v4494_v51, %v4488_v58  ;;  %v7051_v57 = vpack.c.bf16 %v4571_v46, %v4565_v7  ;;  %v4496_v13 = vpop.f32.mrb[41].mxu1  ;;  %v4573_v4 = vpop.f32.mrb[33].mxu0  ;;  %v5627_v58 = vld [vmem:[#allocation9 + $0x48] sm:$0xff]  ;;  %v5630_v46 = vld [vmem:[#allocation9 + $0x60] sm:$0xff] }
 0x8c2   :  { %v7043_v52 = vpack.c.bf16 %v4496_v13, %v4490_v16  ;;  %v7055_v56 = vpack.c.bf16 %v4573_v4, %v4567_v8  ;;  %v7155_v7 = vpack.c.bf16 %v5627_v58, %v5626_v11  ;;  %v5628_v16 = vld [vmem:[#allocation9 + $0x50] sm:$0xff]  ;;  %v5629_v8 = vld [vmem:[#allocation9 + $0x58] sm:$0xff] }
 0x8c3   :  { %v7159_v51 = vpack.c.bf16 %v5629_v8, %v5628_v16  ;;  %v5632_v13 = vld [vmem:[#allocation9 + $0x70] sm:$0xff]  ;;  %v5633_v4 = vld [vmem:[#allocation9 + $0x78] sm:$0xff] }
 0x8c4   :  { %7044 = vmatprep.subr.bf16.mxu1 %v7043_v52 }
 0x8c5   :  { %7046 = vmatpush3.bf16.msra.mxu1 %v7043_v52  ;;  %v7167_v52 = vpack.c.bf16 %v5633_v4, %v5632_v13 }
 0x8c6   :  { %7048 = vmatprep.subr.bf16.mxu1 %v7047_v5 }
 0x8c8   :  { %6252 = vmatmul.mubr.msk.f32.vlgmr.msra.gmra.mrb[42].mxu1 %vm2672_vm3, %v8723_v24 }
 0x8c9   :  { %7050 = vmatpush3.bf16.msra.mxu1 %v7047_v5  ;;  %6254 = vmatprep.mubr.msk.f32.mxu1 %vm2672_vm3, %v8726_v53  ;;  %v5631_v5 = vld [vmem:[#allocation9 + $0x68] sm:$0xff] }
 0x8ca   :  { %7052 = vmatprep.subr.bf16.mxu1 %v7051_v57 }
 0x8cc   :  { %6255 = vmatmul.mubr.msk.f32.gmra.mrb[44].mxu1 %vm2672_vm3, %v8742_v50 }
 0x8cd   :  { %6261 = vmatprep.mubr.msk.f32.mxu1 %vm2672_vm3, %v8750_v28 }
 0x8d0   :  { %6262 = vmatmul.mubr.msk.f32.vlgmr.msra.gmra.mrb[42].mxu1 %vm2672_vm3, %v4594_v26 }
 0x8d1   :  { %7054 = vmatpush3.bf16.msra.mxu1 %v7051_v57  ;;  %6264 = vmatprep.mubr.msk.f32.mxu1 %vm2672_vm3, %v8762_v40  ;;  %v7163_v57 = vpack.c.bf16 %v5631_v5, %v5630_v46 }
 0x8d2   :  { %7056 = vmatprep.subr.bf16.mxu1 %v7055_v56 }
 0x8d4   :  { %6265 = vmatmul.mubr.msk.f32.gmra.mrb[44].mxu1 %vm2672_vm3, %v4596_v19 }
 0x8d5   :  { %6271 = vmatprep.mubr.msk.f32.mxu1 %vm2672_vm3, %v4807_v63 }
 0x8d8   :  { %6272 = vmatmul.mubr.msk.f32.vlgmr.msra.gmra.mrb[42].mxu1 %vm2672_vm3, %v8790_v1 }
 0x8d9   :  { %7058 = vmatpush3.bf16.msra.mxu1 %v7055_v56  ;;  %6274 = vmatprep.mubr.msk.f32.mxu1 %vm2672_vm3, %v8793_v31 }
 0x8da   :  { %7092 = vmatprep.subr.bf16.mxu1 %v8547_v30 }
 0x8dc   :  { %v5089_v15 = vpop.f32.mrb[34].mxu0  ;;  %6275 = vmatmul.mubr.msk.f32.gmra.mrb[44].mxu1 %vm2672_vm3, %v8809_v27 }
 0x8dd   :  { %v5091_v32 = vpop.f32.mrb[35].mxu0  ;;  %6281 = vmatprep.mubr.msk.f32.mxu1 %vm2672_vm3, %v8817_v14 }
 0x8e0   :  { %v5095_v43 = vpop.f32.mrb[36].mxu0  ;;  %6282 = vmatmul.mubr.msk.f32.vlgmr.msra.gmra.mrb[42].mxu1 %vm2672_vm3, %v8829_v23 }
 0x8e1   :  { %v7127_v30 = vpack.c.bf16 %v5095_v43, %v5089_v15  ;;  %v5097_v17 = vpop.f32.mrb[37].mxu0  ;;  %7094 = vmatpush1.bf16.msra.mxu1 %v8552_v21  ;;  %6284 = vmatprep.mubr.msk.f32.mxu1 %vm2672_vm3, %v8832_v38 }
 0x8e2   :  { %v7123_v22 = vpack.c.bf16 %v5097_v17, %v5091_v32  ;;  %7096 = vmatprep.subr.bf16.mxu1 %v8559_v33 }
 0x8e4   :  { %7124 = vmatprep.subr.bf16.mxu0 %v7123_v22  ;;  %6285 = vmatmul.mubr.msk.f32.gmra.mrb[44].mxu1 %vm2672_vm3, %v4921_v25 }
 0x8e5   :  { %7098 = vmatpush1.bf16.msra.mxu1 %v8564_v54  ;;  %7126 = vmatpush3.bf16.msra.mxu0 %v7123_v22 }
 0x8e6   :  { %7128 = vmatprep.subr.bf16.mxu0 %v7127_v30  ;;  %7100 = vmatprep.subr.bf16.mxu1 %v8571_v47 }
 0x8e7   :  { %5164 = vmatprep.mubr.f32.mxu1 %v9052_v55 }
 0x8e8   :  { %6292 = vmatmul.mubr.msk.f32.vlgmr.msra.gmra.mrb[38].mxu0 %vm2672_vm3, %v8723_v24 }
 0x8e9   :  { %7102 = vmatpush1.bf16.msra.mxu1 %v8576_v60  ;;  %7130 = vmatpush3.bf16.msra.mxu0 %v7127_v30 }
 0x8ea   :  { %7104 = vmatprep.subr.bf16.mxu1 %v8583_v20  ;;  %6294 = vmatprep.mubr.msk.f32.mxu0 %vm2672_vm3, %v8726_v53 }
 0x8ec   :  { %6295 = vmatmul.mubr.msk.f32.gmra.mrb[40].mxu0 %vm2672_vm3, %v8742_v50 }
 0x8ed   :  { %7106 = vmatpush1.bf16.msra.mxu1 %v8588_v42  ;;  %6301 = vmatprep.mubr.msk.f32.mxu0 %vm2672_vm3, %v8750_v28 }
 0x8ee   :  { %7108 = vmatprep.subr.bf16.mxu1 %v8595_v36 }
 0x8f0   :  { %6302 = vmatmul.mubr.msk.f32.vlgmr.msra.gmra.mrb[38].mxu0 %vm2672_vm3, %v4594_v26 }
 0x8f1   :  { %7110 = vmatpush1.bf16.msra.mxu1 %v8600_v37  ;;  %6304 = vmatprep.mubr.msk.f32.mxu0 %vm2672_vm3, %v8762_v40 }
 0x8f2   :  { %7112 = vmatprep.subr.bf16.mxu1 %v8607_v41 }
 0x8f4   :  { %6305 = vmatmul.mubr.msk.f32.gmra.mrb[40].mxu0 %vm2672_vm3, %v4596_v19 }
 0x8f5   :  { %7114 = vmatpush1.bf16.msra.mxu1 %v8612_v39  ;;  %6311 = vmatprep.mubr.msk.f32.mxu0 %vm2672_vm3, %v4807_v63 }
 0x8f6   :  { %7116 = vmatprep.subr.bf16.mxu1 %v8619_v29 }
 0x8f9   :  { %7118 = vmatpush1.bf16.msra.mxu1 %v8624_v18  ;;  %v5618_v18 = vld [vmem:[#allocation9] sm:$0xff] }
 0x8fa   :  { %7120 = vmatprep.subr.bf16.mxu1 %v8631_v62  ;;  %v5619_v62 = vld [vmem:[#allocation9 + $0x8] sm:$0xff] }
 0x8fd   :  { %7122 = vmatpush1.bf16.msra.mxu1 %v8636_v9  ;;  %v7139_v9 = vpack.c.bf16 %v5619_v62, %v5618_v18 }
 0x8ff   :  { %7140 = vmatprep.subr.bf16.mxu1 %v7139_v9 }
 0x900   :  { %5165 = vmatmul.mubr.f32.vlgmr.msra.gmra.mrb[46].mxu1 %v4354_v0  ;;  %v5623_v0 = vld [vmem:[#allocation9 + $0x28] sm:$0xff] }
 0x901   :  { %5170 = vmatprep.mubr.f32.mxu1 %v9052_v55  ;;  %7142 = vmatpush3.bf16.msra.mxu1 %v7139_v9  ;;  %v7147_v6 = vpack.c.bf16 %v5623_v0, %v5622_v48 }
 0x902   :  { %7144 = vmatprep.subr.bf16.mxu1 %v7143_v3 }
 0x904   :  { %5171 = vmatmul.mubr.f32.gmra.mrb[48].mxu1 %v4355_v49  ;;  %v5624_v49 = vld [vmem:[#allocation9 + $0x30] sm:$0xff] }
 0x905   :  { %7146 = vmatpush3.bf16.msra.mxu1 %v7143_v3  ;;  %v7151_v59 = vpack.c.bf16 %v5625_v61, %v5624_v49 }
 0x906   :  { %7148 = vmatprep.subr.bf16.mxu1 %v7147_v6 }
 0x909   :  { %7150 = vmatpush3.bf16.msra.mxu1 %v7147_v6 }
 0x90a   :  { %7152 = vmatprep.subr.bf16.mxu1 %v7151_v59 }
 0x90d   :  { %7154 = vmatpush3.bf16.msra.mxu1 %v7151_v59 }
 0x90e   :  { %7156 = vmatprep.subr.bf16.mxu1 %v7155_v7 }
 0x911   :  { %7158 = vmatpush3.bf16.msra.mxu1 %v7155_v7 }
 0x912   :  { %7160 = vmatprep.subr.bf16.mxu1 %v7159_v51 }
 0x915   :  { %7162 = vmatpush3.bf16.msra.mxu1 %v7159_v51 }
 0x916   :  { %7164 = vmatprep.subr.bf16.mxu1 %v7163_v57 }
 0x919   :  { %7166 = vmatpush3.bf16.msra.mxu1 %v7163_v57 }
 0x91a   :  { %7168 = vmatprep.subr.bf16.mxu1 %v7167_v52 }
 0x91d   :  { %7170 = vmatpush3.bf16.msra.mxu1 %v7167_v52 }
 0x9b3   :  { %v8876_v21 = vpop.f32.mrb[42].mxu1 }
 0x9b4   :  { %v8878_v33 = vpop.f32.mrb[43].mxu1 }
 0x9b5   :  { %v5525_v54 = vadd.f32 %v8876_v21, %v8878_v33 }
 0x9b7   :  { %v8882_v47 = vpop.f32.mrb[44].mxu1 }
 0x9b8   :  { %v8884_v60 = vpop.f32.mrb[45].mxu1 }
 0x9b9   :  { %v5526_v20 = vadd.f32 %v5525_v54, %v8884_v60 }
 0x9bb   :  { %v8888_v42 = vadd.f32 %v8882_v47, %v5526_v20 }
 0x9bd   :  { %v5528_v56 = vrot.slane %v8888_v42, 4 }
 0x9bf   :  { %v5529_v45 = vadd.f32 %v5528_v56, %v8888_v42 }
 0x9c1   :  { %v5530_v40 = vrot.slane %v5529_v45, 2 }
 0x9c3   :  { %v5531_v63 = vadd.f32 %v5530_v40, %v5529_v45 }
 0x9c5   :  { %v5532_v10 = vrot.slane %v5531_v63, 1 }
 0x9c7   :  { %v5533_v15 = vadd.f32 %v5532_v10, %v5531_v63 }
 0x9d3   :  { %v5166_v55 = vpop.f32.mrb[46].mxu1 }
 0x9d4   :  { %v5168_v36 = vpop.f32.mrb[47].mxu1 }
 0x9d7   :  { %v5172_v37 = vpop.f32.mrb[48].mxu1 }
 0x9d8   :  { %v7131_v41 = vpack.c.bf16 %v5172_v37, %v5166_v55  ;;  %v5174_v39 = vpop.f32.mrb[49].mxu1 }
 0x9d9   :  { %v7135_v29 = vpack.c.bf16 %v5174_v39, %v5168_v36 }
 0x9da   :  { %7132 = vmatprep.subr.bf16.mxu0 %v7131_v41 }
 0x9db   :  { %7134 = vmatpush3.bf16.msra.mxu0 %v7131_v41 }
 0x9dc   :  { %7136 = vmatprep.subr.bf16.mxu0 %v7135_v29 }
 0x9de   :  { %6312 = vmatmul.mubr.msk.f32.vlgmr.msra.gmra.mrb[38].mxu0 %vm2672_vm3, %v8790_v1 }
 0x9df   :  { %7138 = vmatpush3.bf16.msra.mxu0 %v7135_v29  ;;  %6314 = vmatprep.mubr.msk.f32.mxu0 %vm2672_vm3, %v8793_v31 }
 0x9e0   :  { %7172 = vmatprep.subr.bf16.mxu0 %v7139_v9 }
 0x9e2   :  { %6315 = vmatmul.mubr.msk.f32.gmra.mrb[40].mxu0 %vm2672_vm3, %v8809_v27 }
 0x9e3   :  { %6321 = vmatprep.mubr.msk.f32.mxu0 %vm2672_vm3, %v8817_v14 }
 0x9e6   :  { %6322 = vmatmul.mubr.msk.f32.vlgmr.msra.gmra.mrb[38].mxu0 %vm2672_vm3, %v8829_v23 }
 0x9e7   :  { %6324 = vmatprep.mubr.msk.f32.mxu0 %vm2672_vm3, %v8832_v38  ;;  %7174 = vmatpush3.bf16.msra.mxu0 %v7139_v9 }
 0x9e8   :  { %7176 = vmatprep.subr.bf16.mxu0 %v7143_v3 }
 0x9ea   :  { %6325 = vmatmul.mubr.msk.f32.gmra.mrb[40].mxu0 %vm2672_vm3, %v4921_v25 }
 0x9eb   :  { %7178 = vmatpush3.bf16.msra.mxu0 %v7143_v3 }
 0x9ec   :  { %7180 = vmatprep.subr.bf16.mxu0 %v7147_v6 }
 0x9ef   :  { %7182 = vmatpush3.bf16.msra.mxu0 %v7147_v6 }
 0x9f0   :  { %7184 = vmatprep.subr.bf16.mxu0 %v7151_v59 }
 0x9f3   :  { %7186 = vmatpush3.bf16.msra.mxu0 %v7151_v59 }
 0x9f4   :  { %7188 = vmatprep.subr.bf16.mxu0 %v7155_v7 }
 0x9f7   :  { %7190 = vmatpush3.bf16.msra.mxu0 %v7155_v7 }
 0x9f8   :  { %7192 = vmatprep.subr.bf16.mxu0 %v7159_v51 }
 0x9fb   :  { %7194 = vmatpush3.bf16.msra.mxu0 %v7159_v51 }
 0x9fc   :  { %7196 = vmatprep.subr.bf16.mxu0 %v7163_v57 }
 0x9ff   :  { %7198 = vmatpush3.bf16.msra.mxu0 %v7163_v57  ;;  %v4420_v57 = vld [vmem:[%s8948_s5 + $0x6] ss:$0 sm:$0xff] }
 0xa00   :  { %7200 = vmatprep.subr.bf16.mxu0 %v7167_v52 }
 0xa03   :  { %7202 = vmatpush3.bf16.msra.mxu0 %v7167_v52  ;;  %v4421_v52 = vld [vmem:[%s8948_s5 + $0x7] ss:$0 sm:$0xff] }
 0xab9   :  { %v6323_v34 = vpop.f32.mrb[38].mxu0 }
 0xaba   :  { %v5502_v24 = vpop.f32.mrb[39].mxu0 }
 0xabb   :  { %v5535_v53 = vadd.f32 %v6323_v34, %v5502_v24 }
 0xabd   :  { %v6326_v50 = vpop.f32.mrb[40].mxu0 }
 0xabe   :  { %v5512_v28 = vpop.f32.mrb[41].mxu0 }
 0xabf   :  { %v5536_v26 = vadd.f32 %v5535_v53, %v5512_v28 }
 0xac1   :  { %v5537_v35 = vadd.f32 %v6326_v50, %v5536_v26 }
 0xac3   :  { %v5538_v19 = vrot.slane %v5537_v35, 4 }
 0xac5   :  { %v5539_v1 = vadd.f32 %v5538_v19, %v5537_v35 }
 0xac7   :  { %v5540_v31 = vrot.slane %v5539_v1, 2 }
 0xac9   :  { %v5541_v27 = vadd.f32 %v5540_v31, %v5539_v1 }
 0xacb   :  { %v5542_v14 = vrot.slane %v5541_v27, 1 }
 0xacd   :  { %v5543_v32 = vadd.f32 %v5542_v14, %v5541_v27 }
 0xacf   :  { %v5544_v23 = vadd.f32 %v5543_v32, %v5533_v15 }
 0xad1   :  { %v5545_v38 = vmul.f32 0.016666668, %v5544_v23 }
 0xad3   :  { %v5546_v43 = vsub.f32 %v8878_v33, %v5545_v38  ;;  %v5547_v30 = vsub.f32 %v8876_v21, %v5545_v38  ;;  %v5548_v17 = vsub.f32 %v8884_v60, %v5545_v38  ;;  %v5549_v25 = vsub.f32 %v8882_v47, %v5545_v38 }
 0xad4   :  { %v5554_v22 = vsub.f32 %v5502_v24, %v5545_v38  ;;  %v5555_v54 = vsub.f32 %v6323_v34, %v5545_v38  ;;  %v5556_v20 = vsub.f32 %v5512_v28, %v5545_v38  ;;  %v5557_v42 = vsub.f32 %v6326_v50, %v5545_v38 }
 0xad5   :  { %v5562_v55 = vmul.f32 %v5546_v43, %v5546_v43  ;;  %v5563_v36 = vmul.f32 %v5547_v30, %v5547_v30  ;;  %v5553_v37 = vsel %vm4582_vm8, %v5549_v25, 0.0  ;;  %v5564_v29 = vmul.f32 %v5548_v17, %v5548_v17 }
 0xad6   :  { %v5576_v41 = vmul.f32 %v5554_v22, %v5554_v22  ;;  %v5577_v39 = vmul.f32 %v5555_v54, %v5555_v54  ;;  %v5561_v33 = vsel %vm4582_vm8, %v5557_v42, 0.0  ;;  %v5578_v18 = vmul.f32 %v5556_v20, %v5556_v20 }
 0xad7   :  { %v5566_v21 = vadd.f32 %v5563_v36, %v5562_v55  ;;  %v5565_v62 = vmul.f32 %v5553_v37, %v5553_v37  ;;  %v5579_v9 = vmul.f32 %v5561_v33, %v5561_v33 }
 0xad8   :  { %v5580_v60 = vadd.f32 %v5577_v39, %v5576_v41 }
 0xad9   :  { %v5567_v47 = vadd.f32 %v5566_v21, %v5564_v29 }
 0xada   :  { %v5581_v44 = vadd.f32 %v5580_v60, %v5578_v18 }
 0xadb   :  { %v5568_v12 = vadd.f32 %v5567_v47, %v5565_v62 }
 0xadc   :  { %v5582_v3 = vadd.f32 %v5581_v44, %v5579_v9 }
 0xadd   :  { %v5569_v48 = vrot.slane %v5568_v12, 4 }
 0xade   :  { %v5583_v0 = vrot.slane %v5582_v3, 4 }
 0xadf   :  { %v5570_v6 = vadd.f32 %v5569_v48, %v5568_v12 }
 0xae0   :  { %v5584_v49 = vadd.f32 %v5583_v0, %v5582_v3 }
 0xae1   :  { %v5571_v61 = vrot.slane %v5570_v6, 2 }
 0xae2   :  { %v5585_v59 = vrot.slane %v5584_v49, 2 }
 0xae3   :  { %v5572_v11 = vadd.f32 %v5571_v61, %v5570_v6 }
 0xae4   :  { %v5586_v58 = vadd.f32 %v5585_v59, %v5584_v49 }
 0xae5   :  { %v5573_v2 = vrot.slane %v5572_v11, 1 }
 0xae6   :  { %v5587_v7 = vrot.slane %v5586_v58, 1 }
 0xae7   :  { %v5574_v16 = vadd.f32 %v5573_v2, %v5572_v11 }
 0xae8   :  { %v5588_v8 = vadd.f32 %v5587_v7, %v5586_v58 }
 0xaea   :  { %v5589_v51 = vadd.f32 %v5588_v8, %v5574_v16 }
 0xaec   :  { %v5590_v46 = vmul.f32 0.016666668, %v5589_v51 }
 0xaee   :  { %v5591_v5 = vadd.f32 1e-05, %v5590_v46 }
 0xaf0   :  { %7287 = vrsqrt.f32 %v5591_v5 }
 0xafa   :  { %v7288_v13 = vpop.eup %7287 }
 0xafb   :  { %v5593_v4 = vmul.f32 %v7288_v13, %v4420_v57 }
 0xafd   :  { %v5607_v56 = vmul.f32 %v5593_v4, %v5555_v54  ;;  %v5608_v34 = vmul.f32 %v5593_v4, %v5556_v20  ;;  %v5594_v24 = vmul.f32 %v5593_v4, %v5546_v43  ;;  %v5606_v53 = vmul.f32 %v5593_v4, %v5554_v22 }
 0xafe   :  { %v5595_v45 = vmul.f32 %v5593_v4, %v5547_v30  ;;  %v5596_v50 = vmul.f32 %v5593_v4, %v5548_v17  ;;  %v5597_v28 = vmul.f32 %v5593_v4, %v5553_v37  ;;  %v5609_v26 = vmul.f32 %v5593_v4, %v5561_v33 }
 0xaff   :  { %v5598_v40 = vadd.f32 %v5594_v24, %v4421_v52  ;;  %v5610_v35 = vadd.f32 %v5606_v53, %v4421_v52  ;;  %v5611_v19 = vadd.f32 %v5607_v56, %v4421_v52  ;;  %v5612_v63 = vadd.f32 %v5608_v34, %v4421_v52 }
 0xb00   :  { %v5599_v1 = vadd.f32 %v5595_v45, %v4421_v52  ;;  %v5600_v31 = vadd.f32 %v5596_v50, %v4421_v52  ;;  %v5601_v32 = vadd.f32 %v5597_v28, %v4421_v52  ;;  %v5613_v23 = vadd.f32 %v5609_v26, %v4421_v52 }
 0xb01   :  { %v5602_v10 = vmax.f32 %v5598_v40, 0.0  ;;  %v5614_v27 = vmax.f32 %v5610_v35, 0.0  ;;  %v5615_v14 = vmax.f32 %v5611_v19, 0.0  ;;  %v5616_v43 = vmax.f32 %v5612_v63, 0.0 }
 0xb02   :  { %v5603_v15 = vmax.f32 %v5599_v1, 0.0  ;;  %v5604_v38 = vmax.f32 %v5600_v31, 0.0  ;;  %v5605_v30 = vmax.f32 %v5601_v32, 0.0  ;;  %v5617_v17 = vmax.f32 %v5613_v23, 0.0 }
 0xb03   :  { %6359 = vmatprep.mubr.f32.mxu1 %v5602_v10  ;;  %6397 = vmatprep.mubr.f32.mxu0 %v5614_v27 }
 0xb04   :  { %6360 = vmatmul.mubr.f32.vlgmr.msra.gmra.mrb[50].mxu1 %v5603_v15  ;;  %6398 = vmatmul.mubr.f32.vlgmr.msra.gmra.mrb[42].mxu0 %v5615_v14 }
 0xb05   :  { %6362 = vmatprep.mubr.f32.mxu1 %v5604_v38  ;;  %6400 = vmatprep.mubr.f32.mxu0 %v5616_v43 }
 0xb08   :  { %6363 = vmatmul.mubr.f32.gmra.mrb[52].mxu1 %v5605_v30  ;;  %6401 = vmatmul.mubr.f32.gmra.mrb[44].mxu0 %v5617_v17 }
 0xbd7   :  { %v6361_v25 = vpop.f32.mrb[50].mxu1  ;;  %v6399_v22 = vpop.f32.mrb[42].mxu0 }
 0xbd8   :  { %7289 = vtanh.f32 %v6361_v25  ;;  %v5700_v54 = vpop.f32.mrb[51].mxu1  ;;  %v5793_v20 = vpop.f32.mrb[43].mxu0 }
 0xbd9   :  { %7291 = vtanh.f32 %v6399_v22 }
 0xbda   :  { %7293 = vtanh.f32 %v5700_v54 }
 0xbdb   :  { %7295 = vtanh.f32 %v5793_v20  ;;  %v6364_v42 = vpop.f32.mrb[52].mxu1  ;;  %v6402_v55 = vpop.f32.mrb[44].mxu0 }
 0xbdc   :  { %7297 = vtanh.f32 %v6364_v42  ;;  %v5710_v36 = vpop.f32.mrb[53].mxu1  ;;  %v5803_v37 = vpop.f32.mrb[45].mxu0 }
 0xbdd   :  { %7299 = vtanh.f32 %v6402_v55 }
 0xbde   :  { %7301 = vtanh.f32 %v5710_v36 }
 0xbdf   :  { %7303 = vtanh.f32 %v5803_v37 }
 0xbe2   :  { %v7290_v41 = vpop.eup %7289 }
 0xbe3   :  { %v7292_v39 = vpop.eup %7291  ;;  %5724 = vst [vmem:[%s8950_s7 + $0x8] sm:$0xff] %v7290_v41 }
 0xbe4   :  { %v7294_v33 = vpop.eup %7293  ;;  %5817 = vst [vmem:[%s8950_s7 + $0x28] sm:$0xff] %v7292_v39 }
 0xbe5   :  { %v7296_v29 = vpop.eup %7295  ;;  %5723 = vst [vmem:[%s8950_s7] sm:$0xff] %v7294_v33 }
 0xbe6   :  { %v7298_v21 = vpop.eup %7297  ;;  %5816 = vst [vmem:[%s8950_s7 + $0x20] sm:$0xff] %v7296_v29 }
 0xbe7   :  { %v7300_v18 = vpop.eup %7299  ;;  %5726 = vst [vmem:[%s8950_s7 + $0x18] sm:$0xff] %v7298_v21 }
 0xbe8   :  { %v7302_v60 = vpop.eup %7301  ;;  %5819 = vst [vmem:[%s8950_s7 + $0x38] sm:$0xff] %v7300_v18 }
 0xbe9   :  { %v7304_v62 = vpop.eup %7303  ;;  %5725 = vst [vmem:[%s8950_s7 + $0x10] sm:$0xff] %v7302_v60 }
 0xbea   :  { %5818 = vst [vmem:[%s8950_s7 + $0x30] sm:$0xff] %v7304_v62 }
 0xbeb   :  { %5824 = vsyncpa [#allocation3], 1 }
 0xbec   :  { %5825 = vsyncpa [#allocation5], 1 }
 0xbed   :  { %5826 = vsyncpa [#allocation8], 1 }

</bundles_post_ra>
